<compile_context>
chip_gen: v7x
topology: tpu7x:2x2x1
jax: 0.10.0
libtpu: 0.0.40
codegen_flags: <defaults>
</compile_context>

<pallas_src>
import jax
import jax.numpy as jnp
from jax import lax
from jax.experimental import pallas as pl
from jax.experimental.pallas import tpu as pltpu


def _down_kernel(x_ref, w1_ref, w2_ref, scal_ref, o_ref, p1_ref, p2_ref):
    # x_ref:    (N, H, W, Cin)        input activations (NHWC)
    # w1_ref:   (9*Cin,  Cout)        conv1 weights, taps stacked along K
    # w2_ref:   (9*Cout, Cout)        conv2 weights, taps stacked along K
    # scal_ref: (6, Cout)             rows = b1, g1, beta1, b2, g2, beta2
    # o_ref:    (N, H2, W2, Cout)     output (NHWC)
    # p1_ref:   (N, H2+2, W2+2, Cin)  padded scratch for the pooled input
    # p2_ref:   (N, H2+2, W2+2, Cout) padded scratch for y1
    N, H, W, Cin = x_ref.shape
    H2, W2 = H // 2, W // 2
    Cout = o_ref.shape[-1]
    rows = N * H2 * W2

    # ---------------- MaxPool2d(kernel=2, stride=2) ----------------
    # W pairs via strided loads straight from the ref (C stays on lanes).
    xw = jnp.maximum(x_ref[:, :, pl.ds(0, W2, 2), :],
                     x_ref[:, :, pl.ds(1, W2, 2), :]).astype(jnp.float32)
    # H pairs: split the (leading) H axis and reduce the size-2 dim (pure VPU).
    xp = jnp.max(xw.reshape(N, H2, 2, W2, Cin), axis=2)        # (N, H2, W2, Cin)

    # Stage the pooled activation into a zero-padded VMEM scratch ('same' pad=1).
    p1_ref[...] = jnp.zeros_like(p1_ref)
    p1_ref[:, 1:H2 + 1, 1:W2 + 1, :] = xp

    def conv3x3(pad_ref, w_ref):
        # 3x3 'same' conv as a single matmul: 9 taps read as static windows of
        # the padded ref and stacked along the contraction axis (im2col-lite).
        C = pad_ref.shape[-1]
        taps = []
        for dy in range(3):
            for dx in range(3):
                t = pad_ref[:, dy:dy + H2, dx:dx + W2, :]      # (N, H2, W2, C)
                taps.append(t.reshape(rows, C))
        patches = jnp.concatenate(taps, axis=-1)               # (rows, 9*C)
        # K = 9*C fat MXU matmul (keep f32 to match PyTorch numerics; bf16
        # inputs would double MXU throughput on v6e/v7x if precision allows).
        return jnp.dot(patches, w_ref[...],
                       preferred_element_type=jnp.float32)     # (rows, Cout)

    def bn_relu(z, b, g, bt, eps=1e-5):
        # Training-mode BatchNorm: batch mean, biased variance (centered form,
        # clamped at 0 so rsqrt never sees a negative value).
        z = z + b                                              # conv bias
        mean = jnp.mean(z, axis=0, keepdims=True)
        d = z - mean
        var = jnp.maximum(jnp.mean(d * d, axis=0, keepdims=True), 0.0)
        return jnp.maximum(d * lax.rsqrt(var + eps) * g + bt, 0.0)

    b1, g1, bt1 = scal_ref[0:1, :], scal_ref[1:2, :], scal_ref[2:3, :]
    b2, g2, bt2 = scal_ref[3:4, :], scal_ref[4:5, :], scal_ref[5:6, :]

    # Conv1 -> BN1 -> ReLU, staged into the second padded scratch.
    y1 = bn_relu(conv3x3(p1_ref, w1_ref), b1, g1, bt1)         # (rows, Cout)
    p2_ref[...] = jnp.zeros_like(p2_ref)
    p2_ref[:, 1:H2 + 1, 1:W2 + 1, :] = y1.reshape(N, H2, W2, Cout)

    # Conv2 -> BN2 -> ReLU.
    y2 = bn_relu(conv3x3(p2_ref, w2_ref), b2, g2, bt2)
    # TODO(synk): for Cout < 128 a lane-dense (N, H2*W2*Cout) store would cut
    #             masked vst traffic, at the cost of a sublane->lane relayout.
    o_ref[...] = y2.reshape(N, H2, W2, Cout).astype(o_ref.dtype)


def prepare_down_params(params):
    """One-time repack of PyTorch-layout parameters (hoisted off the hot path)."""
    w1, b1, g1, bt1, w2, b2, g2, bt2 = params
    Cout, Cin = w1.shape[0], w1.shape[1]
    # OIHW -> (ky, kx, cin, cout) -> (9*cin, cout); K order matches the kernel's
    # (dy, dx, cin) tap-concatenation order.
    w1_k = jnp.transpose(w1, (2, 3, 1, 0)).reshape(9 * Cin, Cout).astype(jnp.float32)
    w2_k = jnp.transpose(w2, (2, 3, 1, 0)).reshape(9 * Cout, Cout).astype(jnp.float32)
    scal = jnp.stack([b1, g1, bt1, b2, g2, bt2], axis=0).astype(jnp.float32)  # (6, Cout)
    return w1_k, w2_k, scal


@jax.jit
def down_forward(x_nchw, packed_params):
    """Down.forward: x (N, Cin, H, W) -> (N, Cout, H/2, W/2)."""
    w1_k, w2_k, scal = packed_params
    N, Cin, H, W = x_nchw.shape
    Cout = w1_k.shape[-1]
    H2, W2 = H // 2, W // 2

    # NCHW -> NHWC at the interface boundary; the kernel is NHWC-native.
    x_nhwc = jnp.transpose(x_nchw, (0, 2, 3, 1))

    vmem = pl.BlockSpec(memory_space=pltpu.MemorySpace.VMEM)
    out_nhwc = pl.pallas_call(
        _down_kernel,
        out_shape=jax.ShapeDtypeStruct((N, H2, W2, Cout), x_nchw.dtype),
        in_specs=[vmem, vmem, vmem, vmem],
        out_specs=vmem,
        scratch_shapes=[
            pltpu.VMEM((N, H2 + 2, W2 + 2, Cin), jnp.float32),
            pltpu.VMEM((N, H2 + 2, W2 + 2, Cout), jnp.float32),
        ],
        compiler_params=pltpu.CompilerParams(
            vmem_limit_bytes=48 * 1024 * 1024),
    )(x_nhwc, w1_k, w2_k, scal)

    return jnp.transpose(out_nhwc, (0, 3, 1, 2))  # back to NCHW


def _reference(x_nchw, params, eps=1e-5):
    """Pure-JAX NCHW reference matching PyTorch training-mode semantics."""
    w1, b1, g1, bt1, w2, b2, g2, bt2 = params
    x = lax.reduce_window(x_nchw, -jnp.inf, lax.max,
                          (1, 1, 2, 2), (1, 1, 2, 2), 'VALID')

    def conv_bn_relu(x, w, b, g, bt):
        y = lax.conv_general_dilated(x, w, (1, 1), ((1, 1), (1, 1)),
                                     dimension_numbers=('NCHW', 'OIHW', 'NCHW'))
        y = y + b.reshape(1, -1, 1, 1)
        mean = jnp.mean(y, axis=(0, 2, 3), keepdims=True)
        var = jnp.var(y, axis=(0, 2, 3), keepdims=True)  # biased
        y = (y - mean) * lax.rsqrt(var + eps)
        y = y * g.reshape(1, -1, 1, 1) + bt.reshape(1, -1, 1, 1)
        return jnp.maximum(y, 0.0)

    x = conv_bn_relu(x, w1, b1, g1, bt1)
    x = conv_bn_relu(x, w2, b2, g2, bt2)
    return x


if __name__ == "__main__":
    key = jax.random.PRNGKey(0)
    N, Cin, Cout, H, W = 2, 4, 8, 16, 16

    k = jax.random.split(key, 9)
    x = jax.random.normal(k[0], (N, Cin, H, W), jnp.float32)

    # Deterministic parameter init (shapes per nn.Conv2d / nn.BatchNorm2d).
    w1 = jax.random.normal(k[1], (Cout, Cin, 3, 3), jnp.float32) * 0.1
    b1 = jax.random.normal(k[2], (Cout,), jnp.float32) * 0.1
    g1 = 1.0 + 0.1 * jax.random.normal(k[3], (Cout,), jnp.float32)
    bt1 = 0.1 * jax.random.normal(k[4], (Cout,), jnp.float32)
    w2 = jax.random.normal(k[5], (Cout, Cout, 3, 3), jnp.float32) * 0.1
    b2 = jax.random.normal(k[6], (Cout,), jnp.float32) * 0.1
    g2 = 1.0 + 0.1 * jax.random.normal(k[7], (Cout,), jnp.float32)
    bt2 = 0.1 * jax.random.normal(k[8], (Cout,), jnp.float32)
    params = (w1, b1, g1, bt1, w2, b2, g2, bt2)

    packed = prepare_down_params(params)   # one-time weight/scalar repack
    out = down_forward(x, packed)
    jax.block_until_ready(out)

    ref = _reference(x, params)
    assert out.shape == (N, Cout, H // 2, W // 2), out.shape
    assert jnp.allclose(out, ref, atol=1e-4, rtol=1e-4), \
        float(jnp.max(jnp.abs(out - ref)))

    print("KERNEL_OK")
</pallas_src>

<mosaic_0001>
module attributes {stable_mosaic.version = 11 : i64} {
  func.func @_down_kernel(%arg0: memref<2x16x16x4xf32, #tpu.memory_space<vmem>>, %arg1: memref<36x8xf32, #tpu.memory_space<vmem>>, %arg2: memref<72x8xf32, #tpu.memory_space<vmem>>, %arg3: memref<6x8xf32, #tpu.memory_space<vmem>>, %arg4: memref<2x8x8x8xf32, #tpu.memory_space<vmem>>, %arg5: memref<2x10x10x4xf32, #tpu.memory_space<vmem>>, %arg6: memref<2x10x10x8xf32, #tpu.memory_space<vmem>>) attributes {dimension_semantics = [], scalar_prefetch = 0 : i64, scratch_operands = 2 : i64, tpu.core_type = #tpu.core_type<tc>} {
    %c0 = arith.constant 0 : index
    %c0_0 = arith.constant 0 : index
    %c0_1 = arith.constant 0 : index
    %c0_2 = arith.constant 0 : index
    %0 = tpu.strided_load %arg0[%c0, %c0_0, %c0_1, %c0_2] {strides = array<i32: 1, 1, 2, 1>} : memref<2x16x16x4xf32, #tpu.memory_space<vmem>>, vector<2x16x8x4xf32>
    %c0_3 = arith.constant 0 : index
    %c0_4 = arith.constant 0 : index
    %c1 = arith.constant 1 : index
    %c0_5 = arith.constant 0 : index
    %1 = tpu.strided_load %arg0[%c0_3, %c0_4, %c1, %c0_5] {strides = array<i32: 1, 1, 2, 1>} : memref<2x16x16x4xf32, #tpu.memory_space<vmem>>, vector<2x16x8x4xf32>
    %2 = arith.maximumf %0, %1 : vector<2x16x8x4xf32>
    %3 = vector.shape_cast %2 : vector<2x16x8x4xf32> to vector<2x8x2x8x4xf32>
    %cst = arith.constant dense<0xFF800000> : vector<2x8x8x4xf32>
    %4 = vector.multi_reduction <maximumf>, %3, %cst [2] : vector<2x8x2x8x4xf32> to vector<2x8x8x4xf32>
    %cst_6 = arith.constant 0.000000e+00 : f32
    %5 = vector.broadcast %cst_6 : f32 to vector<2x10x10x4xf32>
    %c0_7 = arith.constant 0 : index
    %c0_8 = arith.constant 0 : index
    %c0_9 = arith.constant 0 : index
    %c0_10 = arith.constant 0 : index
    %6 = vector.load %arg5[%c0_7, %c0_8, %c0_9, %c0_10] : memref<2x10x10x4xf32, #tpu.memory_space<vmem>>, vector<2x10x10x4xf32>
    tpu.vector_store %arg5[%c0_7, %c0_8, %c0_9, %c0_10], %5 {strides = array<i32>} : memref<2x10x10x4xf32, #tpu.memory_space<vmem>>, vector<2x10x10x4xf32>,
    %c0_11 = arith.constant 0 : index
    %c1_12 = arith.constant 1 : index
    %c1_13 = arith.constant 1 : index
    %c0_14 = arith.constant 0 : index
    %7 = vector.load %arg5[%c0_11, %c1_12, %c1_13, %c0_14] : memref<2x10x10x4xf32, #tpu.memory_space<vmem>>, vector<2x8x8x4xf32>
    tpu.vector_store %arg5[%c0_11, %c1_12, %c1_13, %c0_14], %4 {strides = array<i32>} : memref<2x10x10x4xf32, #tpu.memory_space<vmem>>, vector<2x8x8x4xf32>,
    %c0_15 = arith.constant 0 : index
    %c0_16 = arith.constant 0 : index
    %8 = vector.load %arg3[%c0_15, %c0_16] : memref<6x8xf32, #tpu.memory_space<vmem>>, vector<1x8xf32>
    %c1_17 = arith.constant 1 : index
    %c0_18 = arith.constant 0 : index
    %9 = vector.load %arg3[%c1_17, %c0_18] : memref<6x8xf32, #tpu.memory_space<vmem>>, vector<1x8xf32>
    %c2 = arith.constant 2 : index
    %c0_19 = arith.constant 0 : index
    %10 = vector.load %arg3[%c2, %c0_19] : memref<6x8xf32, #tpu.memory_space<vmem>>, vector<1x8xf32>
    %c3 = arith.constant 3 : index
    %c0_20 = arith.constant 0 : index
    %11 = vector.load %arg3[%c3, %c0_20] : memref<6x8xf32, #tpu.memory_space<vmem>>, vector<1x8xf32>
    %c4 = arith.constant 4 : index
    %c0_21 = arith.constant 0 : index
    %12 = vector.load %arg3[%c4, %c0_21] : memref<6x8xf32, #tpu.memory_space<vmem>>, vector<1x8xf32>
    %c5 = arith.constant 5 : index
    %c0_22 = arith.constant 0 : index
    %13 = vector.load %arg3[%c5, %c0_22] : memref<6x8xf32, #tpu.memory_space<vmem>>, vector<1x8xf32>
    %c0_23 = arith.constant 0 : index
    %c0_24 = arith.constant 0 : index
    %c0_25 = arith.constant 0 : index
    %c0_26 = arith.constant 0 : index
    %14 = vector.load %arg5[%c0_23, %c0_24, %c0_25, %c0_26] : memref<2x10x10x4xf32, #tpu.memory_space<vmem>>, vector<2x8x8x4xf32>
    %15 = vector.shape_cast %14 : vector<2x8x8x4xf32> to vector<128x4xf32>
    %c0_27 = arith.constant 0 : index
    %c0_28 = arith.constant 0 : index
    %c1_29 = arith.constant 1 : index
    %c0_30 = arith.constant 0 : index
    %16 = vector.load %arg5[%c0_27, %c0_28, %c1_29, %c0_30] : memref<2x10x10x4xf32, #tpu.memory_space<vmem>>, vector<2x8x8x4xf32>
    %17 = vector.shape_cast %16 : vector<2x8x8x4xf32> to vector<128x4xf32>
    %c0_31 = arith.constant 0 : index
    %c0_32 = arith.constant 0 : index
    %c2_33 = arith.constant 2 : index
    %c0_34 = arith.constant 0 : index
    %18 = vector.load %arg5[%c0_31, %c0_32, %c2_33, %c0_34] : memref<2x10x10x4xf32, #tpu.memory_space<vmem>>, vector<2x8x8x4xf32>
    %19 = vector.shape_cast %18 : vector<2x8x8x4xf32> to vector<128x4xf32>
    %c0_35 = arith.constant 0 : index
    %c1_36 = arith.constant 1 : index
    %c0_37 = arith.constant 0 : index
    %c0_38 = arith.constant 0 : index
    %20 = vector.load %arg5[%c0_35, %c1_36, %c0_37, %c0_38] : memref<2x10x10x4xf32, #tpu.memory_space<vmem>>, vector<2x8x8x4xf32>
    %21 = vector.shape_cast %20 : vector<2x8x8x4xf32> to vector<128x4xf32>
    %c0_39 = arith.constant 0 : index
    %c1_40 = arith.constant 1 : index
    %c1_41 = arith.constant 1 : index
    %c0_42 = arith.constant 0 : index
    %22 = vector.load %arg5[%c0_39, %c1_40, %c1_41, %c0_42] : memref<2x10x10x4xf32, #tpu.memory_space<vmem>>, vector<2x8x8x4xf32>
    %23 = vector.shape_cast %22 : vector<2x8x8x4xf32> to vector<128x4xf32>
    %c0_43 = arith.constant 0 : index
    %c1_44 = arith.constant 1 : index
    %c2_45 = arith.constant 2 : index
    %c0_46 = arith.constant 0 : index
    %24 = vector.load %arg5[%c0_43, %c1_44, %c2_45, %c0_46] : memref<2x10x10x4xf32, #tpu.memory_space<vmem>>, vector<2x8x8x4xf32>
    %25 = vector.shape_cast %24 : vector<2x8x8x4xf32> to vector<128x4xf32>
    %c0_47 = arith.constant 0 : index
    %c2_48 = arith.constant 2 : index
    %c0_49 = arith.constant 0 : index
    %c0_50 = arith.constant 0 : index
    %26 = vector.load %arg5[%c0_47, %c2_48, %c0_49, %c0_50] : memref<2x10x10x4xf32, #tpu.memory_space<vmem>>, vector<2x8x8x4xf32>
    %27 = vector.shape_cast %26 : vector<2x8x8x4xf32> to vector<128x4xf32>
    %c0_51 = arith.constant 0 : index
    %c2_52 = arith.constant 2 : index
    %c1_53 = arith.constant 1 : index
    %c0_54 = arith.constant 0 : index
    %28 = vector.load %arg5[%c0_51, %c2_52, %c1_53, %c0_54] : memref<2x10x10x4xf32, #tpu.memory_space<vmem>>, vector<2x8x8x4xf32>
    %29 = vector.shape_cast %28 : vector<2x8x8x4xf32> to vector<128x4xf32>
    %c0_55 = arith.constant 0 : index
    %c2_56 = arith.constant 2 : index
    %c2_57 = arith.constant 2 : index
    %c0_58 = arith.constant 0 : index
    %30 = vector.load %arg5[%c0_55, %c2_56, %c2_57, %c0_58] : memref<2x10x10x4xf32, #tpu.memory_space<vmem>>, vector<2x8x8x4xf32>
    %31 = vector.shape_cast %30 : vector<2x8x8x4xf32> to vector<128x4xf32>
    %32 = tpu.concatenate %15, %17, %19, %21, %23, %25, %27, %29, %31 in 1 : vector<128x4xf32>, vector<128x4xf32>, vector<128x4xf32>, vector<128x4xf32>, vector<128x4xf32>, vector<128x4xf32>, vector<128x4xf32>, vector<128x4xf32>, vector<128x4xf32> -> vector<128x36xf32>
    %c0_59 = arith.constant 0 : index
    %c0_60 = arith.constant 0 : index
    %33 = vector.load %arg1[%c0_59, %c0_60] : memref<36x8xf32, #tpu.memory_space<vmem>>, vector<36x8xf32>
    %cst_61 = arith.constant dense<0.000000e+00> : vector<128x8xf32>
    %34 = tpu.matmul %32, %33, %cst_61 {dimension_numbers = #tpu.dot_dimension_numbers<[1], [0], [0], [1], [0, 0, 1, 1], [], []>} : vector<128x36xf32>, vector<36x8xf32>, vector<128x8xf32> -> vector<128x8xf32>
    %35 = vector.broadcast %8 : vector<1x8xf32> to vector<128x8xf32>
    %36 = arith.addf %34, %35 : vector<128x8xf32>
    %cst_62 = arith.constant dense<0.000000e+00> : vector<8xf32>
    %37 = vector.multi_reduction <add>, %36, %cst_62 [0] : vector<128x8xf32> to vector<8xf32>
    %38 = vector.shape_cast %37 : vector<8xf32> to vector<1x8xf32>
    %cst_63 = arith.constant 1.280000e+02 : f32
    %39 = vector.broadcast %cst_63 : f32 to vector<1x8xf32>
    %40 = arith.divf %38, %39 : vector<1x8xf32>
    %41 = vector.broadcast %40 : vector<1x8xf32> to vector<128x8xf32>
    %42 = arith.subf %36, %41 : vector<128x8xf32>
    %43 = arith.mulf %42, %42 : vector<128x8xf32>
    %cst_64 = arith.constant dense<0.000000e+00> : vector<8xf32>
    %44 = vector.multi_reduction <add>, %43, %cst_64 [0] : vector<128x8xf32> to vector<8xf32>
    %45 = vector.shape_cast %44 : vector<8xf32> to vector<1x8xf32>
    %cst_65 = arith.constant 1.280000e+02 : f32
    %46 = vector.broadcast %cst_65 : f32 to vector<1x8xf32>
    %47 = arith.divf %45, %46 : vector<1x8xf32>
    %cst_66 = arith.constant 0.000000e+00 : f32
    %48 = vector.broadcast %cst_66 : f32 to vector<1x8xf32>
    %49 = arith.maximumf %47, %48 : vector<1x8xf32>
    %cst_67 = arith.constant 9.99999974E-6 : f32
    %50 = vector.broadcast %cst_67 : f32 to vector<1x8xf32>
    %51 = arith.addf %49, %50 : vector<1x8xf32>
    %52 = math.rsqrt %51 : vector<1x8xf32>
    %53 = vector.broadcast %52 : vector<1x8xf32> to vector<128x8xf32>
    %54 = arith.mulf %42, %53 : vector<128x8xf32>
    %55 = vector.broadcast %9 : vector<1x8xf32> to vector<128x8xf32>
    %56 = arith.mulf %54, %55 : vector<128x8xf32>
    %57 = vector.broadcast %10 : vector<1x8xf32> to vector<128x8xf32>
    %58 = arith.addf %56, %57 : vector<128x8xf32>
    %cst_68 = arith.constant 0.000000e+00 : f32
    %59 = vector.broadcast %cst_68 : f32 to vector<128x8xf32>
    %60 = arith.maximumf %58, %59 : vector<128x8xf32>
    %cst_69 = arith.constant 0.000000e+00 : f32
    %61 = vector.broadcast %cst_69 : f32 to vector<2x10x10x8xf32>
    %c0_70 = arith.constant 0 : index
    %c0_71 = arith.constant 0 : index
    %c0_72 = arith.constant 0 : index
    %c0_73 = arith.constant 0 : index
    %62 = vector.load %arg6[%c0_70, %c0_71, %c0_72, %c0_73] : memref<2x10x10x8xf32, #tpu.memory_space<vmem>>, vector<2x10x10x8xf32>
    tpu.vector_store %arg6[%c0_70, %c0_71, %c0_72, %c0_73], %61 {strides = array<i32>} : memref<2x10x10x8xf32, #tpu.memory_space<vmem>>, vector<2x10x10x8xf32>,
    %63 = vector.shape_cast %60 : vector<128x8xf32> to vector<2x8x8x8xf32>
    %c0_74 = arith.constant 0 : index
    %c1_75 = arith.constant 1 : index
    %c1_76 = arith.constant 1 : index
    %c0_77 = arith.constant 0 : index
    %64 = vector.load %arg6[%c0_74, %c1_75, %c1_76, %c0_77] : memref<2x10x10x8xf32, #tpu.memory_space<vmem>>, vector<2x8x8x8xf32>
    tpu.vector_store %arg6[%c0_74, %c1_75, %c1_76, %c0_77], %63 {strides = array<i32>} : memref<2x10x10x8xf32, #tpu.memory_space<vmem>>, vector<2x8x8x8xf32>,
    %c0_78 = arith.constant 0 : index
    %c0_79 = arith.constant 0 : index
    %c0_80 = arith.constant 0 : index
    %c0_81 = arith.constant 0 : index
    %65 = vector.load %arg6[%c0_78, %c0_79, %c0_80, %c0_81] : memref<2x10x10x8xf32, #tpu.memory_space<vmem>>, vector<2x8x8x8xf32>
    %66 = vector.shape_cast %65 : vector<2x8x8x8xf32> to vector<128x8xf32>
    %c0_82 = arith.constant 0 : index
    %c0_83 = arith.constant 0 : index
    %c1_84 = arith.constant 1 : index
    %c0_85 = arith.constant 0 : index
    %67 = vector.load %arg6[%c0_82, %c0_83, %c1_84, %c0_85] : memref<2x10x10x8xf32, #tpu.memory_space<vmem>>, vector<2x8x8x8xf32>
    %68 = vector.shape_cast %67 : vector<2x8x8x8xf32> to vector<128x8xf32>
    %c0_86 = arith.constant 0 : index
    %c0_87 = arith.constant 0 : index
    %c2_88 = arith.constant 2 : index
    %c0_89 = arith.constant 0 : index
    %69 = vector.load %arg6[%c0_86, %c0_87, %c2_88, %c0_89] : memref<2x10x10x8xf32, #tpu.memory_space<vmem>>, vector<2x8x8x8xf32>
    %70 = vector.shape_cast %69 : vector<2x8x8x8xf32> to vector<128x8xf32>
    %c0_90 = arith.constant 0 : index
    %c1_91 = arith.constant 1 : index
    %c0_92 = arith.constant 0 : index
    %c0_93 = arith.constant 0 : index
    %71 = vector.load %arg6[%c0_90, %c1_91, %c0_92, %c0_93] : memref<2x10x10x8xf32, #tpu.memory_space<vmem>>, vector<2x8x8x8xf32>
    %72 = vector.shape_cast %71 : vector<2x8x8x8xf32> to vector<128x8xf32>
    %c0_94 = arith.constant 0 : index
    %c1_95 = arith.constant 1 : index
    %c1_96 = arith.constant 1 : index
    %c0_97 = arith.constant 0 : index
    %73 = vector.load %arg6[%c0_94, %c1_95, %c1_96, %c0_97] : memref<2x10x10x8xf32, #tpu.memory_space<vmem>>, vector<2x8x8x8xf32>
    %74 = vector.shape_cast %73 : vector<2x8x8x8xf32> to vector<128x8xf32>
    %c0_98 = arith.constant 0 : index
    %c1_99 = arith.constant 1 : index
    %c2_100 = arith.constant 2 : index
    %c0_101 = arith.constant 0 : index
    %75 = vector.load %arg6[%c0_98, %c1_99, %c2_100, %c0_101] : memref<2x10x10x8xf32, #tpu.memory_space<vmem>>, vector<2x8x8x8xf32>
    %76 = vector.shape_cast %75 : vector<2x8x8x8xf32> to vector<128x8xf32>
    %c0_102 = arith.constant 0 : index
    %c2_103 = arith.constant 2 : index
    %c0_104 = arith.constant 0 : index
    %c0_105 = arith.constant 0 : index
    %77 = vector.load %arg6[%c0_102, %c2_103, %c0_104, %c0_105] : memref<2x10x10x8xf32, #tpu.memory_space<vmem>>, vector<2x8x8x8xf32>
    %78 = vector.shape_cast %77 : vector<2x8x8x8xf32> to vector<128x8xf32>
    %c0_106 = arith.constant 0 : index
    %c2_107 = arith.constant 2 : index
    %c1_108 = arith.constant 1 : index
    %c0_109 = arith.constant 0 : index
    %79 = vector.load %arg6[%c0_106, %c2_107, %c1_108, %c0_109] : memref<2x10x10x8xf32, #tpu.memory_space<vmem>>, vector<2x8x8x8xf32>
    %80 = vector.shape_cast %79 : vector<2x8x8x8xf32> to vector<128x8xf32>
    %c0_110 = arith.constant 0 : index
    %c2_111 = arith.constant 2 : index
    %c2_112 = arith.constant 2 : index
    %c0_113 = arith.constant 0 : index
    %81 = vector.load %arg6[%c0_110, %c2_111, %c2_112, %c0_113] : memref<2x10x10x8xf32, #tpu.memory_space<vmem>>, vector<2x8x8x8xf32>
    %82 = vector.shape_cast %81 : vector<2x8x8x8xf32> to vector<128x8xf32>
    %83 = tpu.concatenate %66, %68, %70, %72, %74, %76, %78, %80, %82 in 1 : vector<128x8xf32>, vector<128x8xf32>, vector<128x8xf32>, vector<128x8xf32>, vector<128x8xf32>, vector<128x8xf32>, vector<128x8xf32>, vector<128x8xf32>, vector<128x8xf32> -> vector<128x72xf32>
    %c0_114 = arith.constant 0 : index
    %c0_115 = arith.constant 0 : index
    %84 = vector.load %arg2[%c0_114, %c0_115] : memref<72x8xf32, #tpu.memory_space<vmem>>, vector<72x8xf32>
    %cst_116 = arith.constant dense<0.000000e+00> : vector<128x8xf32>
    %85 = tpu.matmul %83, %84, %cst_116 {dimension_numbers = #tpu.dot_dimension_numbers<[1], [0], [0], [1], [0, 0, 1, 1], [], []>} : vector<128x72xf32>, vector<72x8xf32>, vector<128x8xf32> -> vector<128x8xf32>
    %86 = vector.broadcast %11 : vector<1x8xf32> to vector<128x8xf32>
    %87 = arith.addf %85, %86 : vector<128x8xf32>
    %cst_117 = arith.constant dense<0.000000e+00> : vector<8xf32>
    %88 = vector.multi_reduction <add>, %87, %cst_117 [0] : vector<128x8xf32> to vector<8xf32>
    %89 = vector.shape_cast %88 : vector<8xf32> to vector<1x8xf32>
    %cst_118 = arith.constant 1.280000e+02 : f32
    %90 = vector.broadcast %cst_118 : f32 to vector<1x8xf32>
    %91 = arith.divf %89, %90 : vector<1x8xf32>
    %92 = vector.broadcast %91 : vector<1x8xf32> to vector<128x8xf32>
    %93 = arith.subf %87, %92 : vector<128x8xf32>
    %94 = arith.mulf %93, %93 : vector<128x8xf32>
    %cst_119 = arith.constant dense<0.000000e+00> : vector<8xf32>
    %95 = vector.multi_reduction <add>, %94, %cst_119 [0] : vector<128x8xf32> to vector<8xf32>
    %96 = vector.shape_cast %95 : vector<8xf32> to vector<1x8xf32>
    %cst_120 = arith.constant 1.280000e+02 : f32
    %97 = vector.broadcast %cst_120 : f32 to vector<1x8xf32>
    %98 = arith.divf %96, %97 : vector<1x8xf32>
    %cst_121 = arith.constant 0.000000e+00 : f32
    %99 = vector.broadcast %cst_121 : f32 to vector<1x8xf32>
    %100 = arith.maximumf %98, %99 : vector<1x8xf32>
    %cst_122 = arith.constant 9.99999974E-6 : f32
    %101 = vector.broadcast %cst_122 : f32 to vector<1x8xf32>
    %102 = arith.addf %100, %101 : vector<1x8xf32>
    %103 = math.rsqrt %102 : vector<1x8xf32>
    %104 = vector.broadcast %103 : vector<1x8xf32> to vector<128x8xf32>
    %105 = arith.mulf %93, %104 : vector<128x8xf32>
    %106 = vector.broadcast %12 : vector<1x8xf32> to vector<128x8xf32>
    %107 = arith.mulf %105, %106 : vector<128x8xf32>
    %108 = vector.broadcast %13 : vector<1x8xf32> to vector<128x8xf32>
    %109 = arith.addf %107, %108 : vector<128x8xf32>
    %cst_123 = arith.constant 0.000000e+00 : f32
    %110 = vector.broadcast %cst_123 : f32 to vector<128x8xf32>
    %111 = arith.maximumf %109, %110 : vector<128x8xf32>
    %112 = vector.shape_cast %111 : vector<128x8xf32> to vector<2x8x8x8xf32>
    %c0_124 = arith.constant 0 : index
    %c0_125 = arith.constant 0 : index
    %c0_126 = arith.constant 0 : index
    %c0_127 = arith.constant 0 : index
    %113 = vector.load %arg4[%c0_124, %c0_125, %c0_126, %c0_127] : memref<2x8x8x8xf32, #tpu.memory_space<vmem>>, vector<2x8x8x8xf32>
    tpu.vector_store %arg4[%c0_124, %c0_125, %c0_126, %c0_127], %112 {strides = array<i32>} : memref<2x8x8x8xf32, #tpu.memory_space<vmem>>, vector<2x8x8x8xf32>,
    return
  }
}

</mosaic_0001>

<bundles_post_ra>
// kernel: down_forward.1
= control target key start
LH: loop header
LB: loop body
LE: loop exit
PB: predicated region body
PF: predicated region fallthrough
CT: control target
= control target key end

     0   :  { %vm176_vm0 = vcmask 31744   ;;  %vm226_vm1 = vcmask 25600   ;;  %vm962_vm2 = vcmask 64512   ;;  %v3004_v0 = vmov 0.0   ;;  %s3005_s23 = smov 8   ;;  %s3006_s24 = smov 4   ;;  %s4769_s0 = inlined_call_operand.vmem [shape: f32[2,16,16,4], index: 0, kind: input, shape index: {}]   ;;  %s4770_s1 = inlined_call_operand.vmem [shape: f32[36,8], index: 1, kind: input, shape index: {}]   ;;  %s4771_s3 = inlined_call_operand.vmem [shape: f32[6,8], index: 3, kind: input, shape index: {}]   ;;  %s4772_s2 = inlined_call_operand.vmem [shape: f32[72,8], index: 2, kind: input, shape index: {}]   ;;  %s4773_s4 = inlined_call_operand.vmem [shape: f32[2,8,8,8], index: 4, kind: output, shape index: {}]  }
   0x1   :  { %225 = vst.msk [vmem:[#allocation2] sm:$0xff] %vm176_vm0, %v3004_v0  ;;  %228 = vst.msk [vmem:[#allocation2 + $0x10] sm:$0xff] %vm176_vm0, %v3004_v0  ;;  %v17_v1 = vld [vmem:[%s4769_s0] ss:$2 sm:$0xff]  ;;  %v2729_v2 = vld [vmem:[%s4769_s0 + $0x10] ss:$2 sm:$0xff] }
   0x2   :  { %227 = vst.msk [vmem:[#allocation2 + $0x8] sm:$0x3] %vm226_vm1, %v3004_v0  ;;  %229 = vst.msk [vmem:[#allocation2 + $0x18] sm:$0x3] %vm226_vm1, %v3004_v0  ;;  %v2760_v3 = vld [vmem:[%s4769_s0 + $0x1] ss:$2 sm:$0xff] }
   0x3   :  { %230 = vst.msk [vmem:[#allocation2 + $0x20] sm:$0xff] %vm176_vm0, %v3004_v0  ;;  %232 = vst.msk [vmem:[#allocation2 + $0x30] sm:$0xff] %vm176_vm0, %v3004_v0  ;;  %v2761_v4 = vld [vmem:[%s4769_s0 + $0x11] ss:$2 sm:$0xff]  ;;  %v144_v5 = vmax.f32 %v17_v1, %v2760_v3  ;;  %v2730_v6 = vld [vmem:[%s4769_s0 + $0x20] ss:$2 sm:$0xff] }
   0x4   :  { %231 = vst.msk [vmem:[#allocation2 + $0x28] sm:$0x3] %vm226_vm1, %v3004_v0  ;;  %233 = vst.msk [vmem:[#allocation2 + $0x38] sm:$0x3] %vm226_vm1, %v3004_v0  ;;  %v2731_v7 = vld [vmem:[%s4769_s0 + $0x30] ss:$2 sm:$0xff]  ;;  %v145_v8 = vmax.f32 %v2729_v2, %v2761_v4 }
   0x5   :  { %234 = vst.msk [vmem:[#allocation2 + $0x40] sm:$0xff] %vm176_vm0, %v3004_v0  ;;  %236 = vst.msk [vmem:[#allocation2 + $0x50] sm:$0xff] %vm176_vm0, %v3004_v0  ;;  %v2762_v9 = vld [vmem:[%s4769_s0 + $0x21] ss:$2 sm:$0xff]  ;;  %v2763_v10 = vld [vmem:[%s4769_s0 + $0x31] ss:$2 sm:$0xff] }
   0x6   :  { %235 = vst.msk [vmem:[#allocation2 + $0x48] sm:$0x3] %vm226_vm1, %v3004_v0  ;;  %237 = vst.msk [vmem:[#allocation2 + $0x58] sm:$0x3] %vm226_vm1, %v3004_v0  ;;  %v177_v11 = vsel %vm176_vm0, %v144_v5, -inf  ;;  %v146_v12 = vmax.f32 %v2730_v6, %v2762_v9  ;;  %v147_v13 = vmax.f32 %v2731_v7, %v2763_v10  ;;  %v178_v16 = vsel %vm176_vm0, %v145_v8, -inf }
   0x7   :  { %238 = vst.msk [vmem:[#allocation2 + $0x60] sm:$0xff] %vm176_vm0, %v3004_v0  ;;  %240 = vst.msk [vmem:[#allocation2 + $0x70] sm:$0xff] %vm176_vm0, %v3004_v0  ;;  %v2732_v14 = vld [vmem:[%s4769_s0 + $0x40] ss:$2 sm:$0xff]  ;;  %v2733_v15 = vld [vmem:[%s4769_s0 + $0x50] ss:$2 sm:$0xff]  ;;  %v179_v19 = vmax.f32 %v177_v11, %v178_v16 }
   0x8   :  { %239 = vst.msk [vmem:[#allocation2 + $0x68] sm:$0x3] %vm226_vm1, %v3004_v0  ;;  %241 = vst.msk [vmem:[#allocation2 + $0x78] sm:$0x3] %vm226_vm1, %v3004_v0  ;;  %v2764_v17 = vld [vmem:[%s4769_s0 + $0x41] ss:$2 sm:$0xff] }
   0x9   :  { %242 = vst.msk [vmem:[#allocation2 + $0x80] sm:$0xff] %vm176_vm0, %v3004_v0  ;;  %244 = vst.msk [vmem:[#allocation2 + $0x90] sm:$0xff] %vm176_vm0, %v3004_v0  ;;  %v2765_v18 = vld [vmem:[%s4769_s0 + $0x51] ss:$2 sm:$0xff]  ;;  %v180_v20 = vsel %vm176_vm0, %v146_v12, -inf  ;;  %v181_v21 = vsel %vm176_vm0, %v147_v13, -inf  ;;  %v148_v22 = vmax.f32 %v2732_v14, %v2764_v17 }
   0xa   :  { %243 = vst.msk [vmem:[#allocation2 + $0x88] sm:$0x3] %vm226_vm1, %v3004_v0  ;;  %245 = vst.msk [vmem:[#allocation2 + $0x98] sm:$0x3] %vm226_vm1, %v3004_v0  ;;  %v2734_v23 = vld [vmem:[%s4769_s0 + $0x60] ss:$2 sm:$0xff]  ;;  %v182_v24 = vmax.f32 %v180_v20, %v181_v21  ;;  %v149_v25 = vmax.f32 %v2733_v15, %v2765_v18 }
   0xb   :  { %246 = vst.msk [vmem:[#allocation2 + $0xa0] sm:$0xff] %vm176_vm0, %v3004_v0  ;;  %248 = vst.msk [vmem:[#allocation2 + $0xb0] sm:$0xff] %vm176_vm0, %v3004_v0  ;;  %v2735_v26 = vld [vmem:[%s4769_s0 + $0x70] ss:$2 sm:$0xff]  ;;  %v2766_v27 = vld [vmem:[%s4769_s0 + $0x61] ss:$2 sm:$0xff] }
   0xc   :  { %247 = vst.msk [vmem:[#allocation2 + $0xa8] sm:$0x3] %vm226_vm1, %v3004_v0  ;;  %249 = vst.msk [vmem:[#allocation2 + $0xb8] sm:$0x3] %vm226_vm1, %v3004_v0  ;;  %v2767_v28 = vld [vmem:[%s4769_s0 + $0x71] ss:$2 sm:$0xff]  ;;  %v150_v32 = vmax.f32 %v2734_v23, %v2766_v27 }
   0xd   :  { %250 = vst.msk [vmem:[#allocation2 + $0xc0] sm:$0xff] %vm176_vm0, %v3004_v0  ;;  %252 = vst.msk [vmem:[#allocation2 + $0xd0] sm:$0xff] %vm176_vm0, %v3004_v0  ;;  %v321_v29 = vld [vmem:[#allocation2 + $0x2] sm:$0xff]  ;;  %v183_v31 = vsel %vm176_vm0, %v148_v22, -inf  ;;  %v151_v33 = vmax.f32 %v2735_v26, %v2767_v28  ;;  %v184_v35 = vsel %vm176_vm0, %v149_v25, -inf  ;;  %s3007_s11 = smov 12  }
   0xe   :  { %251 = vst.msk [vmem:[#allocation2 + $0xc8] sm:$0x3] %vm226_vm1, %v3004_v0  ;;  %253 = vst.msk [vmem:[#allocation2 + $0xd8] sm:$0x3] %vm226_vm1, %v3004_v0  ;;  %v305_v30 = vld [vmem:[#allocation2 + $0x1] sm:$0xff]  ;;  %514 = vrot.lane.b32.xlu1 %v321_v29, %s3005_s23  ;;  %v185_v38 = vmax.f32 %v183_v31, %v184_v35  ;;  %v186_v39 = vsel %vm176_vm0, %v150_v32, -inf }
   0xf   :  { %254 = vst.msk [vmem:[#allocation2 + $0xe0] sm:$0xff] %vm176_vm0, %v3004_v0  ;;  %256 = vst.msk [vmem:[#allocation2 + $0xf0] sm:$0xff] %vm176_vm0, %v3004_v0  ;;  %v2736_v34 = vld [vmem:[%s4769_s0 + $0x80] ss:$2 sm:$0xff]  ;;  %450 = vrot.lane.b32.xlu0 %v305_v30, %s3006_s24  ;;  %v2737_v36 = vld [vmem:[%s4769_s0 + $0x90] ss:$2 sm:$0xff] }
  0x10   :  { %255 = vst.msk [vmem:[#allocation2 + $0xe8] sm:$0x3] %vm226_vm1, %v3004_v0  ;;  %257 = vst.msk [vmem:[#allocation2 + $0xf8] sm:$0x3] %vm226_vm1, %v3004_v0  ;;  %v2768_v37 = vld [vmem:[%s4769_s0 + $0x81] ss:$2 sm:$0xff] }
  0x11   :  { %258 = vst.msk [vmem:[#allocation2 + $0x100] sm:$0xff] %vm176_vm0, %v3004_v0  ;;  %260 = vst.msk [vmem:[#allocation2 + $0x110] sm:$0xff] %vm176_vm0, %v3004_v0  ;;  %v187_v40 = vsel %vm176_vm0, %v151_v33, -inf  ;;  %v2769_v41 = vld [vmem:[%s4769_s0 + $0x91] ss:$2 sm:$0xff]  ;;  %v152_v42 = vmax.f32 %v2736_v34, %v2768_v37  ;;  %s3008_s22 = smov 16  }
  0x12   :  { %259 = vst.msk [vmem:[#allocation2 + $0x108] sm:$0x3] %vm226_vm1, %v3004_v0  ;;  %261 = vst.msk [vmem:[#allocation2 + $0x118] sm:$0x3] %vm226_vm1, %v3004_v0  ;;  %v2738_v43 = vld [vmem:[%s4769_s0 + $0xa0] ss:$2 sm:$0xff]  ;;  %v188_v44 = vmax.f32 %v186_v39, %v187_v40  ;;  %v153_v45 = vmax.f32 %v2737_v36, %v2769_v41 }
  0x13   :  { %262 = vst.msk [vmem:[#allocation2 + $0x120] sm:$0xff] %vm176_vm0, %v3004_v0  ;;  %264 = vst.msk [vmem:[#allocation2 + $0x130] sm:$0xff] %vm176_vm0, %v3004_v0  ;;  %v2739_v46 = vld [vmem:[%s4769_s0 + $0xb0] ss:$2 sm:$0xff]  ;;  %v2770_v47 = vld [vmem:[%s4769_s0 + $0xa1] ss:$2 sm:$0xff] }
  0x14   :  { %263 = vst.msk [vmem:[#allocation2 + $0x128] sm:$0x3] %vm226_vm1, %v3004_v0  ;;  %265 = vst.msk [vmem:[#allocation2 + $0x138] sm:$0x3] %vm226_vm1, %v3004_v0  ;;  %v2771_v48 = vld [vmem:[%s4769_s0 + $0xb1] ss:$2 sm:$0xff]  ;;  %v154_v50 = vmax.f32 %v2738_v43, %v2770_v47 }
  0x15   :  { %1472 = vst.msk [vmem:[#allocation3] sm:$0xff] %vm962_vm2, %v3004_v0  ;;  %1475 = vst.msk [vmem:[#allocation3 + $0x10] sm:$0xff] %vm962_vm2, %v3004_v0  ;;  %v189_v49 = vsel %vm176_vm0, %v152_v42, -inf  ;;  %v155_v51 = vmax.f32 %v2739_v46, %v2771_v48  ;;  %v2740_v52 = vld [vmem:[%s4769_s0 + $0xc0] ss:$2 sm:$0xff]  ;;  %v190_v54 = vsel %vm176_vm0, %v153_v45, -inf }
  0x16   :  { %1477 = vst.msk [vmem:[#allocation3 + $0x20] sm:$0xff] %vm962_vm2, %v3004_v0  ;;  %1479 = vst.msk [vmem:[#allocation3 + $0x30] sm:$0xff] %vm962_vm2, %v3004_v0  ;;  %v2741_v53 = vld [vmem:[%s4769_s0 + $0xd0] ss:$2 sm:$0xff]  ;;  %v2772_v55 = vld [vmem:[%s4769_s0 + $0xc1] ss:$2 sm:$0xff]  ;;  %v191_v57 = vmax.f32 %v189_v49, %v190_v54 }
  0x17   :  { %1481 = vst.msk [vmem:[#allocation3 + $0x40] sm:$0xff] %vm962_vm2, %v3004_v0  ;;  %1483 = vst.msk [vmem:[#allocation3 + $0x50] sm:$0xff] %vm962_vm2, %v3004_v0  ;;  %v2773_v56 = vld [vmem:[%s4769_s0 + $0xd1] ss:$2 sm:$0xff]  ;;  %v192_v58 = vsel %vm176_vm0, %v154_v50, -inf  ;;  %v193_v59 = vsel %vm176_vm0, %v155_v51, -inf  ;;  %v156_v60 = vmax.f32 %v2740_v52, %v2772_v55 }
  0x18   :  { %1485 = vst.msk [vmem:[#allocation3 + $0x60] sm:$0xff] %vm962_vm2, %v3004_v0  ;;  %1487 = vst.msk [vmem:[#allocation3 + $0x70] sm:$0xff] %vm962_vm2, %v3004_v0  ;;  %v2742_v61 = vld [vmem:[%s4769_s0 + $0xe0] ss:$2 sm:$0xff]  ;;  %v194_v1 = vmax.f32 %v192_v58, %v193_v59  ;;  %v157_v2 = vmax.f32 %v2741_v53, %v2773_v56  ;;  %v2743_v3 = vld [vmem:[%s4769_s0 + $0xf0] ss:$2 sm:$0xff] }
  0x19   :  { %1489 = vst.msk [vmem:[#allocation3 + $0x80] sm:$0xff] %vm962_vm2, %v3004_v0  ;;  %1491 = vst.msk [vmem:[#allocation3 + $0x90] sm:$0xff] %vm962_vm2, %v3004_v0  ;;  %v195_v5 = vsel %vm176_vm0, %v156_v60, -inf  ;;  %v2774_v8 = vld [vmem:[%s4769_s0 + $0xe1] ss:$2 sm:$0xff]  ;;  %s3009_s7 = smov 20  }
  0x1a   :  { %1493 = vst.msk [vmem:[#allocation3 + $0xa0] sm:$0xff] %vm962_vm2, %v3004_v0  ;;  %1495 = vst.msk [vmem:[#allocation3 + $0xb0] sm:$0xff] %vm962_vm2, %v3004_v0  ;;  %v196_v7 = vsel %vm176_vm0, %v157_v2, -inf  ;;  %v2775_v9 = vld [vmem:[%s4769_s0 + $0xf1] ss:$2 sm:$0xff]  ;;  %v158_v11 = vmax.f32 %v2742_v61, %v2774_v8  ;;  %s3010_s8 = smov 24  }
  0x1b   :  { %1497 = vst.msk [vmem:[#allocation3 + $0xc0] sm:$0xff] %vm962_vm2, %v3004_v0  ;;  %1499 = vst.msk [vmem:[#allocation3 + $0xd0] sm:$0xff] %vm962_vm2, %v3004_v0  ;;  %v197_v10 = vmax.f32 %v195_v5, %v196_v7  ;;  %v159_v12 = vmax.f32 %v2743_v3, %v2775_v9  ;;  %v2744_v13 = vld [vmem:[%s4769_s0 + $0x100] ss:$2 sm:$0xff]  ;;  %v2776_v14 = vld [vmem:[%s4769_s0 + $0x101] ss:$2 sm:$0xff] }
  0x1c   :  { %1501 = vst.msk [vmem:[#allocation3 + $0xe0] sm:$0xff] %vm962_vm2, %v3004_v0  ;;  %1503 = vst.msk [vmem:[#allocation3 + $0xf0] sm:$0xff] %vm962_vm2, %v3004_v0  ;;  %v2745_v15 = vld [vmem:[%s4769_s0 + $0x110] ss:$2 sm:$0xff]  ;;  %v160_v16 = vmax.f32 %v2744_v13, %v2776_v14  ;;  %v198_v17 = vsel %vm176_vm0, %v158_v11, -inf  ;;  %v1081_v48 = vld [vmem:[%s4770_s1] sm:$0xff] }
  0x1d   :  { %1505 = vst.msk [vmem:[#allocation3 + $0x100] sm:$0xff] %vm962_vm2, %v3004_v0  ;;  %1507 = vst.msk [vmem:[#allocation3 + $0x110] sm:$0xff] %vm962_vm2, %v3004_v0  ;;  %v199_v18 = vsel %vm176_vm0, %v159_v12, -inf  ;;  %v2777_v21 = vld [vmem:[%s4769_s0 + $0x111] ss:$2 sm:$0xff]  ;;  %v1082_v49 = vld [vmem:[%s4770_s1 + $0x8] sm:$0xff] }
  0x1e   :  { %1509 = vst.msk [vmem:[#allocation3 + $0x120] sm:$0xff] %vm962_vm2, %v3004_v0  ;;  %1511 = vst.msk [vmem:[#allocation3 + $0x130] sm:$0xff] %vm962_vm2, %v3004_v0  ;;  %v200_v20 = vmax.f32 %v198_v17, %v199_v18  ;;  %v201_v22 = vsel %vm176_vm0, %v160_v16, -inf  ;;  %v2746_v23 = vld [vmem:[%s4769_s0 + $0x120] ss:$2 sm:$0xff]  ;;  %v2953_v50 = vpack.c.bf16 %v1082_v49, %v1081_v48  ;;  %v1084_v58 = vld [vmem:[%s4770_s1 + $0x18] sm:$0xff] }
  0x1f   :  { %267 = vst.msk [vmem:[#allocation2 + $0x11] sm:$0xff] %vm176_vm0, %v179_v19  ;;  %268 = vst.msk [vmem:[#allocation2 + $0x21] sm:$0xff] %vm176_vm0, %v182_v24  ;;  %v161_v24 = vmax.f32 %v2745_v15, %v2777_v21  ;;  %v2747_v25 = vld [vmem:[%s4769_s0 + $0x130] ss:$2 sm:$0xff]  ;;  %v2778_v26 = vld [vmem:[%s4769_s0 + $0x121] ss:$2 sm:$0xff] }
  0x20   :  { %269 = vst.msk [vmem:[#allocation2 + $0x31] sm:$0xff] %vm176_vm0, %v185_v38  ;;  %270 = vst.msk [vmem:[#allocation2 + $0x41] sm:$0xff] %vm176_vm0, %v188_v44  ;;  %v2779_v27 = vld [vmem:[%s4769_s0 + $0x131] ss:$2 sm:$0xff]  ;;  %v162_v28 = vmax.f32 %v2746_v23, %v2778_v26  ;;  %v2748_v34 = vld [vmem:[%s4769_s0 + $0x140] ss:$2 sm:$0xff]  ;;  %2954 = vmatprep.subr.bf16.mxu0 %v2953_v50 }
  0x21   :  { %271 = vst.msk [vmem:[#allocation2 + $0x51] sm:$0xff] %vm176_vm0, %v191_v57  ;;  %272 = vst.msk [vmem:[#allocation2 + $0x61] sm:$0xff] %vm176_vm0, %v194_v1  ;;  %v163_v29 = vmax.f32 %v2747_v25, %v2779_v27  ;;  %v202_v30 = vsel %vm176_vm0, %v161_v24, -inf  ;;  %v2749_v35 = vld [vmem:[%s4769_s0 + $0x150] ss:$2 sm:$0xff]  ;;  %2956 = vmatpush3.bf16.msra.mxu0 %v2953_v50  ;;  %s3011_s29 = smov 28  }
  0x22   :  { %273 = vst.msk [vmem:[#allocation2 + $0x71] sm:$0xff] %vm176_vm0, %v197_v10  ;;  %274 = vst.msk [vmem:[#allocation2 + $0x81] sm:$0xff] %vm176_vm0, %v200_v20  ;;  %v203_v31 = vmax.f32 %v201_v22, %v202_v30  ;;  %v204_v32 = vsel %vm176_vm0, %v162_v28, -inf  ;;  %v2780_v37 = vld [vmem:[%s4769_s0 + $0x141] ss:$2 sm:$0xff]  ;;  %v1083_v57 = vld [vmem:[%s4770_s1 + $0x10] sm:$0xff] }
  0x23   :  { %v205_v33 = vsel %vm176_vm0, %v163_v29, -inf  ;;  %v2781_v38 = vld [vmem:[%s4769_s0 + $0x151] ss:$2 sm:$0xff]  ;;  %v164_v39 = vmax.f32 %v2748_v34, %v2780_v37  ;;  %v2750_v51 = vld [vmem:[%s4769_s0 + $0x160] ss:$2 sm:$0xff]  ;;  %v2957_v60 = vpack.c.bf16 %v1084_v58, %v1083_v57  ;;  %vm1139_vm3 = vcmask 1043456  }
  0x24   :  { %v206_v36 = vmax.f32 %v204_v32, %v205_v33  ;;  %275 = vst.msk [vmem:[#allocation2 + $0xb1] sm:$0xff] %vm176_vm0, %v203_v31  ;;  %v165_v40 = vmax.f32 %v2749_v35, %v2781_v38  ;;  %v2751_v52 = vld [vmem:[%s4769_s0 + $0x170] ss:$2 sm:$0xff]  ;;  %v2782_v53 = vld [vmem:[%s4769_s0 + $0x161] ss:$2 sm:$0xff]  ;;  %vm979_vm4 = vcmask 97280  }
  0x25   :  { %v207_v43 = vsel %vm176_vm0, %v164_v39, -inf  ;;  %v2783_v54 = vld [vmem:[%s4769_s0 + $0x171] ss:$2 sm:$0xff]  ;;  %v166_v55 = vmax.f32 %v2750_v51, %v2782_v53  ;;  %2958 = vmatprep.subr.bf16.mxu0 %v2957_v60  ;;  %v2752_v2 = vld [vmem:[%s4769_s0 + $0x180] ss:$2 sm:$0xff]  ;;  %vm996_vm5 = vcmask 130048  }
  0x26   :  { %v322_v62 = vld [vmem:[#allocation2 + $0x12] sm:$0xff]  ;;  %v3276_v6 = vld [vmem:[#allocation2 + $0x20] sm:$0xff]  ;;  %276 = vst.msk [vmem:[#allocation2 + $0xc1] sm:$0xff] %vm176_vm0, %v206_v36  ;;  %v208_v44 = vsel %vm176_vm0, %v165_v40, -inf  ;;  %v167_v56 = vmax.f32 %v2751_v52, %v2783_v54  ;;  %2960 = vmatpush3.bf16.msra.mxu0 %v2957_v60  ;;  %vm1013_vm6 = vcmask 162816   ;;  %vm1030_vm7 = vcmask 195584  }
  0x27   :  { %v306_v63 = vld [vmem:[#allocation2 + $0x11] sm:$0xff]  ;;  %516 = vrot.lane.b32.xlu1 %v322_v62, %s3005_s23  ;;  %v3302_v19 = vld [vmem:[#allocation2 + $0x21] sm:$0xff]  ;;  %v209_v45 = vmax.f32 %v207_v43, %v208_v44  ;;  %v210_v59 = vsel %vm176_vm0, %v166_v55, -inf  ;;  %vm1047_vm8 = vcmask 228352   ;;  %vm1064_vm9 = vcmask 261120   ;;  %s3016_s30 = smov 40  }
  0x28   :  { %452 = vrot.lane.b32.xlu0 %v306_v63, %s3006_s24  ;;  %v3272_v4 = vld [vmem:[#allocation2 + $0x10] sm:$0xff]  ;;  %v323_v41 = vld [vmem:[#allocation2 + $0x22] sm:$0xff]  ;;  %v211_v61 = vsel %vm176_vm0, %v167_v56, -inf  ;;  %vm1090_vm10 = vcmask 293888   ;;  %vm1473_vm11 = vcmask 58368   ;;  %vm2251_vm12 = vcmask 326656  }
  0x29   :  { %v308_v42 = vld [vmem:[#allocation2 + $0x31] sm:$0xff]  ;;  %277 = vst.msk [vmem:[#allocation2 + $0xd1] sm:$0xff] %vm176_vm0, %v209_v45  ;;  %v3391_v1 = vld [vmem:[#allocation2 + $0x40] sm:$0xff]  ;;  %vm2268_vm13 = vcmask 392192   ;;  %vm2285_vm14 = vcmask 457728   ;;  %vm2302_vm15 = vcmask 523264  }
  0x2a   :  { %v3349_v46 = vld [vmem:[#allocation2 + $0x30] sm:$0xff]  ;;  %v2784_v5 = vld [vmem:[%s4769_s0 + $0x181] ss:$2 sm:$0xff]  ;;  %v2754_v16 = vld [vmem:[%s4769_s0 + $0x1a0] ss:$2 sm:$0xff] }
  0x2b   :  { %580 = vrot.lane.b32.xlu1 %v3276_v6, %s3007_s11  ;;  %v324_v47 = vld [vmem:[#allocation2 + $0x32] sm:$0xff]  ;;  %v356_v8 = vld [vmem:[#allocation2 + $0x41] sm:$0xff]  ;;  %v168_v9 = vmax.f32 %v2752_v2, %v2784_v5  ;;  %1500 = vst.msk [vmem:[#allocation3 + $0xd8] sm:$0x3] %vm1473_vm11, %v3004_v0  ;;  %1502 = vst.msk [vmem:[#allocation3 + $0xe8] sm:$0x3] %vm1473_vm11, %v3004_v0 }
  0x2c   :  { %578 = vrot.lane.b32.xlu0 %v3272_v4, %s3007_s11  ;;  %v2753_v3 = vld [vmem:[%s4769_s0 + $0x190] ss:$2 sm:$0xff]  ;;  %v2785_v7 = vld [vmem:[%s4769_s0 + $0x191] ss:$2 sm:$0xff]  ;;  %v325_v14 = vld [vmem:[#allocation2 + $0x42] sm:$0xff] }
  0x2d   :  { %v169_v10 = vmax.f32 %v2753_v3, %v2785_v7  ;;  %v213_v11 = vsel %vm176_vm0, %v168_v9, -inf  ;;  %v310_v15 = vld [vmem:[#allocation2 + $0x51] sm:$0xff]  ;;  %v2786_v18 = vld [vmem:[%s4769_s0 + $0x1a1] ss:$2 sm:$0xff]  ;;  %v2756_v28 = vld [vmem:[%s4769_s0 + $0x1c0] ss:$2 sm:$0xff] }
  0x2e   :  { %v2755_v17 = vld [vmem:[%s4769_s0 + $0x1b0] ss:$2 sm:$0xff]  ;;  %v170_v20 = vmax.f32 %v2754_v16, %v2786_v18  ;;  %v3445_v27 = vld [vmem:[#allocation2 + $0x60] sm:$0xff]  ;;  %v2789_v31 = vld [vmem:[%s4769_s0 + $0x1d1] ss:$2 sm:$0xff] }
  0x2f   :  { %454 = vrot.lane.b32.xlu1 %v3302_v19, %s3006_s24  ;;  %v214_v12 = vsel %vm176_vm0, %v169_v10, -inf  ;;  %v3434_v21 = vld [vmem:[#allocation2 + $0x50] sm:$0xff]  ;;  %v2788_v30 = vld [vmem:[%s4769_s0 + $0x1c1] ss:$2 sm:$0xff]  ;;  %v2758_v40 = vld [vmem:[%s4769_s0 + $0x1e0] ss:$2 sm:$0xff] }
  0x30   :  { %642 = vrot.lane.b32.xlu0 %v306_v63, %s3008_s22  ;;  %v1085_v63 = vld [vmem:[%s4770_s1 + $0x20] sm:$0xf]  ;;  %s3012_s1 = smov 32   ;;  %v215_v13 = vmax.f32 %v213_v11, %v214_v12  ;;  %v326_v22 = vld [vmem:[#allocation2 + $0x52] sm:$0xff]  ;;  %v216_v24 = vsel %vm176_vm0, %v170_v20, -inf  ;;  %v172_v32 = vmax.f32 %v2756_v28, %v2788_v30 }
  0x31   :  { %2885 = vmatprep.subr.msk.mxu0 %vm1139_vm3, %v1085_v63  ;;  %v2757_v29 = vld [vmem:[%s4769_s0 + $0x1d0] ss:$2 sm:$0xff]  ;;  %v358_v33 = vld [vmem:[#allocation2 + $0x61] sm:$0xff]  ;;  %v2791_v43 = vld [vmem:[%s4769_s0 + $0x1f1] ss:$2 sm:$0xff] }
  0x32   :  { %2886 = vmatpush3.msk.msra.mxu0 %vm1139_vm3, %v1085_v63  ;;  %279 = vst.msk [vmem:[#allocation2 + $0xf1] sm:$0xff] %vm176_vm0, %v215_v13  ;;  %v173_v34 = vmax.f32 %v2757_v29, %v2789_v31  ;;  %v219_v35 = vsel %vm176_vm0, %v172_v32, -inf  ;;  %v327_v38 = vld [vmem:[#allocation2 + $0x62] sm:$0xff]  ;;  %v312_v39 = vld [vmem:[#allocation2 + $0x71] sm:$0xff] }
  0x33   :  { %706 = vrot.lane.b32.xlu1 %v322_v62, %s3009_s7  ;;  %v212_v62 = vmax.f32 %v210_v59, %v211_v61  ;;  %v3488_v45 = vld [vmem:[#allocation2 + $0x70] sm:$0xff]  ;;  %v344_v52 = vld [vmem:[#allocation2 + $0x80] sm:$0xff]  ;;  %1504 = vst.msk [vmem:[#allocation3 + $0xf8] sm:$0x3] %vm1473_vm11, %v3004_v0  ;;  %1506 = vst.msk [vmem:[#allocation3 + $0x108] sm:$0x3] %vm1473_vm11, %v3004_v0 }
  0x34   :  { %644 = vrot.lane.b32.xlu0 %v3302_v19, %s3008_s22  ;;  %v220_v36 = vsel %vm176_vm0, %v173_v34, -inf  ;;  %v360_v53 = vld [vmem:[#allocation2 + $0x81] sm:$0xff]  ;;  %v314_v58 = vld [vmem:[#allocation2 + $0xb1] sm:$0xff]  ;;  %1508 = vst.msk [vmem:[#allocation3 + $0x118] sm:$0x3] %vm1473_vm11, %v3004_v0 }
  0x35   :  { %278 = vst.msk [vmem:[#allocation2 + $0xe1] sm:$0xff] %vm176_vm0, %v212_v62  ;;  %v221_v37 = vmax.f32 %v219_v35, %v220_v36  ;;  %v313_v54 = vld [vmem:[#allocation2 + $0xa1] sm:$0xff]  ;;  %v3513_v62 = vld [vmem:[#allocation2 + $0xb0] sm:$0xff] }
  0x36   :  { %v329_v57 = vld [vmem:[#allocation2 + $0xa2] sm:$0xff]  ;;  %v330_v63 = vld [vmem:[#allocation2 + $0xb2] sm:$0xff]  ;;  %1510 = vst.msk [vmem:[#allocation3 + $0x128] sm:$0x3] %vm1473_vm11, %v3004_v0  ;;  %1474 = vst.msk [vmem:[#allocation3 + $0x8] sm:$0x3] %vm1473_vm11, %v3004_v0 }
  0x37   :  { %518 = vrot.lane.b32.xlu1 %v323_v41, %s3005_s23  ;;  %281 = vst.msk [vmem:[#allocation2 + $0x111] sm:$0xff] %vm176_vm0, %v221_v37  ;;  %v376_v59 = vld [vmem:[#allocation2 + $0x82] sm:$0xff]  ;;  %v393_v5 = vld [vmem:[#allocation2 + $0x90] sm:$0xff] }
  0x38   :  { %456 = vrot.lane.b32.xlu0 %v308_v42, %s3006_s24  ;;  %v3524_v9 = vld [vmem:[#allocation2 + $0xc0] sm:$0xff]  ;;  %v409_v12 = vld [vmem:[#allocation2 + $0x91] sm:$0xff]  ;;  %1476 = vst.msk [vmem:[#allocation3 + $0x18] sm:$0x3] %vm1473_vm11, %v3004_v0  ;;  %1478 = vst.msk [vmem:[#allocation3 + $0x28] sm:$0x3] %vm1473_vm11, %v3004_v0 }
  0x39   :  { %v425_v18 = vld [vmem:[#allocation2 + $0x92] sm:$0xff]  ;;  %1480 = vst.msk [vmem:[#allocation3 + $0x38] sm:$0x3] %vm1473_vm11, %v3004_v0  ;;  %1482 = vst.msk [vmem:[#allocation3 + $0x48] sm:$0x3] %vm1473_vm11, %v3004_v0 }
  0x3a   :  { %v3556_v36 = vld [vmem:[#allocation2 + $0xd0] sm:$0xff]  ;;  %1484 = vst.msk [vmem:[#allocation3 + $0x58] sm:$0x3] %vm1473_vm11, %v3004_v0  ;;  %1486 = vst.msk [vmem:[#allocation3 + $0x68] sm:$0x3] %vm1473_vm11, %v3004_v0 }
  0x3b   :  { %770 = vrot.lane.b32.xlu1 %v3276_v6, %s3010_s8  ;;  %v332_v37 = vld [vmem:[#allocation2 + $0xd2] sm:$0xff]  ;;  %1488 = vst.msk [vmem:[#allocation3 + $0x78] sm:$0x3] %vm1473_vm11, %v3004_v0  ;;  %1490 = vst.msk [vmem:[#allocation3 + $0x88] sm:$0x3] %vm1473_vm11, %v3004_v0 }
  0x3c   :  { %708 = vrot.lane.b32.xlu0 %v323_v41, %s3009_s7  ;;  %1492 = vst.msk [vmem:[#allocation3 + $0x98] sm:$0x3] %vm1473_vm11, %v3004_v0  ;;  %1494 = vst.msk [vmem:[#allocation3 + $0xa8] sm:$0x3] %vm1473_vm11, %v3004_v0 }
  0x3d   :  { %1496 = vst.msk [vmem:[#allocation3 + $0xb8] sm:$0x3] %vm1473_vm11, %v3004_v0  ;;  %1498 = vst.msk [vmem:[#allocation3 + $0xc8] sm:$0x3] %vm1473_vm11, %v3004_v0 }
  0x3e   :  { %1512 = vst.msk [vmem:[#allocation3 + $0x138] sm:$0x3] %vm1473_vm11, %v3004_v0 }
  0x3f   :  { %582 = vrot.lane.b32.xlu1 %v3349_v46, %s3007_s11 }
  0x40   :  { %520 = vrot.lane.b32.xlu0 %v324_v47, %s3005_s23 }
  0x43   :  { %834 = vrot.lane.b32.xlu1 %v3302_v19, %s3011_s29  ;;  %v2787_v19 = vld [vmem:[%s4769_s0 + $0x1b1] ss:$2 sm:$0xff] }
  0x44   :  { %772 = vrot.lane.b32.xlu0 %v3349_v46, %s3010_s8  ;;  %v171_v23 = vmax.f32 %v2755_v17, %v2787_v19  ;;  %v1666_v0 = vld [vmem:[#allocation3 + $0x92] sm:$0xff] }
  0x46   :  { %v217_v25 = vsel %vm176_vm0, %v171_v23, -inf  ;;  %v331_v23 = vld [vmem:[#allocation2 + $0xc2] sm:$0xff] }
  0x47   :  { %646 = vrot.lane.b32.xlu1 %v308_v42, %s3008_s22  ;;  %v218_v26 = vmax.f32 %v216_v24, %v217_v25  ;;  %v316_v24 = vld [vmem:[#allocation2 + $0xd1] sm:$0xff] }
  0x48   :  { %584 = vrot.lane.b32.xlu0 %v3391_v1, %s3007_s11 }
  0x49   :  { %280 = vst.msk [vmem:[#allocation2 + $0x101] sm:$0xff] %vm176_vm0, %v218_v26 }
  0x4b   :  { %898 = vrot.lane.b32.xlu1 %v323_v41, %s3012_s1  ;;  %v2759_v41 = vld [vmem:[%s4769_s0 + $0x1f0] ss:$2 sm:$0xff] }
  0x4c   :  { %836 = vrot.lane.b32.xlu0 %v308_v42, %s3011_s29  ;;  %v2790_v42 = vld [vmem:[%s4769_s0 + $0x1e1] ss:$2 sm:$0xff]  ;;  %v175_v48 = vmax.f32 %v2759_v41, %v2791_v43 }
  0x4d   :  { %v174_v44 = vmax.f32 %v2758_v40, %v2790_v42 }
  0x4e   :  { %v223_v50 = vsel %vm176_vm0, %v175_v48, -inf }
  0x4f   :  { %648 = vrot.lane.b32.xlu1 %v356_v8, %s3008_s22  ;;  %v222_v49 = vsel %vm176_vm0, %v174_v44, -inf }
  0x50   :  { %458 = vrot.lane.b32.xlu0 %v356_v8, %s3006_s24  ;;  %v224_v51 = vmax.f32 %v222_v49, %v223_v50 }
  0x52   :  { %282 = vst.msk [vmem:[#allocation2 + $0x121] sm:$0xff] %vm176_vm0, %v224_v51  ;;  %v3578_v51 = vld [vmem:[#allocation2 + $0xe0] sm:$0xff] }
  0x53   :  { %900 = vrot.lane.b32.xlu1 %v324_v47, %s3012_s1 }
  0x54   :  { %710 = vrot.lane.b32.xlu0 %v324_v47, %s3009_s7  ;;  %v328_v47 = vld [vmem:[#allocation2 + $0x72] sm:$0xff] }
  0x57   :  { %522 = vrot.lane.b32.xlu1 %v325_v14, %s3005_s23 }
  0x58   :  { %460 = vrot.lane.b32.xlu0 %v310_v15, %s3006_s24 }
  0x5b   :  { %774 = vrot.lane.b32.xlu1 %v3391_v1, %s3010_s8 }
  0x5c   :  { %712 = vrot.lane.b32.xlu0 %v325_v14, %s3009_s7 }
  0x5f   :  { %586 = vrot.lane.b32.xlu1 %v3434_v21, %s3007_s11 }
  0x60   :  { %524 = vrot.lane.b32.xlu0 %v326_v22, %s3005_s23 }
  0x63   :  { %838 = vrot.lane.b32.xlu1 %v356_v8, %s3011_s29 }
  0x64   :  { %776 = vrot.lane.b32.xlu0 %v3434_v21, %s3010_s8 }
  0x67   :  { %650 = vrot.lane.b32.xlu1 %v310_v15, %s3008_s22 }
  0x68   :  { %588 = vrot.lane.b32.xlu0 %v3445_v27, %s3007_s11 }
  0x6b   :  { %902 = vrot.lane.b32.xlu1 %v325_v14, %s3012_s1 }
  0x6c   :  { %840 = vrot.lane.b32.xlu0 %v310_v15, %s3011_s29  ;;  %v362_v15 = vld [vmem:[#allocation2 + $0xc1] sm:$0xff] }
  0x6f   :  { %652 = vrot.lane.b32.xlu1 %v358_v33, %s3008_s22 }
  0x70   :  { %462 = vrot.lane.b32.xlu0 %v358_v33, %s3006_s24 }
  0x73   :  { %904 = vrot.lane.b32.xlu1 %v326_v22, %s3012_s1 }
  0x74   :  { %714 = vrot.lane.b32.xlu0 %v326_v22, %s3009_s7  ;;  %v289_v22 = vld [vmem:[#allocation2] sm:$0xff] }
  0x77   :  { %526 = vrot.lane.b32.xlu1 %v327_v38, %s3005_s23 }
  0x78   :  { %464 = vrot.lane.b32.xlu0 %v312_v39, %s3006_s24 }
  0x7b   :  { %778 = vrot.lane.b32.xlu1 %v3445_v27, %s3010_s8 }
  0x7c   :  { %716 = vrot.lane.b32.xlu0 %v327_v38, %s3009_s7 }
  0x7f   :  { %590 = vrot.lane.b32.xlu1 %v3488_v45, %s3007_s11 }
  0x80   :  { %528 = vrot.lane.b32.xlu0 %v328_v47, %s3005_s23  ;;  %v515_v55 = vpop.permute.xlu1 %514 }
  0x81   :  { %v451_v56 = vpop.permute.xlu0 %450 }
  0x82   :  { %v946_v25 = vsel %vm176_vm0, %v289_v22, %v451_v56 }
  0x83   :  { %842 = vrot.lane.b32.xlu1 %v358_v33, %s3011_s29  ;;  %v963_v29 = vsel %vm962_vm2, %v946_v25, %v515_v55 }
  0x84   :  { %780 = vrot.lane.b32.xlu0 %v3488_v45, %s3010_s8 }
  0x87   :  { %654 = vrot.lane.b32.xlu1 %v312_v39, %s3008_s22 }
  0x88   :  { %592 = vrot.lane.b32.xlu0 %v344_v52, %s3007_s11 }
  0x8b   :  { %906 = vrot.lane.b32.xlu1 %v327_v38, %s3012_s1 }
  0x8c   :  { %844 = vrot.lane.b32.xlu0 %v312_v39, %s3011_s29 }
  0x8f   :  { %656 = vrot.lane.b32.xlu1 %v360_v53, %s3008_s22 }
  0x90   :  { %466 = vrot.lane.b32.xlu0 %v313_v54, %s3006_s24 }
  0x93   :  { %908 = vrot.lane.b32.xlu1 %v328_v47, %s3012_s1 }
  0x94   :  { %718 = vrot.lane.b32.xlu0 %v328_v47, %s3009_s7 }
  0x97   :  { %530 = vrot.lane.b32.xlu1 %v329_v57, %s3005_s23 }
  0x98   :  { %468 = vrot.lane.b32.xlu0 %v314_v58, %s3006_s24 }
  0x99   :  { %v3509_v60 = vpop.permute.xlu1 %516 }
  0x9a   :  { %v453_v61 = vpop.permute.xlu0 %452 }
  0x9b   :  { %782 = vrot.lane.b32.xlu1 %v344_v52, %s3010_s8  ;;  %v947_v38 = vsel %vm176_vm0, %v3272_v4, %v453_v61 }
  0x9c   :  { %720 = vrot.lane.b32.xlu0 %v376_v59, %s3009_s7  ;;  %v964_v43 = vsel %vm962_vm2, %v947_v38, %v3509_v60 }
  0x9d   :  { %v3515_v2 = vpop.permute.xlu1 %580 }
  0x9e   :  { %v579_v3 = vpop.permute.xlu0 %578  ;;  %v981_v4 = vsel %vm979_vm4, %v964_v43, %v3515_v2  ;;  %v333_v2 = vld [vmem:[#allocation2 + $0xe2] sm:$0xff] }
  0x9f   :  { %594 = vrot.lane.b32.xlu1 %v3513_v62, %s3007_s11  ;;  %v980_v30 = vsel %vm979_vm4, %v963_v29, %v579_v3  ;;  %v318_v3 = vld [vmem:[#allocation2 + $0xf1] sm:$0xff] }
  0xa0   :  { %532 = vrot.lane.b32.xlu0 %v330_v63, %s3005_s23 }
  0xa1   :  { %v3520_v7 = vpop.permute.xlu1 %454 }
  0xa2   :  { %v643_v8 = vpop.permute.xlu0 %642 }
  0xa3   :  { %846 = vrot.lane.b32.xlu1 %v360_v53, %s3011_s29  ;;  %v997_v33 = vsel %vm996_vm5, %v980_v30, %v643_v8 }
  0xa4   :  { %784 = vrot.lane.b32.xlu0 %v393_v5, %s3010_s8 }
  0xa5   :  { %v707_v10 = vpop.permute.xlu1 %706 }
  0xa6   :  { %v645_v11 = vpop.permute.xlu0 %644  ;;  %v1014_v34 = vsel %vm1013_vm6, %v997_v33, %v707_v10  ;;  %v948_v10 = vsel %vm176_vm0, %v3276_v6, %v3520_v7  ;;  %v3617_v7 = vld [vmem:[#allocation2 + $0xf0] sm:$0xff] }
  0xa7   :  { %658 = vrot.lane.b32.xlu1 %v314_v58, %s3008_s22  ;;  %v998_v48 = vsel %vm996_vm5, %v981_v4, %v645_v11  ;;  %v364_v58 = vld [vmem:[#allocation2 + $0xe1] sm:$0xff] }
  0xa8   :  { %596 = vrot.lane.b32.xlu0 %v3524_v9, %s3007_s11  ;;  %v335_v4 = vld [vmem:[#allocation2 + $0x102] sm:$0xff] }
  0xa9   :  { %v3529_v13 = vpop.permute.xlu1 %518 }
  0xaa   :  { %v3531_v14 = vpop.permute.xlu0 %456  ;;  %v965_v11 = vsel %vm962_vm2, %v948_v10, %v3529_v13  ;;  %v334_v13 = vld [vmem:[#allocation2 + $0xf2] sm:$0xff] }
  0xab   :  { %910 = vrot.lane.b32.xlu1 %v376_v59, %s3012_s1  ;;  %v949_v25 = vsel %vm176_vm0, %v3349_v46, %v3531_v14 }
  0xac   :  { %848 = vrot.lane.b32.xlu0 %v409_v12, %s3011_s29 }
  0xad   :  { %v771_v16 = vpop.permute.xlu1 %770 }
  0xae   :  { %v709_v17 = vpop.permute.xlu0 %708  ;;  %v1031_v35 = vsel %vm1030_vm7, %v1014_v34, %v771_v16 }
  0xaf   :  { %660 = vrot.lane.b32.xlu1 %v362_v15, %s3008_s22  ;;  %v1015_v49 = vsel %vm1013_vm6, %v998_v48, %v709_v17 }
  0xb0   :  { %470 = vrot.lane.b32.xlu0 %v362_v15, %s3006_s24 }
  0xb1   :  { %v3537_v19 = vpop.permute.xlu1 %582 }
  0xb2   :  { %v3539_v20 = vpop.permute.xlu0 %520  ;;  %v982_v12 = vsel %vm979_vm4, %v965_v11, %v3537_v19 }
  0xb3   :  { %912 = vrot.lane.b32.xlu1 %v425_v18, %s3012_s1 }
  0xb4   :  { %722 = vrot.lane.b32.xlu0 %v330_v63, %s3009_s7 }
  0xb5   :  { %v835_v26 = vpop.permute.xlu1 %834 }
  0xb6   :  { %v773_v28 = vpop.permute.xlu0 %772  ;;  %v1048_v39 = vsel %vm1047_vm8, %v1031_v35, %v835_v26  ;;  %v966_v26 = vsel %vm962_vm2, %v949_v25, %v3539_v20  ;;  %v3640_v20 = vld [vmem:[#allocation2 + $0x100] sm:$0xff] }
  0xb7   :  { %534 = vrot.lane.b32.xlu1 %v331_v23, %s3005_s23  ;;  %v1032_v50 = vsel %vm1030_vm7, %v1015_v49, %v773_v28  ;;  %v384_v25 = vld [vmem:[#allocation2 + $0x122] sm:$0xff] }
  0xb8   :  { %472 = vrot.lane.b32.xlu0 %v316_v24, %s3006_s24 }
  0xb9   :  { %v647_v31 = vpop.permute.xlu1 %646 }
  0xba   :  { %v3548_v32 = vpop.permute.xlu0 %584  ;;  %v999_v17 = vsel %vm996_vm5, %v982_v12, %v647_v31 }
  0xbb   :  { %786 = vrot.lane.b32.xlu1 %v3524_v9, %s3010_s8  ;;  %v983_v28 = vsel %vm979_vm4, %v966_v26, %v3548_v32 }
  0xbc   :  { %724 = vrot.lane.b32.xlu0 %v331_v23, %s3009_s7 }
  0xbd   :  { %v899_v40 = vpop.permute.xlu1 %898 }
  0xbe   :  { %v837_v41 = vpop.permute.xlu0 %836  ;;  %v1065_v42 = vsel %vm1064_vm9, %v1048_v39, %v899_v40  ;;  %v366_v39 = vld [vmem:[#allocation2 + $0x101] sm:$0xff] }
  0xbf   :  { %598 = vrot.lane.b32.xlu1 %v3556_v36, %s3007_s11  ;;  %2887 = vmatprep.mubr.msk.f32.mxu0 %vm1090_vm10, %v1065_v42  ;;  %v1049_v52 = vsel %vm1047_vm8, %v1032_v50, %v837_v41 }
  0xc0   :  { %536 = vrot.lane.b32.xlu0 %v332_v37, %s3005_s23 }
  0xc1   :  { %v649_v44 = vpop.permute.xlu1 %648 }
  0xc2   :  { %v3570_v47 = vpop.permute.xlu0 %458  ;;  %v1000_v31 = vsel %vm996_vm5, %v983_v28, %v649_v44  ;;  %v320_v44 = vld [vmem:[#allocation2 + $0x111] sm:$0xff] }
  0xc3   :  { %850 = vrot.lane.b32.xlu1 %v362_v15, %s3011_s29  ;;  %v950_v50 = vsel %vm176_vm0, %v3391_v1, %v3570_v47  ;;  %v3679_v47 = vld [vmem:[#allocation2 + $0x110] sm:$0xff] }
  0xc4   :  { %788 = vrot.lane.b32.xlu0 %v3556_v36, %s3010_s8 }
  0xc5   :  { %v901_v53 = vpop.permute.xlu1 %900 }
  0xc6   :  { %v711_v54 = vpop.permute.xlu0 %710  ;;  %v1066_v55 = vsel %vm1064_vm9, %v1049_v52, %v901_v53 }
  0xc7   :  { %662 = vrot.lane.b32.xlu1 %v316_v24, %s3008_s22  ;;  %2888 = vmatmul.mubr.msk.f32.vlgmr.msra.gmra.mrb[0].mxu0 %vm1090_vm10, %v1066_v55  ;;  %v1016_v18 = vsel %vm1013_vm6, %v999_v17, %v711_v54 }
  0xc8   :  { %600 = vrot.lane.b32.xlu0 %v3578_v51, %s3007_s11 }
  0xc9   :  { %v3586_v56 = vpop.permute.xlu1 %522 }
  0xca   :  { %v3588_v57 = vpop.permute.xlu0 %460  ;;  %v967_v52 = vsel %vm962_vm2, %v950_v50, %v3586_v56  ;;  %v336_v56 = vld [vmem:[#allocation2 + $0x112] sm:$0xff] }
  0xcb   :  { %914 = vrot.lane.b32.xlu1 %v331_v23, %s3012_s1 }
  0xcc   :  { %852 = vrot.lane.b32.xlu0 %v316_v24, %s3011_s29 }
  0xcd   :  { %v775_v59 = vpop.permute.xlu1 %774 }
  0xce   :  { %v713_v60 = vpop.permute.xlu0 %712  ;;  %v1033_v6 = vsel %vm1030_vm7, %v1016_v18, %v775_v59 }
  0xcf   :  { %664 = vrot.lane.b32.xlu1 %v364_v58, %s3008_s22  ;;  %v1017_v46 = vsel %vm1013_vm6, %v1000_v31, %v713_v60 }
  0xd0   :  { %474 = vrot.lane.b32.xlu0 %v364_v58, %s3006_s24 }
  0xd1   :  { %v3594_v61 = vpop.permute.xlu1 %586 }
  0xd2   :  { %v3596_v63 = vpop.permute.xlu0 %524  ;;  %v984_v53 = vsel %vm979_vm4, %v967_v52, %v3594_v61 }
  0xd3   :  { %916 = vrot.lane.b32.xlu1 %v332_v37, %s3012_s1 }
  0xd4   :  { %726 = vrot.lane.b32.xlu0 %v332_v37, %s3009_s7 }
  0xd5   :  { %v839_v5 = vpop.permute.xlu1 %838 }
  0xd6   :  { %v777_v8 = vpop.permute.xlu0 %776  ;;  %v1050_v22 = vsel %vm1047_vm8, %v1033_v6, %v839_v5  ;;  %v951_v5 = vsel %vm176_vm0, %v3434_v21, %v3588_v57 }
  0xd7   :  { %538 = vrot.lane.b32.xlu1 %v333_v2, %s3005_s23  ;;  %v1034_v14 = vsel %vm1030_vm7, %v1017_v46, %v777_v8  ;;  %v968_v8 = vsel %vm962_vm2, %v951_v5, %v3596_v63  ;;  %v352_v63 = vld [vmem:[#allocation2 + $0x120] sm:$0xff] }
  0xd8   :  { %476 = vrot.lane.b32.xlu0 %v318_v3, %s3006_s24  ;;  %v297_v5 = vld [vmem:[#allocation2 + $0xa0] sm:$0xff] }
  0xd9   :  { %v651_v15 = vpop.permute.xlu1 %650 }
  0xda   :  { %v3609_v16 = vpop.permute.xlu0 %588 }
  0xdb   :  { %790 = vrot.lane.b32.xlu1 %v3578_v51, %s3010_s8  ;;  %v985_v10 = vsel %vm979_vm4, %v968_v8, %v3609_v16 }
  0xdc   :  { %728 = vrot.lane.b32.xlu0 %v333_v2, %s3009_s7 }
  0xdd   :  { %v903_v19 = vpop.permute.xlu1 %902 }
  0xde   :  { %v841_v23 = vpop.permute.xlu0 %840  ;;  %v1067_v24 = vsel %vm1064_vm9, %v1050_v22, %v903_v19  ;;  %v368_v19 = vld [vmem:[#allocation2 + $0x121] sm:$0xff] }
  0xdf   :  { %602 = vrot.lane.b32.xlu1 %v3617_v7, %s3007_s11  ;;  %2890 = vmatprep.mubr.msk.f32.mxu0 %vm1090_vm10, %v1067_v24  ;;  %v1051_v33 = vsel %vm1047_vm8, %v1034_v14, %v841_v23 }
  0xe0   :  { %540 = vrot.lane.b32.xlu0 %v334_v13, %s3005_s23 }
  0xe1   :  { %v653_v29 = vpop.permute.xlu1 %652 }
  0xe2   :  { %v3632_v30 = vpop.permute.xlu0 %462 }
  0xe3   :  { %854 = vrot.lane.b32.xlu1 %v364_v58, %s3011_s29  ;;  %v1001_v58 = vsel %vm996_vm5, %v984_v53, %v651_v15  ;;  %v1002_v15 = vsel %vm996_vm5, %v985_v10, %v653_v29  ;;  %v401_v29 = vld [vmem:[#allocation2 + $0x130] sm:$0xff]  ;;  %v952_v14 = vsel %vm176_vm0, %v3445_v27, %v3632_v30 }
  0xe4   :  { %792 = vrot.lane.b32.xlu0 %v3617_v7, %s3010_s8  ;;  %v433_v30 = vld [vmem:[#allocation2 + $0x132] sm:$0xff] }
  0xe5   :  { %v905_v34 = vpop.permute.xlu1 %904 }
  0xe6   :  { %v715_v32 = vpop.permute.xlu0 %714  ;;  %v1068_v35 = vsel %vm1064_vm9, %v1051_v33, %v905_v34  ;;  %v417_v34 = vld [vmem:[#allocation2 + $0x131] sm:$0xff] }
  0xe7   :  { %666 = vrot.lane.b32.xlu1 %v318_v3, %s3008_s22  ;;  %2891 = vmatmul.mubr.msk.f32.gmra.mrb[2].mxu0 %vm1090_vm10, %v1068_v35  ;;  %v1018_v59 = vsel %vm1013_vm6, %v1001_v58, %v715_v32 }
  0xe8   :  { %604 = vrot.lane.b32.xlu0 %v3640_v20, %s3007_s11 }
  0xe9   :  { %v3648_v37 = vpop.permute.xlu1 %526 }
  0xea   :  { %v3650_v38 = vpop.permute.xlu0 %464  ;;  %v969_v33 = vsel %vm962_vm2, %v952_v14, %v3648_v37 }
  0xeb   :  { %918 = vrot.lane.b32.xlu1 %v333_v2, %s3012_s1 }
  0xec   :  { %856 = vrot.lane.b32.xlu0 %v318_v3, %s3011_s29 }
  0xed   :  { %v779_v40 = vpop.permute.xlu1 %778 }
  0xee   :  { %v717_v41 = vpop.permute.xlu0 %716  ;;  %v1035_v1 = vsel %vm1030_vm7, %v1018_v59, %v779_v40 }
  0xef   :  { %668 = vrot.lane.b32.xlu1 %v366_v39, %s3008_s22  ;;  %v1019_v21 = vsel %vm1013_vm6, %v1002_v15, %v717_v41 }
  0xf0   :  { %478 = vrot.lane.b32.xlu0 %v366_v39, %s3006_s24 }
  0xf1   :  { %v3656_v42 = vpop.permute.xlu1 %590 }
  0xf2   :  { %v3658_v43 = vpop.permute.xlu0 %528  ;;  %v986_v32 = vsel %vm979_vm4, %v969_v33, %v3656_v42  ;;  %v953_v42 = vsel %vm176_vm0, %v3488_v45, %v3650_v38 }
  0xf3   :  { %920 = vrot.lane.b32.xlu1 %v334_v13, %s3012_s1 }
  0xf4   :  { %730 = vrot.lane.b32.xlu0 %v334_v13, %s3009_s7 }
  0xf5   :  { %v843_v48 = vpop.permute.xlu1 %842 }
  0xf6   :  { %v781_v49 = vpop.permute.xlu0 %780  ;;  %v1052_v60 = vsel %vm1047_vm8, %v1035_v1, %v843_v48 }
  0xf7   :  { %542 = vrot.lane.b32.xlu1 %v335_v4, %s3005_s23  ;;  %v1036_v57 = vsel %vm1030_vm7, %v1019_v21, %v781_v49  ;;  %v970_v49 = vsel %vm962_vm2, %v953_v42, %v3658_v43 }
  0xf8   :  { %480 = vrot.lane.b32.xlu0 %v320_v44, %s3006_s24 }
  0xf9   :  { %v655_v54 = vpop.permute.xlu1 %654 }
  0xfa   :  { %v3671_v55 = vpop.permute.xlu0 %592  ;;  %v1003_v40 = vsel %vm996_vm5, %v986_v32, %v655_v54 }
  0xfb   :  { %794 = vrot.lane.b32.xlu1 %v3640_v20, %s3010_s8  ;;  %v987_v50 = vsel %vm979_vm4, %v970_v49, %v3671_v55 }
  0xfc   :  { %732 = vrot.lane.b32.xlu0 %v335_v4, %s3009_s7 }
  0xfd   :  { %v907_v61 = vpop.permute.xlu1 %906 }
  0xfe   :  { %v845_v2 = vpop.permute.xlu0 %844  ;;  %v1069_v3 = vsel %vm1064_vm9, %v1052_v60, %v907_v61 }
  0xff   :  { %606 = vrot.lane.b32.xlu1 %v3679_v47, %s3007_s11  ;;  %2893 = vmatprep.mubr.msk.f32.mxu0 %vm1090_vm10, %v1069_v3  ;;  %v1053_v17 = vsel %vm1047_vm8, %v1036_v57, %v845_v2 }
 0x100   :  { %544 = vrot.lane.b32.xlu0 %v336_v56, %s3005_s23 }
 0x101   :  { %v657_v11 = vpop.permute.xlu1 %656 }
 0x102   :  { %v3694_v12 = vpop.permute.xlu0 %466  ;;  %v1004_v54 = vsel %vm996_vm5, %v987_v50, %v657_v11 }
 0x103   :  { %858 = vrot.lane.b32.xlu1 %v366_v39, %s3011_s29  ;;  %v954_v11 = vsel %vm176_vm0, %v297_v5, %v3694_v12 }
 0x104   :  { %796 = vrot.lane.b32.xlu0 %v3679_v47, %s3010_s8 }
 0x105   :  { %v909_v18 = vpop.permute.xlu1 %908 }
 0x106   :  { %v719_v6 = vpop.permute.xlu0 %718  ;;  %v1070_v16 = vsel %vm1064_vm9, %v1053_v17, %v909_v18 }
 0x107   :  { %670 = vrot.lane.b32.xlu1 %v320_v44, %s3008_s22  ;;  %2894 = vmatmul.mubr.msk.f32.gmra.mrb[4].mxu0 %vm1090_vm10, %v1070_v16  ;;  %v1020_v41 = vsel %vm1013_vm6, %v1003_v40, %v719_v6 }
 0x108   :  { %608 = vrot.lane.b32.xlu0 %v352_v63, %s3007_s11  ;;  %s3013_s11 = smov 48  }
 0x109   :  { %v531_v13 = vpop.permute.xlu1 %530 }
 0x10a   :  { %v3707_v22 = vpop.permute.xlu0 %468  ;;  %v971_v15 = vsel %vm962_vm2, %v954_v11, %v531_v13 }
 0x10b   :  { %922 = vrot.lane.b32.xlu1 %v335_v4, %s3012_s1  ;;  %v955_v12 = vsel %vm176_vm0, %v3513_v62, %v3707_v22 }
 0x10c   :  { %860 = vrot.lane.b32.xlu0 %v320_v44, %s3011_s29 }
 0x10d   :  { %v783_v23 = vpop.permute.xlu1 %782 }
 0x10e   :  { %v721_v24 = vpop.permute.xlu0 %720  ;;  %v1037_v27 = vsel %vm1030_vm7, %v1020_v41, %v783_v23 }
 0x10f   :  { %734 = vrot.lane.b32.xlu1 %v336_v56, %s3009_s7  ;;  %v1021_v58 = vsel %vm1013_vm6, %v1004_v54, %v721_v24 }
 0x110   :  { %672 = vrot.lane.b32.xlu0 %v368_v19, %s3008_s22 }
 0x111   :  { %v595_v26 = vpop.permute.xlu1 %594 }
 0x112   :  { %v3713_v28 = vpop.permute.xlu0 %532  ;;  %v988_v21 = vsel %vm979_vm4, %v971_v15, %v595_v26 }
 0x113   :  { %736 = vrot.lane.b32.xlu1 %v384_v25, %s3009_s7  ;;  %v972_v13 = vsel %vm962_vm2, %v955_v12, %v3713_v28  ;;  %s3014_s7 = smov 64  }
 0x114   :  { %924 = vrot.lane.b32.xlu0 %v336_v56, %s3012_s1 }
 0x115   :  { %v847_v31 = vpop.permute.xlu1 %846 }
 0x116   :  { %v785_v46 = vpop.permute.xlu0 %784  ;;  %v1054_v4 = vsel %vm1047_vm8, %v1037_v27, %v847_v31 }
 0x117   :  { %800 = vrot.lane.b32.xlu1 %v401_v29, %s3010_s8  ;;  %v1038_v45 = vsel %vm1030_vm7, %v1021_v58, %v785_v46 }
 0x118   :  { %798 = vrot.lane.b32.xlu0 %v352_v63, %s3010_s8 }
 0x119   :  { %v659_v35 = vpop.permute.xlu1 %658 }
 0x11a   :  { %v597_v39 = vpop.permute.xlu0 %596  ;;  %v1005_v17 = vsel %vm996_vm5, %v988_v21, %v659_v35 }
 0x11b   :  { %864 = vrot.lane.b32.xlu1 %v417_v34, %s3011_s29 }
 0x11c   :  { %862 = vrot.lane.b32.xlu0 %v368_v19, %s3011_s29  ;;  %s3015_s29 = smov 56  }
 0x11d   :  { %v911_v37 = vpop.permute.xlu1 %910 }
 0x11e   :  { %v849_v44 = vpop.permute.xlu0 %848  ;;  %v1071_v48 = vsel %vm1064_vm9, %v1054_v4, %v911_v37 }
 0x11f   :  { %928 = vrot.lane.b32.xlu1 %v433_v30, %s3012_s1  ;;  %2896 = vmatprep.mubr.msk.f32.mxu0 %vm1090_vm10, %v1071_v48  ;;  %v1055_v38 = vsel %vm1047_vm8, %v1038_v45, %v849_v44 }
 0x120   :  { %926 = vrot.lane.b32.xlu0 %v384_v25, %s3012_s1  ;;  %v989_v25 = vsel %vm979_vm4, %v972_v13, %v597_v39 }
 0x121   :  { %v661_v52 = vpop.permute.xlu1 %660 }
 0x122   :  { %v471_v53 = vpop.permute.xlu0 %470  ;;  %v1006_v31 = vsel %vm996_vm5, %v989_v25, %v661_v52 }
 0x123   :  { %v956_v4 = vsel %vm176_vm0, %v3524_v9, %v471_v53 }
 0x125   :  { %v913_v59 = vpop.permute.xlu1 %912 }
 0x126   :  { %v723_v1 = vpop.permute.xlu0 %722  ;;  %v1072_v56 = vsel %vm1064_vm9, %v1055_v38, %v913_v59 }
 0x127   :  { %2897 = vmatmul.mubr.msk.f32.gmra.mrb[6].mxu0 %vm1090_vm10, %v1072_v56  ;;  %v1022_v18 = vsel %vm1013_vm6, %v1005_v17, %v723_v1 }
 0x129   :  { %v535_v43 = vpop.permute.xlu1 %534 }
 0x12a   :  { %v473_v60 = vpop.permute.xlu0 %472  ;;  %v973_v37 = vsel %vm962_vm2, %v956_v4, %v535_v43 }
 0x12b   :  { %v957_v9 = vsel %vm176_vm0, %v3556_v36, %v473_v60 }
 0x12d   :  { %v787_v61 = vpop.permute.xlu1 %786 }
 0x12e   :  { %v725_v55 = vpop.permute.xlu0 %724  ;;  %v1039_v6 = vsel %vm1030_vm7, %v1022_v18, %v787_v61 }
 0x12f   :  { %v1023_v46 = vsel %vm1013_vm6, %v1006_v31, %v725_v55 }
 0x131   :  { %v599_v2 = vpop.permute.xlu1 %598 }
 0x132   :  { %v537_v3 = vpop.permute.xlu0 %536  ;;  %v990_v44 = vsel %vm979_vm4, %v973_v37, %v599_v2 }
 0x133   :  { %v974_v53 = vsel %vm962_vm2, %v957_v9, %v537_v3 }
 0x135   :  { %v851_v8 = vpop.permute.xlu1 %850 }
 0x136   :  { %v789_v10 = vpop.permute.xlu0 %788  ;;  %v1056_v16 = vsel %vm1047_vm8, %v1039_v6, %v851_v8 }
 0x137   :  { %v1040_v14 = vsel %vm1030_vm7, %v1023_v46, %v789_v10 }
 0x139   :  { %v663_v57 = vpop.permute.xlu1 %662 }
 0x13a   :  { %v601_v63 = vpop.permute.xlu0 %600  ;;  %v1007_v49 = vsel %vm996_vm5, %v990_v44, %v663_v57 }
 0x13b   :  { %v991_v59 = vsel %vm979_vm4, %v974_v53, %v601_v63 }
 0x13d   :  { %v915_v19 = vpop.permute.xlu1 %914 }
 0x13e   :  { %v853_v23 = vpop.permute.xlu0 %852  ;;  %v1073_v24 = vsel %vm1064_vm9, %v1056_v16, %v915_v19 }
 0x13f   :  { %2899 = vmatprep.mubr.msk.f32.mxu0 %vm1090_vm10, %v1073_v24  ;;  %v1057_v33 = vsel %vm1047_vm8, %v1040_v14, %v853_v23 }
 0x141   :  { %v665_v26 = vpop.permute.xlu1 %664 }
 0x142   :  { %v475_v29 = vpop.permute.xlu0 %474  ;;  %v1008_v43 = vsel %vm996_vm5, %v991_v59, %v665_v26 }
 0x143   :  { %v958_v17 = vsel %vm176_vm0, %v3578_v51, %v475_v29 }
 0x145   :  { %v917_v34 = vpop.permute.xlu1 %916 }
 0x146   :  { %v727_v32 = vpop.permute.xlu0 %726  ;;  %v1074_v62 = vsel %vm1064_vm9, %v1057_v33, %v917_v34 }
 0x147   :  { %2900 = vmatmul.mubr.msk.f32.gmra.mrb[8].mxu0 %vm1090_vm10, %v1074_v62  ;;  %v1024_v50 = vsel %vm1013_vm6, %v1007_v49, %v727_v32 }
 0x149   :  { %v539_v22 = vpop.permute.xlu1 %538 }
 0x14a   :  { %v477_v28 = vpop.permute.xlu0 %476  ;;  %v975_v18 = vsel %vm962_vm2, %v958_v17, %v539_v22 }
 0x14b   :  { %v959_v51 = vsel %vm176_vm0, %v3617_v7, %v477_v28 }
 0x14d   :  { %v791_v35 = vpop.permute.xlu1 %790 }
 0x14e   :  { %v729_v39 = vpop.permute.xlu0 %728  ;;  %v1041_v52 = vsel %vm1030_vm7, %v1024_v50, %v791_v35 }
 0x14f   :  { %v1025_v61 = vsel %vm1013_vm6, %v1008_v43, %v729_v39 }
 0x151   :  { %v603_v40 = vpop.permute.xlu1 %602 }
 0x152   :  { %v541_v41 = vpop.permute.xlu0 %540  ;;  %v992_v6 = vsel %vm979_vm4, %v975_v18, %v603_v40 }
 0x153   :  { %v976_v29 = vsel %vm962_vm2, %v959_v51, %v541_v41 }
 0x155   :  { %v855_v27 = vpop.permute.xlu1 %854 }
 0x156   :  { %v793_v30 = vpop.permute.xlu0 %792  ;;  %v1058_v54 = vsel %vm1047_vm8, %v1041_v52, %v855_v27 }
 0x157   :  { %v1042_v55 = vsel %vm1030_vm7, %v1025_v61, %v793_v30 }
 0x159   :  { %v667_v48 = vpop.permute.xlu1 %666 }
 0x15a   :  { %v605_v42 = vpop.permute.xlu0 %604  ;;  %v1009_v23 = vsel %vm996_vm5, %v992_v6, %v667_v48 }
 0x15b   :  { %v993_v46 = vsel %vm979_vm4, %v976_v29, %v605_v42 }
 0x15d   :  { %v919_v58 = vpop.permute.xlu1 %918 }
 0x15e   :  { %v857_v45 = vpop.permute.xlu0 %856  ;;  %v1075_v38 = vsel %vm1064_vm9, %v1058_v54, %v919_v58 }
 0x15f   :  { %2902 = vmatprep.mubr.msk.f32.mxu0 %vm1090_vm10, %v1075_v38  ;;  %v1059_v2 = vsel %vm1047_vm8, %v1042_v55, %v857_v45 }
 0x161   :  { %v669_v1 = vpop.permute.xlu1 %668 }
 0x162   :  { %v479_v56 = vpop.permute.xlu0 %478  ;;  %v1010_v34 = vsel %vm996_vm5, %v993_v46, %v669_v1  ;;  %v3834_v1 = vld [vmem:[%s4771_s3] ss:$0 sm:$0xff] }
 0x163   :  { %v960_v41 = vsel %vm176_vm0, %v3640_v20, %v479_v56 }
 0x165   :  { %v921_v5 = vpop.permute.xlu1 %920 }
 0x166   :  { %v731_v8 = vpop.permute.xlu0 %730  ;;  %v1076_v36 = vsel %vm1064_vm9, %v1059_v2, %v921_v5 }
 0x167   :  { %2903 = vmatmul.mubr.msk.f32.gmra.mrb[10].mxu0 %vm1090_vm10, %v1076_v36  ;;  %v1026_v24 = vsel %vm1013_vm6, %v1009_v23, %v731_v8 }
 0x169   :  { %v543_v60 = vpop.permute.xlu1 %542 }
 0x16a   :  { %v481_v3 = vpop.permute.xlu0 %480  ;;  %v977_v30 = vsel %vm962_vm2, %v960_v41, %v543_v60 }
 0x16b   :  { %v961_v27 = vsel %vm176_vm0, %v3679_v47, %v481_v3  ;;  %vm2332_vm0 = vcmask 588800  }
 0x16d   :  { %v795_v10 = vpop.permute.xlu1 %794 }
 0x16e   :  { %v733_v11 = vpop.permute.xlu0 %732  ;;  %v1043_v12 = vsel %vm1030_vm7, %v1026_v24, %v795_v10 }
 0x16f   :  { %v1027_v32 = vsel %vm1013_vm6, %v1010_v34, %v733_v11 }
 0x171   :  { %v607_v15 = vpop.permute.xlu1 %606 }
 0x172   :  { %v545_v21 = vpop.permute.xlu0 %544  ;;  %v994_v37 = vsel %vm979_vm4, %v977_v30, %v607_v15 }
 0x173   :  { %v978_v4 = vsel %vm962_vm2, %v961_v27, %v545_v21 }
 0x175   :  { %v859_v57 = vpop.permute.xlu1 %858 }
 0x176   :  { %v797_v63 = vpop.permute.xlu0 %796  ;;  %v1060_v13 = vsel %vm1047_vm8, %v1043_v12, %v859_v57 }
 0x177   :  { %v1044_v62 = vsel %vm1030_vm7, %v1027_v32, %v797_v63 }
 0x179   :  { %v671_v16 = vpop.permute.xlu1 %670 }
 0x17a   :  { %v609_v19 = vpop.permute.xlu0 %608  ;;  %v1011_v49 = vsel %vm996_vm5, %v994_v37, %v671_v16 }
 0x17b   :  { %v995_v44 = vsel %vm979_vm4, %v978_v4, %v609_v19 }
 0x17d   :  { %v923_v25 = vpop.permute.xlu1 %922 }
 0x17e   :  { %v861_v26 = vpop.permute.xlu0 %860  ;;  %v1077_v31 = vsel %vm1064_vm9, %v1060_v13, %v923_v25 }
 0x17f   :  { %2905 = vmatprep.mubr.msk.f32.mxu0 %vm1090_vm10, %v1077_v31  ;;  %v1061_v22 = vsel %vm1047_vm8, %v1044_v62, %v861_v26 }
 0x181   :  { %v735_v14 = vpop.permute.xlu1 %734 }
 0x182   :  { %v673_v33 = vpop.permute.xlu0 %672  ;;  %v1028_v52 = vsel %vm1013_vm6, %v1011_v49, %v735_v14  ;;  %v1570_v49 = vld [vmem:[#allocation3 + $0xa2] sm:$0xff] }
 0x183   :  { %v1012_v50 = vsel %vm996_vm5, %v995_v44, %v673_v33  ;;  %v1546_v44 = vld [vmem:[#allocation3 + $0x1] sm:$0xff]  ;;  %1771 = vrot.lane.b32.xlu1 %v1570_v49, %s3008_s22 }
 0x184   :  { %1691 = vrot.lane.b32.xlu0 %v1546_v44, %s3005_s23 }
 0x185   :  { %v737_v35 = vpop.permute.xlu1 %736 }
 0x186   :  { %v925_v39 = vpop.permute.xlu0 %924  ;;  %v1029_v20 = vsel %vm1013_vm6, %v1012_v50, %v737_v35  ;;  %v1634_v50 = vld [vmem:[#allocation3 + $0x90] sm:$0xff] }
 0x187   :  { %v1078_v7 = vsel %vm1064_vm9, %v1061_v22, %v925_v39  ;;  %2153 = vrot.lane.b32.xlu1 %v1666_v0, %s3014_s7 }
 0x188   :  { %2906 = vmatmul.mubr.msk.f32.gmra.mrb[12].mxu0 %vm1090_vm10, %v1078_v7 }
 0x189   :  { %v801_v28 = vpop.permute.xlu1 %800 }
 0x18a   :  { %v799_v40 = vpop.permute.xlu0 %798  ;;  %v1046_v47 = vsel %vm1030_vm7, %v1029_v20, %v801_v28 }
 0x18b   :  { %v1045_v54 = vsel %vm1030_vm7, %v1028_v52, %v799_v40  ;;  %v1650_v52 = vld [vmem:[#allocation3 + $0x91] sm:$0xff] }
 0x18d   :  { %v865_v48 = vpop.permute.xlu1 %864 }
 0x18e   :  { %v863_v42 = vpop.permute.xlu0 %862  ;;  %v1063_v58 = vsel %vm1047_vm8, %v1046_v47, %v865_v48  ;;  %v1562_v48 = vld [vmem:[#allocation3 + $0x2] sm:$0xff] }
 0x18f   :  { %v1062_v45 = vsel %vm1047_vm8, %v1045_v54, %v863_v42  ;;  %1755 = vrot.lane.b32.xlu0 %v1562_v48, %s3008_s22  ;;  %v1554_v42 = vld [vmem:[#allocation3 + $0xa1] sm:$0xff] }
 0x191   :  { %v929_v38 = vpop.permute.xlu1 %928 }
 0x192   :  { %v927_v9 = vpop.permute.xlu0 %926  ;;  %v1080_v53 = vsel %vm1064_vm9, %v1063_v58, %v929_v38 }
 0x193   :  { %v1079_v59 = vsel %vm1064_vm9, %v1062_v45, %v927_v9  ;;  %1707 = vrot.lane.b32.xlu0 %v1554_v42, %s3005_s23 }
 0x194   :  { %2908 = vmatprep.mubr.msk.f32.mxu0 %vm1090_vm10, %v1079_v59 }
 0x195   :  { %2909 = vmatmul.mubr.msk.f32.gmra.mrb[14].mxu0 %vm1090_vm10, %v1080_v53 }
 0x197   :  { %2025 = vrot.lane.b32.xlu0 %v1634_v50, %s3013_s11 }
 0x19a   :  { %v2889_v56 = vpop.f32.mrb[0].mxu0 }
 0x19b   :  { %v3837_v43 = vadd.f32 %v2889_v56, %v3834_v1  ;;  %v1209_v61 = vpop.f32.mrb[1].mxu0  ;;  %2089 = vrot.lane.b32.xlu0 %v1650_v52, %s3015_s29 }
 0x19c   :  { %v3840_v55 = vadd.f32 %v3834_v1, %v1209_v61 }
 0x19d   :  { %v1289_v2 = vsel %vm962_vm2, %v3837_v43, 0.0 }
 0x19e   :  { %v1288_v5 = vsel %vm962_vm2, %v3840_v55, 0.0 }
 0x19f   :  { %v1290_v8 = vadd.f32 %v1289_v2, %v1288_v5 }
 0x1ba   :  { %v2892_v36 = vpop.f32.mrb[2].mxu0 }
 0x1bb   :  { %v1219_v60 = vpop.f32.mrb[3].mxu0  ;;  %v3847_v3 = vadd.f32 %v2892_v36, %v3834_v1 }
 0x1bc   :  { %v3850_v10 = vadd.f32 %v3834_v1, %v1219_v60 }
 0x1bd   :  { %v1293_v21 = vsel %vm962_vm2, %v3847_v3, 0.0 }
 0x1be   :  { %v1291_v11 = vsel %vm962_vm2, %v3850_v10, 0.0 }
 0x1bf   :  { %v1292_v15 = vadd.f32 %v1291_v11, %v1290_v8 }
 0x1c1   :  { %v1294_v57 = vadd.f32 %v1293_v21, %v1292_v15 }
 0x1da   :  { %v2895_v63 = vpop.f32.mrb[4].mxu0 }
 0x1db   :  { %v1229_v17 = vpop.f32.mrb[5].mxu0  ;;  %v3857_v18 = vadd.f32 %v2895_v63, %v3834_v1 }
 0x1dc   :  { %v3860_v6 = vadd.f32 %v3834_v1, %v1229_v17 }
 0x1dd   :  { %v1297_v23 = vsel %vm962_vm2, %v3857_v18, 0.0 }
 0x1de   :  { %v1295_v16 = vsel %vm962_vm2, %v3860_v6, 0.0 }
 0x1df   :  { %v1296_v19 = vadd.f32 %v1295_v16, %v1294_v57 }
 0x1e1   :  { %v1298_v24 = vadd.f32 %v1297_v23, %v1296_v19 }
 0x1fa   :  { %v2898_v12 = vpop.f32.mrb[6].mxu0 }
 0x1fb   :  { %v1239_v13 = vpop.f32.mrb[7].mxu0  ;;  %v3867_v25 = vadd.f32 %v2898_v12, %v3834_v1 }
 0x1fc   :  { %v3870_v26 = vadd.f32 %v3834_v1, %v1239_v13 }
 0x1fd   :  { %v1301_v29 = vsel %vm962_vm2, %v3867_v25, 0.0 }
 0x1fe   :  { %v1299_v31 = vsel %vm962_vm2, %v3870_v26, 0.0 }
 0x1ff   :  { %v1300_v51 = vadd.f32 %v1299_v31, %v1298_v24 }
 0x201   :  { %v1302_v46 = vadd.f32 %v1301_v29, %v1300_v51 }
 0x21a   :  { %v2901_v14 = vpop.f32.mrb[8].mxu0 }
 0x21b   :  { %v1249_v33 = vpop.f32.mrb[9].mxu0  ;;  %v3877_v34 = vadd.f32 %v2901_v14, %v3834_v1 }
 0x21c   :  { %v3880_v32 = vadd.f32 %v3834_v1, %v1249_v33 }
 0x21d   :  { %v1305_v35 = vsel %vm962_vm2, %v3877_v34, 0.0 }
 0x21e   :  { %v1303_v62 = vsel %vm962_vm2, %v3880_v32, 0.0 }
 0x21f   :  { %v1304_v22 = vadd.f32 %v1303_v62, %v1302_v46 }
 0x221   :  { %v1306_v39 = vadd.f32 %v1305_v35, %v1304_v22 }
 0x23a   :  { %v2904_v7 = vpop.f32.mrb[10].mxu0 }
 0x23b   :  { %v1259_v28 = vpop.f32.mrb[11].mxu0  ;;  %v3887_v40 = vadd.f32 %v2904_v7, %v3834_v1 }
 0x23c   :  { %v3890_v41 = vadd.f32 %v3834_v1, %v1259_v28 }
 0x23d   :  { %v1309_v4 = vsel %vm962_vm2, %v3887_v40, 0.0 }
 0x23e   :  { %v1307_v27 = vsel %vm962_vm2, %v3890_v41, 0.0 }
 0x23f   :  { %v1308_v30 = vadd.f32 %v1307_v27, %v1306_v39 }
 0x241   :  { %v1310_v37 = vadd.f32 %v1309_v4, %v1308_v30 }
 0x25b   :  { %v2907_v20 = vpop.f32.mrb[12].mxu0 }
 0x25c   :  { %v1269_v47 = vpop.f32.mrb[13].mxu0  ;;  %v1275_v54 = vadd.f32 %v2907_v20, %v3834_v1 }
 0x25d   :  { %v1270_v58 = vadd.f32 %v3834_v1, %v1269_v47 }
 0x25e   :  { %v1313_v9 = vsel %vm962_vm2, %v1275_v54, 0.0 }
 0x25f   :  { %v1311_v45 = vsel %vm962_vm2, %v1270_v58, 0.0 }
 0x260   :  { %v1312_v38 = vadd.f32 %v1311_v45, %v1310_v37 }
 0x262   :  { %v1314_v53 = vadd.f32 %v1313_v9, %v1312_v38 }
 0x268   :  { %v2910_v59 = vpop.f32.mrb[14].mxu0 }
 0x269   :  { %v1279_v56 = vpop.f32.mrb[15].mxu0  ;;  %v1285_v61 = vadd.f32 %v2910_v59, %v3834_v1 }
 0x26a   :  { %v1280_v2 = vadd.f32 %v3834_v1, %v1279_v56 }
 0x26b   :  { %v1317_v36 = vsel %vm962_vm2, %v1285_v61, 0.0 }
 0x26c   :  { %v1315_v5 = vsel %vm962_vm2, %v1280_v2, 0.0 }
 0x26d   :  { %v1316_v8 = vadd.f32 %v1315_v5, %v1314_v53 }
 0x26f   :  { %v1318_v60 = vadd.f32 %v1317_v36, %v1316_v8 }
 0x271   :  { %v1319_v11 = vrot.slane %v1318_v60, 4 }
 0x273   :  { %v1320_v15 = vadd.f32 %v1319_v11, %v1318_v60 }
 0x275   :  { %v1321_v21 = vrot.slane %v1320_v15, 2 }
 0x277   :  { %v1322_v57 = vadd.f32 %v1321_v21, %v1320_v15 }
 0x279   :  { %v1323_v63 = vrot.slane %v1322_v57, 1 }
 0x27b   :  { %v1324_v17 = vadd.f32 %v1323_v63, %v1322_v57 }
 0x27d   :  { %v1326_v16 = vmul.f32 0.0078125, %v1324_v17 }
 0x27f   :  { %v3952_v19 = vsub.f32 %v3840_v55, %v1326_v16  ;;  %v3955_v23 = vsub.f32 %v3837_v43, %v1326_v16  ;;  %v3958_v1 = vsub.f32 %v3850_v10, %v1326_v16  ;;  %v3961_v24 = vsub.f32 %v3847_v3, %v1326_v16 }
 0x280   :  { %v3964_v12 = vsub.f32 %v3860_v6, %v1326_v16  ;;  %v3967_v13 = vsub.f32 %v3857_v18, %v1326_v16  ;;  %v3970_v31 = vsub.f32 %v3870_v26, %v1326_v16  ;;  %v3973_v55 = vsub.f32 %v3867_v25, %v1326_v16 }
 0x281   :  { %v3976_v43 = vsub.f32 %v3880_v32, %v1326_v16  ;;  %v3979_v10 = vsub.f32 %v3877_v34, %v1326_v16  ;;  %v3982_v3 = vsub.f32 %v3890_v41, %v1326_v16  ;;  %v3985_v6 = vsub.f32 %v3887_v40, %v1326_v16 }
 0x282   :  { %v3987_v18 = vsub.f32 %v1270_v58, %v1326_v16  ;;  %v3989_v51 = vsub.f32 %v1275_v54, %v1326_v16  ;;  %v3991_v26 = vsub.f32 %v1280_v2, %v1326_v16  ;;  %v3993_v25 = vsub.f32 %v1285_v61, %v1326_v16 }
 0x283   :  { %v1343_v29 = vmul.f32 %v3952_v19, %v3952_v19  ;;  %v1344_v46 = vmul.f32 %v3955_v23, %v3955_v23  ;;  %v1345_v14 = vmul.f32 %v3958_v1, %v3958_v1  ;;  %v1346_v33 = vmul.f32 %v3961_v24, %v3961_v24 }
 0x284   :  { %v1347_v22 = vmul.f32 %v3964_v12, %v3964_v12  ;;  %v1348_v7 = vmul.f32 %v3967_v13, %v3967_v13  ;;  %v1349_v41 = vmul.f32 %v3970_v31, %v3970_v31  ;;  %v1350_v4 = vmul.f32 %v3973_v55, %v3973_v55 }
 0x285   :  { %v1359_v34 = vsel %vm962_vm2, %v1343_v29, 0.0  ;;  %v1360_v32 = vsel %vm962_vm2, %v1344_v46, 0.0  ;;  %v1362_v35 = vsel %vm962_vm2, %v1345_v14, 0.0  ;;  %v1364_v28 = vsel %vm962_vm2, %v1346_v33, 0.0 }
 0x286   :  { %v1361_v62 = vadd.f32 %v1360_v32, %v1359_v34  ;;  %v1366_v27 = vsel %vm962_vm2, %v1347_v22, 0.0  ;;  %v1368_v37 = vsel %vm962_vm2, %v1348_v7, 0.0  ;;  %v1351_v48 = vmul.f32 %v3976_v43, %v3976_v43 }
 0x287   :  { %v1370_v42 = vsel %vm962_vm2, %v1349_v41, 0.0  ;;  %v1352_v50 = vmul.f32 %v3979_v10, %v3979_v10  ;;  %v1372_v0 = vsel %vm962_vm2, %v1350_v4, 0.0  ;;  %v1353_v20 = vmul.f32 %v3982_v3, %v3982_v3  ;;  %v2810_v41 = vld [vmem:[%s4771_s3 + $0x1] ss:$0 sm:$0xff] }
 0x288   :  { %v1363_v39 = vadd.f32 %v1362_v35, %v1361_v62  ;;  %v1374_v47 = vsel %vm962_vm2, %v1351_v48, 0.0  ;;  %v1354_v58 = vmul.f32 %v3985_v6, %v3985_v6  ;;  %v1355_v9 = vmul.f32 %v3987_v18, %v3987_v18 }
 0x289   :  { %v1376_v45 = vsel %vm962_vm2, %v1352_v50, 0.0  ;;  %v1378_v53 = vsel %vm962_vm2, %v1353_v20, 0.0  ;;  %v1356_v56 = vmul.f32 %v3989_v51, %v3989_v51  ;;  %v1357_v5 = vmul.f32 %v3991_v26, %v3991_v26 }
 0x28a   :  { %v1365_v40 = vadd.f32 %v1364_v28, %v1363_v39  ;;  %v1380_v61 = vsel %vm962_vm2, %v1354_v58, 0.0  ;;  %v1382_v8 = vsel %vm962_vm2, %v1355_v9, 0.0  ;;  %v1358_v60 = vmul.f32 %v3993_v25, %v3993_v25 }
 0x28b   :  { %v1384_v11 = vsel %vm962_vm2, %v1356_v56, 0.0  ;;  %v1386_v21 = vsel %vm962_vm2, %v1357_v5, 0.0 }
 0x28c   :  { %v1367_v30 = vadd.f32 %v1366_v27, %v1365_v40  ;;  %v1388_v63 = vsel %vm962_vm2, %v1358_v60, 0.0 }
 0x28e   :  { %v1369_v44 = vadd.f32 %v1368_v37, %v1367_v30 }
 0x290   :  { %v1371_v49 = vadd.f32 %v1370_v42, %v1369_v44 }
 0x292   :  { %v1373_v52 = vadd.f32 %v1372_v0, %v1371_v49 }
 0x294   :  { %v1375_v54 = vadd.f32 %v1374_v47, %v1373_v52 }
 0x296   :  { %v1377_v38 = vadd.f32 %v1376_v45, %v1375_v54 }
 0x298   :  { %v1379_v59 = vadd.f32 %v1378_v53, %v1377_v38 }
 0x29a   :  { %v1381_v2 = vadd.f32 %v1380_v61, %v1379_v59 }
 0x29c   :  { %v1383_v36 = vadd.f32 %v1382_v8, %v1381_v2 }
 0x29e   :  { %v1385_v15 = vadd.f32 %v1384_v11, %v1383_v36 }
 0x2a0   :  { %v1387_v57 = vadd.f32 %v1386_v21, %v1385_v15 }
 0x2a2   :  { %v1389_v17 = vadd.f32 %v1388_v63, %v1387_v57 }
 0x2a4   :  { %v1390_v16 = vrot.slane %v1389_v17, 4 }
 0x2a6   :  { %v1391_v29 = vadd.f32 %v1390_v16, %v1389_v17 }
 0x2a8   :  { %v1392_v46 = vrot.slane %v1391_v29, 2 }
 0x2aa   :  { %v1393_v14 = vadd.f32 %v1392_v46, %v1391_v29 }
 0x2ac   :  { %v1394_v33 = vrot.slane %v1393_v14, 1 }
 0x2ae   :  { %v1395_v34 = vadd.f32 %v1394_v33, %v1393_v14 }
 0x2b0   :  { %v1396_v32 = vmul.f32 0.0078125, %v1395_v34 }
 0x2b2   :  { %v1397_v62 = vmax.f32 %v1396_v32, 0.0 }
 0x2b4   :  { %v1398_v22 = vadd.f32 1e-05, %v1397_v62 }
 0x2b6   :  { %3000 = vrsqrt.f32 %v1398_v22 }
 0x2c0   :  { %v3001_v35 = vpop.eup %3000 }
 0x2c1   :  { %v1400_v39 = vmul.f32 %v3001_v35, %v3952_v19  ;;  %v1401_v7 = vmul.f32 %v3001_v35, %v3955_v23  ;;  %v1402_v28 = vmul.f32 %v3001_v35, %v3958_v1  ;;  %v1403_v40 = vmul.f32 %v3001_v35, %v3961_v24 }
 0x2c2   :  { %v1404_v27 = vmul.f32 %v3001_v35, %v3964_v12  ;;  %v1405_v30 = vmul.f32 %v3001_v35, %v3967_v13  ;;  %v1406_v4 = vmul.f32 %v3001_v35, %v3970_v31  ;;  %v1407_v37 = vmul.f32 %v3001_v35, %v3973_v55 }
 0x2c3   :  { %v1408_v19 = vmul.f32 %v3001_v35, %v3976_v43  ;;  %v1409_v23 = vmul.f32 %v3001_v35, %v3979_v10  ;;  %v1410_v1 = vmul.f32 %v3001_v35, %v3982_v3  ;;  %v1411_v24 = vmul.f32 %v3001_v35, %v3985_v6  ;;  %v2811_v43 = vld [vmem:[%s4771_s3 + $0x2] ss:$0 sm:$0xff] }
 0x2c4   :  { %v1412_v44 = vmul.f32 %v3001_v35, %v3987_v18  ;;  %v1413_v48 = vmul.f32 %v3001_v35, %v3989_v51  ;;  %v1414_v12 = vmul.f32 %v3001_v35, %v3991_v26  ;;  %v1415_v13 = vmul.f32 %v3001_v35, %v3993_v25 }
 0x2c5   :  { %v1420_v42 = vmul.f32 %v2810_v41, %v1400_v39  ;;  %v1421_v31 = vmul.f32 %v2810_v41, %v1401_v7  ;;  %v1422_v49 = vmul.f32 %v2810_v41, %v1402_v28  ;;  %v1423_v55 = vmul.f32 %v2810_v41, %v1403_v40 }
 0x2c6   :  { %v1424_v10 = vmul.f32 %v2810_v41, %v1404_v27  ;;  %v1425_v3 = vmul.f32 %v2810_v41, %v1405_v30  ;;  %v1426_v50 = vmul.f32 %v2810_v41, %v1406_v4  ;;  %v1427_v6 = vmul.f32 %v2810_v41, %v1407_v37 }
 0x2c7   :  { %v1428_v0 = vmul.f32 %v2810_v41, %v1408_v19  ;;  %v1429_v18 = vmul.f32 %v2810_v41, %v1409_v23  ;;  %v1430_v52 = vmul.f32 %v2810_v41, %v1410_v1  ;;  %v1431_v51 = vmul.f32 %v2810_v41, %v1411_v24 }
 0x2c8   :  { %v1432_v20 = vmul.f32 %v2810_v41, %v1412_v44  ;;  %v1433_v26 = vmul.f32 %v2810_v41, %v1413_v48  ;;  %v1434_v47 = vmul.f32 %v2810_v41, %v1414_v12  ;;  %v1435_v25 = vmul.f32 %v2810_v41, %v1415_v13  ;;  %v2319_v44 = vld [vmem:[%s4772_s2] sm:$0xff]  ;;  %v2320_v48 = vld [vmem:[%s4772_s2 + $0x8] sm:$0xff]  ;;  %v2321_v13 = vld [vmem:[%s4772_s2 + $0x10] sm:$0xff] }
 0x2c9   :  { %v1442_v54 = vadd.f32 %v2811_v43, %v1422_v49  ;;  %v1443_v58 = vadd.f32 %v2811_v43, %v1423_v55  ;;  %v1444_v45 = vadd.f32 %v2811_v43, %v1424_v10  ;;  %v1445_v38 = vadd.f32 %v2811_v43, %v1425_v3  ;;  %v2323_v55 = vld [vmem:[%s4772_s2 + $0x20] sm:$0xff] }
 0x2ca   :  { %v1446_v9 = vadd.f32 %v2811_v43, %v1426_v50  ;;  %v1447_v53 = vadd.f32 %v2811_v43, %v1427_v6  ;;  %v1448_v59 = vadd.f32 %v2811_v43, %v1428_v0  ;;  %v1449_v56 = vadd.f32 %v2811_v43, %v1429_v18  ;;  %v2325_v50 = vld [vmem:[%s4772_s2 + $0x30] sm:$0xff]  ;;  %v2326_v6 = vld [vmem:[%s4772_s2 + $0x38] sm:$0xff]  ;;  %v2327_v18 = vld [vmem:[%s4772_s2 + $0x40] sm:$0xff] }
 0x2cb   :  { %v1450_v61 = vadd.f32 %v2811_v43, %v1430_v52  ;;  %v1451_v2 = vadd.f32 %v2811_v43, %v1431_v51  ;;  %v1452_v5 = vadd.f32 %v2811_v43, %v1432_v20  ;;  %v1453_v8 = vadd.f32 %v2811_v43, %v1433_v26 }
 0x2cc   :  { %v1454_v36 = vadd.f32 %v2811_v43, %v1434_v47  ;;  %v1455_v60 = vadd.f32 %v2811_v43, %v1435_v25  ;;  %v1458_v11 = vmax.f32 %v1442_v54, 0.0  ;;  %v1459_v15 = vmax.f32 %v1443_v58, 0.0  ;;  %v4184_v58 = vpop.permute.xlu0 %1691 }
 0x2cd   :  { %v1460_v21 = vmax.f32 %v1444_v45, 0.0  ;;  %v1461_v57 = vmax.f32 %v1445_v38, 0.0  ;;  %v1462_v63 = vmax.f32 %v1446_v9, 0.0  ;;  %v1463_v17 = vmax.f32 %v1447_v53, 0.0 }
 0x2ce   :  { %v1464_v16 = vmax.f32 %v1448_v59, 0.0  ;;  %v1465_v29 = vmax.f32 %v1449_v56, 0.0  ;;  %v1466_v46 = vmax.f32 %v1450_v61, 0.0  ;;  %v1467_v14 = vmax.f32 %v1451_v2, 0.0  ;;  %1516 = vst.msk [vmem:[#allocation3 + $0x31] sm:$0xff] %vm962_vm2, %v1458_v11  ;;  %1517 = vst.msk [vmem:[#allocation3 + $0x41] sm:$0xff] %vm962_vm2, %v1459_v15  ;;  %v4203_v59 = vpop.permute.xlu1 %1771 }
 0x2cf   :  { %v1468_v33 = vmax.f32 %v1452_v5, 0.0  ;;  %v1469_v34 = vmax.f32 %v1453_v8, 0.0  ;;  %v1470_v32 = vmax.f32 %v1454_v36, 0.0  ;;  %v1471_v62 = vmax.f32 %v1455_v60, 0.0  ;;  %1518 = vst.msk [vmem:[#allocation3 + $0x51] sm:$0xff] %vm962_vm2, %v1460_v21  ;;  %1519 = vst.msk [vmem:[#allocation3 + $0x61] sm:$0xff] %vm962_vm2, %v1461_v57 }
 0x2d0   :  { %1520 = vst.msk [vmem:[#allocation3 + $0x71] sm:$0xff] %vm962_vm2, %v1462_v63  ;;  %1521 = vst.msk [vmem:[#allocation3 + $0x81] sm:$0xff] %vm962_vm2, %v1463_v17  ;;  %v1440_v22 = vadd.f32 %v2811_v43, %v1420_v42  ;;  %v1441_v35 = vadd.f32 %v2811_v43, %v1421_v31  ;;  %v2961_v12 = vpack.c.bf16 %v2320_v48, %v2319_v44  ;;  %v2322_v42 = vld [vmem:[%s4772_s2 + $0x18] sm:$0xff]  ;;  %v2324_v43 = vld [vmem:[%s4772_s2 + $0x28] sm:$0xff]  ;;  %v4192_v38 = vpop.permute.xlu0 %1755 }
 0x2d1   :  { %1524 = vst.msk [vmem:[#allocation3 + $0xd1] sm:$0xff] %vm962_vm2, %v1466_v46  ;;  %1525 = vst.msk [vmem:[#allocation3 + $0xe1] sm:$0xff] %vm962_vm2, %v1467_v14  ;;  %v2965_v31 = vpack.c.bf16 %v2322_v42, %v2321_v13  ;;  %v2969_v10 = vpack.c.bf16 %v2324_v43, %v2323_v55  ;;  %v2973_v0 = vpack.c.bf16 %v2326_v6, %v2325_v50  ;;  %v1530_v13 = vld [vmem:[#allocation3] sm:$0xff] }
 0x2d2   :  { %1522 = vst.msk [vmem:[#allocation3 + $0xb1] sm:$0xff] %vm962_vm2, %v1464_v16  ;;  %1523 = vst.msk [vmem:[#allocation3 + $0xc1] sm:$0xff] %vm962_vm2, %v1465_v29  ;;  %v1456_v39 = vmax.f32 %v1440_v22, 0.0  ;;  %v1457_v7 = vmax.f32 %v1441_v35, 0.0  ;;  %2962 = vmatprep.subr.bf16.mxu0 %v2961_v12  ;;  %2977 = vmatprep.subr.bf16.mxu1 %v2961_v12  ;;  %v4211_v8 = vpop.permute.xlu1 %2153 }
 0x2d3   :  { %1526 = vst.msk [vmem:[#allocation3 + $0xf1] sm:$0xff] %vm962_vm2, %v1468_v33  ;;  %1527 = vst.msk [vmem:[#allocation3 + $0x101] sm:$0xff] %vm962_vm2, %v1469_v34  ;;  %2964 = vmatpush3.bf16.msra.mxu0 %v2961_v12  ;;  %2982 = vmatpush3.bf16.msra.mxu1 %v2961_v12 }
 0x2d4   :  { %1528 = vst.msk [vmem:[#allocation3 + $0x111] sm:$0xff] %vm962_vm2, %v1470_v32  ;;  %1529 = vst.msk [vmem:[#allocation3 + $0x121] sm:$0xff] %vm962_vm2, %v1471_v62  ;;  %2966 = vmatprep.subr.bf16.mxu0 %v2965_v31  ;;  %2978 = vmatprep.subr.bf16.mxu1 %v2965_v31  ;;  %v4199_v53 = vpop.permute.xlu0 %1707 }
 0x2d5   :  { %1514 = vst.msk [vmem:[#allocation3 + $0x11] sm:$0xff] %vm962_vm2, %v1456_v39  ;;  %1515 = vst.msk [vmem:[#allocation3 + $0x21] sm:$0xff] %vm962_vm2, %v1457_v7  ;;  %v4083_v41 = vld [vmem:[#allocation3 + $0x31] sm:$0xff]  ;;  %v4103_v23 = vld [vmem:[#allocation3 + $0x40] sm:$0xff] }
 0x2d6   :  { %v4096_v37 = vld [vmem:[#allocation3 + $0x32] sm:$0xff]  ;;  %v1550_v24 = vld [vmem:[#allocation3 + $0x41] sm:$0xff] }
 0x2d7   :  { %v4105_v1 = vld [vmem:[#allocation3 + $0x30] sm:$0xff]  ;;  %v1566_v49 = vld [vmem:[#allocation3 + $0x42] sm:$0xff]  ;;  %2968 = vmatpush3.bf16.msra.mxu0 %v2965_v31  ;;  %2983 = vmatpush3.bf16.msra.mxu1 %v2965_v31  ;;  %v2187_v31 = vsel %vm962_vm2, %v1530_v13, %v4184_v58 }
 0x2d8   :  { %v1551_v3 = vld [vmem:[#allocation3 + $0x51] sm:$0xff]  ;;  %2970 = vmatprep.subr.bf16.mxu0 %v2969_v10  ;;  %2979 = vmatprep.subr.bf16.mxu1 %v2969_v10  ;;  %v4165_v20 = vld [vmem:[#allocation3 + $0x60] sm:$0xff]  ;;  %v4205_v56 = vpop.permute.xlu0 %2025  ;;  %v2203_v43 = vsel %vm996_vm5, %v2187_v31, %v4192_v38 }
 0x2d9   :  { %v4157_v52 = vld [vmem:[#allocation3 + $0x50] sm:$0xff]  ;;  %v1552_v26 = vld [vmem:[#allocation3 + $0x61] sm:$0xff] }
 0x2da   :  { %v1567_v51 = vld [vmem:[#allocation3 + $0x52] sm:$0xff]  ;;  %v1615_v25 = vld [vmem:[#allocation3 + $0x62] sm:$0xff] }
 0x2db   :  { %2972 = vmatpush3.bf16.msra.mxu0 %v2969_v10  ;;  %2984 = vmatpush3.bf16.msra.mxu1 %v2969_v10  ;;  %v1553_v47 = vld [vmem:[#allocation3 + $0x71] sm:$0xff]  ;;  %v1585_v9 = vld [vmem:[#allocation3 + $0x80] sm:$0xff] }
 0x2dc   :  { %v1563_v28 = vld [vmem:[#allocation3 + $0x12] sm:$0xff]  ;;  %v1548_v27 = vld [vmem:[#allocation3 + $0x21] sm:$0xff]  ;;  %2974 = vmatprep.subr.bf16.mxu0 %v2973_v0  ;;  %2980 = vmatprep.subr.bf16.mxu1 %v2973_v0  ;;  %v4213_v36 = vpop.permute.xlu0 %2089 }
 0x2dd   :  { %v1547_v40 = vld [vmem:[#allocation3 + $0x11] sm:$0xff]  ;;  %1757 = vrot.lane.b32.xlu0 %v1563_v28, %s3008_s22  ;;  %v4088_v30 = vld [vmem:[#allocation3 + $0x20] sm:$0xff] }
 0x2de   :  { %1693 = vrot.lane.b32.xlu1 %v1547_v40, %s3005_s23  ;;  %v4090_v4 = vld [vmem:[#allocation3 + $0x10] sm:$0xff]  ;;  %v1564_v19 = vld [vmem:[#allocation3 + $0x22] sm:$0xff] }
 0x2df   :  { %2976 = vmatpush3.bf16.msra.mxu0 %v2973_v0  ;;  %2985 = vmatpush3.bf16.msra.mxu1 %v2973_v0  ;;  %v1569_v54 = vld [vmem:[#allocation3 + $0x72] sm:$0xff]  ;;  %v1617_v2 = vld [vmem:[#allocation3 + $0x82] sm:$0xff] }
 0x2e0   :  { %2927 = vmatprep.subr.mxu0 %v2327_v18  ;;  %2981 = vmatprep.subr.mxu1 %v2327_v18  ;;  %v4186_v45 = vld [vmem:[#allocation3 + $0x70] sm:$0xff]  ;;  %v1601_v5 = vld [vmem:[#allocation3 + $0x81] sm:$0xff] }
 0x2e1   :  { %1697 = vrot.lane.b32.xlu0 %v4083_v41, %s3005_s23  ;;  %v1555_v61 = vld [vmem:[#allocation3 + $0xb1] sm:$0xff]  ;;  %v4221_v21 = vld [vmem:[#allocation3 + $0xc0] sm:$0xff] }
 0x2e2   :  { %1695 = vrot.lane.b32.xlu1 %v1548_v27, %s3005_s23  ;;  %v1571_v60 = vld [vmem:[#allocation3 + $0xb2] sm:$0xff]  ;;  %v1556_v17 = vld [vmem:[#allocation3 + $0xc1] sm:$0xff] }
 0x2e3   :  { %2928 = vmatpush3.msra.mxu0 %v2327_v18  ;;  %2986 = vmatpush3.msra.mxu1 %v2327_v18  ;;  %v4230_v16 = vld [vmem:[#allocation3 + $0xb0] sm:$0xff]  ;;  %v1619_v22 = vld [vmem:[#allocation3 + $0xc2] sm:$0xff] }
 0x2e4   :  { %v1557_v34 = vld [vmem:[#allocation3 + $0xd1] sm:$0xff]  ;;  %v4279_v42 = vld [vmem:[#allocation3 + $0xe1] sm:$0xff] }
 0x2e5   :  { %1821 = vrot.lane.b32.xlu0 %v4088_v30, %s3010_s8  ;;  %v1573_v7 = vld [vmem:[#allocation3 + $0xd2] sm:$0xff]  ;;  %v1621_v58 = vld [vmem:[#allocation3 + $0xe2] sm:$0xff] }
 0x2e6   :  { %1819 = vrot.lane.b32.xlu1 %v4090_v4, %s3010_s8  ;;  %v1559_v0 = vld [vmem:[#allocation3 + $0xf1] sm:$0xff] }
 0x2e9   :  { %1761 = vrot.lane.b32.xlu0 %v4096_v37, %s3008_s22 }
 0x2ea   :  { %1759 = vrot.lane.b32.xlu1 %v1564_v19, %s3008_s22 }
 0x2ed   :  { %1885 = vrot.lane.b32.xlu0 %v1548_v27, %s3012_s1 }
 0x2ee   :  { %1883 = vrot.lane.b32.xlu1 %v1547_v40, %s3012_s1 }
 0x2f1   :  { %1825 = vrot.lane.b32.xlu0 %v4103_v23, %s3010_s8 }
 0x2f2   :  { %1823 = vrot.lane.b32.xlu1 %v4105_v1, %s3010_s8 }
 0x2f5   :  { %1949 = vrot.lane.b32.xlu0 %v1564_v19, %s3016_s30 }
 0x2f6   :  { %1947 = vrot.lane.b32.xlu1 %v1563_v28, %s3016_s30 }
 0x2f9   :  { %1699 = vrot.lane.b32.xlu0 %v1550_v24, %s3005_s23 }
 0x2fa   :  { %1887 = vrot.lane.b32.xlu1 %v4083_v41, %s3012_s1 }
 0x2fd   :  { %1951 = vrot.lane.b32.xlu0 %v4096_v37, %s3016_s30 }
 0x2fe   :  { %2011 = vrot.lane.b32.xlu1 %v4088_v30, %s3013_s11 }
 0x301   :  { %2075 = vrot.lane.b32.xlu0 %v1548_v27, %s3015_s29 }
 0x302   :  { %1889 = vrot.lane.b32.xlu1 %v1550_v24, %s3012_s1 }
 0x305   :  { %1763 = vrot.lane.b32.xlu0 %v1566_v49, %s3008_s22 }
 0x306   :  { %2013 = vrot.lane.b32.xlu1 %v4105_v1, %s3013_s11 }
 0x309   :  { %2015 = vrot.lane.b32.xlu0 %v4103_v23, %s3013_s11 }
 0x30a   :  { %1701 = vrot.lane.b32.xlu1 %v1551_v3, %s3005_s23 }
 0x30d   :  { %2139 = vrot.lane.b32.xlu0 %v1564_v19, %s3014_s7  ;;  %v4266_v19 = vld [vmem:[#allocation3 + $0xe0] sm:$0xff] }
 0x30e   :  { %1953 = vrot.lane.b32.xlu1 %v1566_v49, %s3016_s30 }
 0x311   :  { %1827 = vrot.lane.b32.xlu0 %v4157_v52, %s3010_s8 }
 0x312   :  { %2077 = vrot.lane.b32.xlu1 %v4083_v41, %s3015_s29  ;;  %v4257_v41 = vld [vmem:[#allocation3 + $0xd0] sm:$0xff] }
 0x315   :  { %2079 = vrot.lane.b32.xlu0 %v1550_v24, %s3015_s29 }
 0x316   :  { %1765 = vrot.lane.b32.xlu1 %v1567_v51, %s3008_s22 }
 0x319   :  { %1829 = vrot.lane.b32.xlu0 %v4165_v20, %s3010_s8 }
 0x31a   :  { %2017 = vrot.lane.b32.xlu1 %v4157_v52, %s3013_s11 }
 0x31d   :  { %2081 = vrot.lane.b32.xlu0 %v1551_v3, %s3015_s29 }
 0x31e   :  { %2141 = vrot.lane.b32.xlu1 %v4096_v37, %s3014_s7 }
 0x321   :  { %1703 = vrot.lane.b32.xlu0 %v1552_v26, %s3005_s23 }
 0x322   :  { %1891 = vrot.lane.b32.xlu1 %v1551_v3, %s3012_s1 }
 0x325   :  { %1955 = vrot.lane.b32.xlu0 %v1567_v51, %s3016_s30 }
 0x326   :  { %2143 = vrot.lane.b32.xlu1 %v1566_v49, %s3014_s7 }
 0x329   :  { %1705 = vrot.lane.b32.xlu0 %v1553_v47, %s3005_s23 }
 0x32a   :  { %1893 = vrot.lane.b32.xlu1 %v1552_v26, %s3012_s1 }
 0x32d   :  { %1957 = vrot.lane.b32.xlu0 %v1615_v25, %s3016_s30 }
 0x32e   :  { %2145 = vrot.lane.b32.xlu1 %v1567_v51, %s3014_s7 }
 0x331   :  { %1769 = vrot.lane.b32.xlu0 %v1569_v54, %s3008_s22 }
 0x332   :  { %1767 = vrot.lane.b32.xlu1 %v1615_v25, %s3008_s22 }
 0x335   :  { %2021 = vrot.lane.b32.xlu0 %v4186_v45, %s3013_s11 }
 0x336   :  { %2019 = vrot.lane.b32.xlu1 %v4165_v20, %s3013_s11 }
 0x339   :  { %1833 = vrot.lane.b32.xlu0 %v1585_v9, %s3010_s8 }
 0x33a   :  { %1831 = vrot.lane.b32.xlu1 %v4186_v45, %s3010_s8 }
 0x33d   :  { %2085 = vrot.lane.b32.xlu0 %v1553_v47, %s3015_s29 }
 0x33e   :  { %2083 = vrot.lane.b32.xlu1 %v1552_v26, %s3015_s29 }
 0x341   :  { %1959 = vrot.lane.b32.xlu0 %v1569_v54, %s3016_s30 }
 0x342   :  { %1895 = vrot.lane.b32.xlu1 %v1553_v47, %s3012_s1 }
 0x345   :  { %1709 = vrot.lane.b32.xlu0 %v1555_v61, %s3005_s23 }
 0x346   :  { %2147 = vrot.lane.b32.xlu1 %v1615_v25, %s3014_s7 }
 0x349   :  { %1961 = vrot.lane.b32.xlu0 %v1617_v2, %s3016_s30 }
 0x34a   :  { %1897 = vrot.lane.b32.xlu1 %v1601_v5, %s3012_s1 }
 0x34d   :  { %1773 = vrot.lane.b32.xlu0 %v1571_v60, %s3008_s22 }
 0x34e   :  { %2149 = vrot.lane.b32.xlu1 %v1569_v54, %s3014_s7 }
 0x34f   :  { %v4217_v11 = vpop.permute.xlu0 %1757 }
 0x350   :  { %v4219_v15 = vpop.permute.xlu1 %1693 }
 0x351   :  { %1837 = vrot.lane.b32.xlu0 %v4221_v21, %s3010_s8 }
 0x352   :  { %2023 = vrot.lane.b32.xlu1 %v1585_v9, %s3013_s11 }
 0x353   :  { %v4226_v57 = vpop.permute.xlu0 %1697 }
 0x354   :  { %v4228_v63 = vpop.permute.xlu1 %1695 }
 0x355   :  { %1711 = vrot.lane.b32.xlu0 %v1556_v17, %s3005_s23 }
 0x356   :  { %1835 = vrot.lane.b32.xlu1 %v4230_v16, %s3010_s8 }
 0x357   :  { %v4235_v29 = vpop.permute.xlu0 %1821 }
 0x358   :  { %v1820_v46 = vpop.permute.xlu1 %1819 }
 0x359   :  { %1963 = vrot.lane.b32.xlu0 %v1571_v60, %s3016_s30  ;;  %v2219_v10 = vsel %vm1030_vm7, %v2203_v43, %v1820_v46 }
 0x35a   :  { %2087 = vrot.lane.b32.xlu1 %v1601_v5, %s3015_s29 }
 0x35b   :  { %v4239_v14 = vpop.permute.xlu0 %1761 }
 0x35c   :  { %v4241_v33 = vpop.permute.xlu1 %1759 }
 0x35d   :  { %1713 = vrot.lane.b32.xlu0 %v1557_v34, %s3005_s23 }
 0x35e   :  { %1899 = vrot.lane.b32.xlu1 %v1555_v61, %s3012_s1  ;;  %v4308_v61 = vld [vmem:[#allocation3 + $0xf2] sm:$0xff] }
 0x35f   :  { %v4245_v32 = vpop.permute.xlu0 %1885 }
 0x360   :  { %v1884_v62 = vpop.permute.xlu1 %1883 }
 0x361   :  { %1965 = vrot.lane.b32.xlu0 %v1619_v22, %s3016_s30  ;;  %v2235_v6 = vsel %vm1064_vm9, %v2219_v10, %v1884_v62 }
 0x362   :  { %2151 = vrot.lane.b32.xlu1 %v1617_v2, %s3014_s7  ;;  %v2188_v2 = vsel %vm962_vm2, %v4090_v4, %v4219_v15  ;;  %v4331_v15 = vld [vmem:[#allocation3 + $0x100] sm:$0xff] }
 0x363   :  { %v4249_v35 = vpop.permute.xlu0 %1825  ;;  %v2204_v46 = vsel %vm996_vm5, %v2188_v2, %v4217_v11  ;;  %v1577_v2 = vld [vmem:[#allocation3 + $0x112] sm:$0xff] }
 0x364   :  { %v4251_v39 = vpop.permute.xlu1 %1823 }
 0x365   :  { %1777 = vrot.lane.b32.xlu0 %v1573_v7, %s3008_s22 }
 0x366   :  { %1901 = vrot.lane.b32.xlu1 %v1556_v17, %s3012_s1 }
 0x367   :  { %v4255_v28 = vpop.permute.xlu0 %1949 }
 0x368   :  { %v1948_v40 = vpop.permute.xlu1 %1947 }
 0x369   :  { %2029 = vrot.lane.b32.xlu0 %v4257_v41, %s3013_s11  ;;  %v2252_v18 = vsel %vm2251_vm12, %v2235_v6, %v1948_v40 }
 0x36a   :  { %1775 = vrot.lane.b32.xlu1 %v1619_v22, %s3008_s22 }
 0x36b   :  { %v4262_v27 = vpop.permute.xlu0 %1699 }
 0x36c   :  { %v4264_v37 = vpop.permute.xlu1 %1887 }
 0x36d   :  { %1841 = vrot.lane.b32.xlu0 %v4266_v19, %s3010_s8 }
 0x36e   :  { %2027 = vrot.lane.b32.xlu1 %v4221_v21, %s3013_s11 }
 0x36f   :  { %v4272_v24 = vpop.permute.xlu0 %1951 }
 0x370   :  { %v2012_v44 = vpop.permute.xlu1 %2011 }
 0x371   :  { %2093 = vrot.lane.b32.xlu0 %v1557_v34, %s3015_s29  ;;  %v2269_v51 = vsel %vm2268_vm13, %v2252_v18, %v2012_v44 }
 0x372   :  { %1839 = vrot.lane.b32.xlu1 %v4257_v41, %s3010_s8 }
 0x373   :  { %v2076_v48 = vpop.permute.xlu0 %2075 }
 0x374   :  { %v4277_v12 = vpop.permute.xlu1 %1889  ;;  %v2286_v26 = vsel %vm2285_vm14, %v2269_v51, %v2076_v48 }
 0x375   :  { %1715 = vrot.lane.b32.xlu0 %v4279_v42, %s3005_s23 }
 0x376   :  { %2091 = vrot.lane.b32.xlu1 %v1556_v17, %s3015_s29  ;;  %v4318_v17 = vld [vmem:[#allocation3 + $0xf0] sm:$0xff] }
 0x377   :  { %v4286_v49 = vpop.permute.xlu0 %1763 }
 0x378   :  { %v2014_v55 = vpop.permute.xlu1 %2013 }
 0x379   :  { %1967 = vrot.lane.b32.xlu0 %v1573_v7, %s3016_s30 }
 0x37a   :  { %1903 = vrot.lane.b32.xlu1 %v1557_v34, %s3012_s1  ;;  %v2220_v34 = vsel %vm1030_vm7, %v2204_v46, %v4235_v29  ;;  %v4394_v46 = vld [vmem:[#allocation3 + $0x110] sm:$0xff] }
 0x37b   :  { %v2016_v3 = vpop.permute.xlu0 %2015  ;;  %v2236_v4 = vsel %vm1064_vm9, %v2220_v34, %v4245_v32  ;;  %v2189_v32 = vsel %vm962_vm2, %v4088_v30, %v4228_v63  ;;  %v1560_v30 = vld [vmem:[#allocation3 + $0x101] sm:$0xff] }
 0x37c   :  { %v4293_v50 = vpop.permute.xlu1 %1701 }
 0x37d   :  { %1717 = vrot.lane.b32.xlu0 %v1559_v0, %s3005_s23 }
 0x37e   :  { %2155 = vrot.lane.b32.xlu1 %v1619_v22, %s3014_s7 }
 0x37f   :  { %v2140_v47 = vpop.permute.xlu0 %2139 }
 0x380   :  { %v1954_v25 = vpop.permute.xlu1 %1953  ;;  %v2303_v54 = vsel %vm2302_vm15, %v2286_v26, %v2140_v47 }
 0x381   :  { %1969 = vrot.lane.b32.xlu0 %v1621_v58, %s3016_s30  ;;  %2929 = vmatprep.mubr.msk.f32.mxu0 %vm2332_vm0, %v2303_v54 }
 0x382   :  { %1905 = vrot.lane.b32.xlu1 %v4279_v42, %s3012_s1 }
 0x383   :  { %v4306_v38 = vpop.permute.xlu0 %1827 }
 0x384   :  { %v2078_v9 = vpop.permute.xlu1 %2077 }
 0x385   :  { %1781 = vrot.lane.b32.xlu0 %v4308_v61, %s3008_s22 }
 0x386   :  { %2157 = vrot.lane.b32.xlu1 %v1573_v7, %s3014_s7  ;;  %v2253_v7 = vsel %vm2251_vm12, %v2236_v4, %v4255_v28  ;;  %v2205_v28 = vsel %vm996_vm5, %v2189_v32, %v4241_v33  ;;  %v1593_v4 = vld [vmem:[#allocation3 + $0x120] sm:$0xff] }
 0x387   :  { %v2080_v5 = vpop.permute.xlu0 %2079  ;;  %v2270_v11 = vsel %vm2268_vm13, %v2253_v7, %v2014_v55  ;;  %v2221_v13 = vsel %vm1030_vm7, %v2205_v28, %v4251_v39  ;;  %v1609_v28 = vld [vmem:[#allocation3 + $0x121] sm:$0xff] }
 0x388   :  { %v4316_v60 = vpop.permute.xlu1 %1765  ;;  %v2287_v29 = vsel %vm2285_vm14, %v2270_v11, %v2078_v9  ;;  %v2237_v43 = vsel %vm1064_vm9, %v2221_v13, %v4264_v37  ;;  %v2190_v37 = vsel %vm962_vm2, %v4105_v1, %v4226_v57  ;;  %v1561_v1 = vld [vmem:[#allocation3 + $0x111] sm:$0xff]  ;;  %v1623_v9 = vld [vmem:[#allocation3 + $0x102] sm:$0xff]  ;;  %v2191_v11 = vsel %vm962_vm2, %v4103_v23, %v4262_v27 }
 0x389   :  { %2033 = vrot.lane.b32.xlu0 %v4318_v17, %s3013_s11  ;;  %v2254_v63 = vsel %vm2251_vm12, %v2237_v43, %v4272_v24  ;;  %v2206_v24 = vsel %vm996_vm5, %v2190_v37, %v4239_v14 }
 0x38a   :  { %1779 = vrot.lane.b32.xlu1 %v1621_v58, %s3008_s22  ;;  %v2271_v33 = vsel %vm2268_vm13, %v2254_v63, %v2016_v3 }
 0x38b   :  { %v4327_v62 = vpop.permute.xlu0 %1829  ;;  %v2288_v10 = vsel %vm2285_vm14, %v2271_v33, %v2080_v5 }
 0x38c   :  { %v2018_v22 = vpop.permute.xlu1 %2017 }
 0x38d   :  { %1845 = vrot.lane.b32.xlu0 %v4331_v15, %s3010_s8 }
 0x38e   :  { %2031 = vrot.lane.b32.xlu1 %v4266_v19, %s3013_s11 }
 0x38f   :  { %v2082_v40 = vpop.permute.xlu0 %2081 }
 0x390   :  { %v2142_v44 = vpop.permute.xlu1 %2141 }
 0x391   :  { %v2304_v48 = vsel %vm2302_vm15, %v2287_v29, %v2142_v44  ;;  %2097 = vrot.lane.b32.xlu0 %v1559_v0, %s3015_s29  ;;  %v2207_v29 = vsel %vm996_vm5, %v2191_v11, %v4286_v49 }
 0x392   :  { %1843 = vrot.lane.b32.xlu1 %v4318_v17, %s3010_s8  ;;  %2930 = vmatmul.mubr.msk.f32.vlgmr.msra.gmra.mrb[16].mxu0 %vm2332_vm0, %v2304_v48 }
 0x393   :  { %v4353_v31 = vpop.permute.xlu0 %1703 }
 0x394   :  { %v1892_v55 = vpop.permute.xlu1 %1891 }
 0x395   :  { %1719 = vrot.lane.b32.xlu0 %v1560_v30, %s3005_s23 }
 0x396   :  { %2095 = vrot.lane.b32.xlu1 %v4279_v42, %s3015_s29  ;;  %v2222_v42 = vsel %vm1030_vm7, %v2206_v24, %v4249_v35 }
 0x397   :  { %v1956_v39 = vpop.permute.xlu0 %1955  ;;  %v2238_v26 = vsel %vm1064_vm9, %v2222_v42, %v4277_v12  ;;  %v1673_v42 = vld [vmem:[#allocation3 + $0x122] sm:$0xff] }
 0x398   :  { %v2144_v6 = vpop.permute.xlu1 %2143  ;;  %v2255_v57 = vsel %vm2251_vm12, %v2238_v26, %v1954_v25  ;;  %v1642_v26 = vld [vmem:[#allocation3 + $0x130] sm:$0xff] }
 0x399   :  { %v2305_v18 = vsel %vm2302_vm15, %v2288_v10, %v2144_v6  ;;  %1971 = vrot.lane.b32.xlu0 %v4308_v61, %s3016_s30  ;;  %v2272_v14 = vsel %vm2268_vm13, %v2255_v57, %v2018_v22 }
 0x39a   :  { %1907 = vrot.lane.b32.xlu1 %v1559_v0, %s3012_s1  ;;  %2932 = vmatprep.mubr.msk.f32.mxu1 %vm2332_vm0, %v2305_v18  ;;  %v2289_v0 = vsel %vm2285_vm14, %v2272_v14, %v2082_v40  ;;  %v2223_v40 = vsel %vm1030_vm7, %v2207_v29, %v4306_v38 }
 0x39b   :  { %v4376_v3 = vpop.permute.xlu0 %1705  ;;  %v2239_v32 = vsel %vm1064_vm9, %v2223_v40, %v1892_v55  ;;  %v2192_v55 = vsel %vm962_vm2, %v4157_v52, %v4293_v50 }
 0x39c   :  { %v1894_v51 = vpop.permute.xlu1 %1893  ;;  %v2256_v13 = vsel %vm2251_vm12, %v2239_v32, %v1956_v39 }
 0x39d   :  { %1721 = vrot.lane.b32.xlu0 %v1561_v1, %s3005_s23 }
 0x39e   :  { %2159 = vrot.lane.b32.xlu1 %v1621_v58, %s3014_s7 }
 0x39f   :  { %v1958_v47 = vpop.permute.xlu0 %1957 }
 0x3a0   :  { %v2146_v54 = vpop.permute.xlu1 %2145 }
 0x3a1   :  { %v2306_v35 = vsel %vm2302_vm15, %v2289_v0, %v2146_v54  ;;  %1973 = vrot.lane.b32.xlu0 %v1623_v9, %s3016_s30  ;;  %v1658_v54 = vld [vmem:[#allocation3 + $0x131] sm:$0xff] }
 0x3a2   :  { %1909 = vrot.lane.b32.xlu1 %v1560_v30, %s3012_s1  ;;  %2933 = vmatmul.mubr.msk.f32.vlgmr.msra.gmra.mrb[0].mxu1 %vm2332_vm0, %v2306_v35  ;;  %v2193_v35 = vsel %vm962_vm2, %v4165_v20, %v4353_v31 }
 0x3a3   :  { %v1770_v12 = vpop.permute.xlu0 %1769 }
 0x3a4   :  { %v4389_v25 = vpop.permute.xlu1 %1767 }
 0x3a5   :  { %1785 = vrot.lane.b32.xlu0 %v1577_v2, %s3008_s22 }
 0x3a6   :  { %2161 = vrot.lane.b32.xlu1 %v4308_v61, %s3014_s7 }
 0x3a7   :  { %v2022_v58 = vpop.permute.xlu0 %2021 }
 0x3a8   :  { %v2020_v5 = vpop.permute.xlu1 %2019 }
 0x3a9   :  { %2037 = vrot.lane.b32.xlu0 %v4394_v46, %s3013_s11  ;;  %v2273_v23 = vsel %vm2268_vm13, %v2256_v13, %v2020_v5  ;;  %v1674_v5 = vld [vmem:[#allocation3 + $0x132] sm:$0xff] }
 0x3aa   :  { %1783 = vrot.lane.b32.xlu1 %v1623_v9, %s3008_s22 }
 0x3ab   :  { %v1834_v34 = vpop.permute.xlu0 %1833 }
 0x3ac   :  { %v4399_v22 = vpop.permute.xlu1 %1831 }
 0x3ad   :  { %1849 = vrot.lane.b32.xlu0 %v1593_v4, %s3010_s8 }
 0x3ae   :  { %2035 = vrot.lane.b32.xlu1 %v4331_v15, %s3013_s11 }
 0x3af   :  { %v2086_v7 = vpop.permute.xlu0 %2085 }
 0x3b0   :  { %v2084_v61 = vpop.permute.xlu1 %2083 }
 0x3b1   :  { %2101 = vrot.lane.b32.xlu0 %v1561_v1, %s3015_s29  ;;  %v2290_v27 = vsel %vm2285_vm14, %v2273_v23, %v2084_v61 }
 0x3b2   :  { %1847 = vrot.lane.b32.xlu1 %v4394_v46, %s3010_s8 }
 0x3b3   :  { %v1960_v44 = vpop.permute.xlu0 %1959 }
 0x3b4   :  { %v1896_v48 = vpop.permute.xlu1 %1895 }
 0x3b5   :  { %1913 = vrot.lane.b32.xlu0 %v1609_v28, %s3012_s1 }
 0x3b6   :  { %2099 = vrot.lane.b32.xlu1 %v1560_v30, %s3015_s29  ;;  %v2208_v30 = vsel %vm996_vm5, %v2192_v55, %v4316_v60 }
 0x3b7   :  { %v4420_v43 = vpop.permute.xlu0 %1709  ;;  %v2224_v63 = vsel %vm1030_vm7, %v2208_v30, %v4327_v62 }
 0x3b8   :  { %v2148_v49 = vpop.permute.xlu1 %2147  ;;  %v2240_v39 = vsel %vm1064_vm9, %v2224_v63, %v1894_v51  ;;  %v2194_v51 = vsel %vm962_vm2, %v4186_v45, %v4376_v3  ;;  %v2209_v45 = vsel %vm996_vm5, %v2193_v35, %v4389_v25 }
 0x3b9   :  { %v2307_v38 = vsel %vm2302_vm15, %v2290_v27, %v2148_v49  ;;  %2165 = vrot.lane.b32.xlu0 %v1577_v2, %s3014_s7  ;;  %v2257_v6 = vsel %vm2251_vm12, %v2240_v39, %v1958_v47 }
 0x3ba   :  { %1911 = vrot.lane.b32.xlu1 %v1561_v1, %s3012_s1  ;;  %2935 = vmatprep.mubr.msk.f32.mxu1 %vm2332_vm0, %v2307_v38  ;;  %v2274_v52 = vsel %vm2268_vm13, %v2257_v6, %v2022_v58  ;;  %v2210_v1 = vsel %vm996_vm5, %v2194_v51, %v1770_v12  ;;  %v2225_v12 = vsel %vm1030_vm7, %v2209_v45, %v4399_v22 }
 0x3bb   :  { %v1962_v33 = vpop.permute.xlu0 %1961  ;;  %v2291_v50 = vsel %vm2285_vm14, %v2274_v52, %v2086_v7  ;;  %v2226_v0 = vsel %vm1030_vm7, %v2210_v1, %v1834_v34  ;;  %v2241_v58 = vsel %vm1064_vm9, %v2225_v12, %v1896_v48 }
 0x3bc   :  { %v1898_v10 = vpop.permute.xlu1 %1897  ;;  %v2258_v31 = vsel %vm2251_vm12, %v2241_v58, %v1960_v44 }
 0x3bd   :  { %2039 = vrot.lane.b32.xlu0 %v1593_v4, %s3013_s11  ;;  %v2242_v47 = vsel %vm1064_vm9, %v2226_v0, %v1898_v10 }
 0x3be   :  { %2163 = vrot.lane.b32.xlu1 %v1623_v9, %s3014_s7  ;;  %v2259_v3 = vsel %vm2251_vm12, %v2242_v47, %v1962_v33 }
 0x3bf   :  { %v4439_v60 = vpop.permute.xlu0 %1773  ;;  %v2276_v34 = vsel %vm2268_vm13, %v2259_v3, %v4205_v56 }
 0x3c0   :  { %v2150_v18 = vpop.permute.xlu1 %2149  ;;  %v2293_v22 = vsel %vm2285_vm14, %v2276_v34, %v4213_v36  ;;  %v1538_v36 = vld [vmem:[#allocation3 + $0xa0] sm:$0xff] }
 0x3c1   :  { %v2308_v37 = vsel %vm2302_vm15, %v2291_v50, %v2150_v18  ;;  %2103 = vrot.lane.b32.xlu0 %v1609_v28, %s3015_s29  ;;  %v2310_v56 = vsel %vm2302_vm15, %v2293_v22, %v4211_v8  ;;  %v2195_v49 = vsel %vm962_vm2, %v1538_v36, %v4199_v53  ;;  %v2196_v53 = vsel %vm962_vm2, %v4230_v16, %v4420_v43 }
 0x3c2   :  { %1975 = vrot.lane.b32.xlu1 %v1577_v2, %s3016_s30  ;;  %2936 = vmatmul.mubr.msk.f32.gmra.mrb[2].mxu1 %vm2332_vm0, %v2308_v37  ;;  %v2211_v8 = vsel %vm996_vm5, %v2195_v49, %v4203_v59  ;;  %v2212_v59 = vsel %vm996_vm5, %v2196_v53, %v4439_v60 }
 0x3c3   :  { %v4445_v62 = vpop.permute.xlu0 %1837 }
 0x3c4   :  { %v2024_v24 = vpop.permute.xlu1 %2023 }
 0x3c5   :  { %2167 = vrot.lane.b32.xlu0 %v1673_v42, %s3014_s7  ;;  %v2275_v25 = vsel %vm2268_vm13, %v2258_v31, %v2024_v24  ;;  %v2228_v24 = vsel %vm1030_vm7, %v2212_v59, %v4445_v62 }
 0x3c6   :  { %1977 = vrot.lane.b32.xlu1 %v1673_v42, %s3016_s30 }
 0x3c7   :  { %v4453_v57 = vpop.permute.xlu0 %1711 }
 0x3c8   :  { %v1836_v14 = vpop.permute.xlu1 %1835  ;;  %v2197_v45 = vsel %vm962_vm2, %v4221_v21, %v4453_v57 }
 0x3c9   :  { %v2227_v30 = vsel %vm1030_vm7, %v2211_v8, %v1836_v14 }
 0x3ca   :  { %2041 = vrot.lane.b32.xlu1 %v1642_v26, %s3013_s11 }
 0x3cb   :  { %v1964_v9 = vpop.permute.xlu0 %1963 }
 0x3cc   :  { %v2088_v2 = vpop.permute.xlu1 %2087 }
 0x3cd   :  { %v2292_v7 = vsel %vm2285_vm14, %v2275_v25, %v2088_v2 }
 0x3ce   :  { %2105 = vrot.lane.b32.xlu1 %v1658_v54, %s3015_s29 }
 0x3cf   :  { %v4470_v4 = vpop.permute.xlu0 %1713 }
 0x3d0   :  { %v1900_v20 = vpop.permute.xlu1 %1899 }
 0x3d1   :  { %v2243_v63 = vsel %vm1064_vm9, %v2227_v30, %v1900_v20 }
 0x3d2   :  { %2169 = vrot.lane.b32.xlu1 %v1674_v5, %s3014_s7  ;;  %v2260_v39 = vsel %vm2251_vm12, %v2243_v63, %v1964_v9 }
 0x3d3   :  { %v1966_v61 = vpop.permute.xlu0 %1965 }
 0x3d4   :  { %v2152_v11 = vpop.permute.xlu1 %2151 }
 0x3d5   :  { %v2309_v29 = vsel %vm2302_vm15, %v2292_v7, %v2152_v11  ;;  %v2198_v7 = vsel %vm962_vm2, %v4257_v41, %v4470_v4 }
 0x3d6   :  { %2938 = vmatprep.mubr.msk.f32.mxu1 %vm2332_vm0, %v2309_v29 }
 0x3d7   :  { %2939 = vmatmul.mubr.msk.f32.gmra.mrb[4].mxu1 %vm2332_vm0, %v2310_v56  ;;  %v1778_v40 = vpop.permute.xlu0 %1777 }
 0x3d8   :  { %v1902_v44 = vpop.permute.xlu1 %1901  ;;  %v2214_v11 = vsel %vm996_vm5, %v2198_v7, %v1778_v40 }
 0x3d9   :  { %v2244_v42 = vsel %vm1064_vm9, %v2228_v24, %v1902_v44 }
 0x3da   :  { %v2261_v16 = vsel %vm2251_vm12, %v2244_v42, %v1966_v61 }
 0x3db   :  { %v2030_v48 = vpop.permute.xlu0 %2029 }
 0x3dc   :  { %v1776_v32 = vpop.permute.xlu1 %1775  ;;  %v2278_v43 = vsel %vm2268_vm13, %v2261_v16, %v2030_v48 }
 0x3dd   :  { %v2213_v58 = vsel %vm996_vm5, %v2197_v45, %v1776_v32 }
 0x3df   :  { %v1842_v28 = vpop.permute.xlu0 %1841 }
 0x3e0   :  { %v2028_v13 = vpop.permute.xlu1 %2027  ;;  %v2230_v56 = vsel %vm1030_vm7, %v2214_v11, %v1842_v28 }
 0x3e1   :  { %v2277_v6 = vsel %vm2268_vm13, %v2260_v39, %v2028_v13 }
 0x3e3   :  { %v2094_v23 = vpop.permute.xlu0 %2093 }
 0x3e4   :  { %v1840_v27 = vpop.permute.xlu1 %1839  ;;  %v2295_v1 = vsel %vm2285_vm14, %v2278_v43, %v2094_v23 }
 0x3e5   :  { %v2229_v5 = vsel %vm1030_vm7, %v2213_v58, %v1840_v27 }
 0x3e7   :  { %v4485_v38 = vpop.permute.xlu0 %1715 }
 0x3e8   :  { %v2092_v55 = vpop.permute.xlu1 %2091  ;;  %v2199_v63 = vsel %vm962_vm2, %v4266_v19, %v4485_v38 }
 0x3e9   :  { %v2294_v52 = vsel %vm2285_vm14, %v2277_v6, %v2092_v55 }
 0x3eb   :  { %v1968_v33 = vpop.permute.xlu0 %1967 }
 0x3ec   :  { %v1904_v10 = vpop.permute.xlu1 %1903 }
 0x3ed   :  { %v2245_v34 = vsel %vm1064_vm9, %v2229_v5, %v1904_v10 }
 0x3ee   :  { %v2262_v25 = vsel %vm2251_vm12, %v2245_v34, %v1968_v33 }
 0x3ef   :  { %v1718_v50 = vpop.permute.xlu0 %1717 }
 0x3f0   :  { %v2156_v18 = vpop.permute.xlu1 %2155  ;;  %v2200_v39 = vsel %vm962_vm2, %v4318_v17, %v1718_v50 }
 0x3f1   :  { %v2311_v37 = vsel %vm2302_vm15, %v2294_v52, %v2156_v18 }
 0x3f2   :  { %2941 = vmatprep.mubr.msk.f32.mxu1 %vm2332_vm0, %v2311_v37 }
 0x3f3   :  { %v1970_v51 = vpop.permute.xlu0 %1969 }
 0x3f4   :  { %v1906_v26 = vpop.permute.xlu1 %1905 }
 0x3f5   :  { %v2246_v44 = vsel %vm1064_vm9, %v2230_v56, %v1906_v26 }
 0x3f6   :  { %v2263_v13 = vsel %vm2251_vm12, %v2246_v44, %v1970_v51 }
 0x3f7   :  { %v1782_v14 = vpop.permute.xlu0 %1781 }
 0x3f8   :  { %v2158_v0 = vpop.permute.xlu1 %2157  ;;  %v2216_v53 = vsel %vm996_vm5, %v2200_v39, %v1782_v14 }
 0x3f9   :  { %v2312_v60 = vsel %vm2302_vm15, %v2295_v1, %v2158_v0 }
 0x3fa   :  { %2942 = vmatmul.mubr.msk.f32.gmra.mrb[6].mxu1 %vm2332_vm0, %v2312_v60 }
 0x3fb   :  { %v2034_v47 = vpop.permute.xlu0 %2033 }
 0x3fc   :  { %v1780_v62 = vpop.permute.xlu1 %1779  ;;  %v2280_v41 = vsel %vm2268_vm13, %v2263_v13, %v2034_v47 }
 0x3fd   :  { %v2215_v6 = vsel %vm996_vm5, %v2199_v63, %v1780_v62 }
 0x3ff   :  { %v1846_v54 = vpop.permute.xlu0 %1845 }
 0x400   :  { %v2032_v35 = vpop.permute.xlu1 %2031  ;;  %v2232_v18 = vsel %vm1030_vm7, %v2216_v53, %v1846_v54 }
 0x401   :  { %v2279_v22 = vsel %vm2268_vm13, %v2262_v25, %v2032_v35 }
 0x403   :  { %v2098_v9 = vpop.permute.xlu0 %2097 }
 0x404   :  { %v1844_v2 = vpop.permute.xlu1 %1843  ;;  %v2297_v4 = vsel %vm2285_vm14, %v2280_v41, %v2098_v9 }
 0x405   :  { %v2231_v52 = vsel %vm1030_vm7, %v2215_v6, %v1844_v2 }
 0x407   :  { %v1720_v3 = vpop.permute.xlu0 %1719 }
 0x408   :  { %v2096_v12 = vpop.permute.xlu1 %2095  ;;  %v2201_v43 = vsel %vm962_vm2, %v4331_v15, %v1720_v3 }
 0x409   :  { %v2296_v21 = vsel %vm2285_vm14, %v2279_v22, %v2096_v12 }
 0x40b   :  { %v1972_v20 = vpop.permute.xlu0 %1971 }
 0x40c   :  { %v1908_v31 = vpop.permute.xlu1 %1907 }
 0x40d   :  { %v2247_v59 = vsel %vm1064_vm9, %v2231_v52, %v1908_v31 }
 0x40e   :  { %v2264_v19 = vsel %vm2251_vm12, %v2247_v59, %v1972_v20 }
 0x40f   :  { %v1722_v57 = vpop.permute.xlu0 %1721 }
 0x410   :  { %v2160_v61 = vpop.permute.xlu1 %2159  ;;  %v2202_v5 = vsel %vm962_vm2, %v4394_v46, %v1722_v57  ;;  %v2812_v46 = vld [vmem:[%s4771_s3 + $0x3] ss:$0 sm:$0xff] }
 0x411   :  { %v2313_v29 = vsel %vm2302_vm15, %v2296_v21, %v2160_v61 }
 0x412   :  { %2944 = vmatprep.mubr.msk.f32.mxu1 %vm2332_vm0, %v2313_v29 }
 0x413   :  { %v1974_v48 = vpop.permute.xlu0 %1973 }
 0x414   :  { %v1910_v32 = vpop.permute.xlu1 %1909 }
 0x415   :  { %v2248_v37 = vsel %vm1064_vm9, %v2232_v18, %v1910_v32 }
 0x416   :  { %v2265_v38 = vsel %vm2251_vm12, %v2248_v37, %v1974_v48 }
 0x417   :  { %v1786_v36 = vpop.permute.xlu0 %1785 }
 0x418   :  { %v2162_v23 = vpop.permute.xlu1 %2161  ;;  %v2218_v34 = vsel %vm996_vm5, %v2202_v5, %v1786_v36 }
 0x419   :  { %v2314_v40 = vsel %vm2302_vm15, %v2297_v4, %v2162_v23 }
 0x41a   :  { %2945 = vmatmul.mubr.msk.f32.gmra.mrb[8].mxu1 %vm2332_vm0, %v2314_v40 }
 0x41b   :  { %v2038_v27 = vpop.permute.xlu0 %2037 }
 0x41c   :  { %v1784_v28 = vpop.permute.xlu1 %1783  ;;  %v2282_v50 = vsel %vm2268_vm13, %v2265_v38, %v2038_v27 }
 0x41d   :  { %v2217_v0 = vsel %vm996_vm5, %v2201_v43, %v1784_v28 }
 0x41f   :  { %v1850_v49 = vpop.permute.xlu0 %1849 }
 0x420   :  { %v2036_v55 = vpop.permute.xlu1 %2035  ;;  %v2234_v20 = vsel %vm1030_vm7, %v2218_v34, %v1850_v49 }
 0x421   :  { %v2281_v17 = vsel %vm2268_vm13, %v2264_v19, %v2036_v55 }
 0x423   :  { %v2102_v8 = vpop.permute.xlu0 %2101 }
 0x424   :  { %v1848_v30 = vpop.permute.xlu1 %1847  ;;  %v2299_v1 = vsel %vm2285_vm14, %v2282_v50, %v2102_v8 }
 0x425   :  { %v2233_v47 = vsel %vm1030_vm7, %v2217_v0, %v1848_v30 }
 0x427   :  { %v1914_v33 = vpop.permute.xlu0 %1913 }
 0x428   :  { %v2100_v10 = vpop.permute.xlu1 %2099  ;;  %v2250_v25 = vsel %vm1064_vm9, %v2234_v20, %v1914_v33 }
 0x429   :  { %v2298_v51 = vsel %vm2285_vm14, %v2281_v17, %v2100_v10 }
 0x42b   :  { %v2166_v24 = vpop.permute.xlu0 %2165 }
 0x42c   :  { %v1912_v42 = vpop.permute.xlu1 %1911  ;;  %v2316_v60 = vsel %vm2302_vm15, %v2299_v1, %v2166_v24 }
 0x42d   :  { %v2249_v62 = vsel %vm1064_vm9, %v2233_v47, %v1912_v42 }
 0x42f   :  { %v2040_v26 = vpop.permute.xlu0 %2039 }
 0x430   :  { %v2164_v16 = vpop.permute.xlu1 %2163 }
 0x431   :  { %v2315_v14 = vsel %vm2302_vm15, %v2298_v51, %v2164_v16 }
 0x432   :  { %2947 = vmatprep.mubr.msk.f32.mxu1 %vm2332_vm0, %v2315_v14 }
 0x433   :  { %2948 = vmatmul.mubr.msk.f32.gmra.mrb[10].mxu1 %vm2332_vm0, %v2316_v60  ;;  %v2104_v54 = vpop.permute.xlu0 %2103 }
 0x434   :  { %v1976_v35 = vpop.permute.xlu1 %1975 }
 0x435   :  { %v2266_v15 = vsel %vm2251_vm12, %v2249_v62, %v1976_v35 }
 0x436   :  { %v2283_v9 = vsel %vm2268_vm13, %v2266_v15, %v2040_v26 }
 0x437   :  { %v2300_v2 = vsel %vm2285_vm14, %v2283_v9, %v2104_v54  ;;  %v2168_v45 = vpop.permute.xlu0 %2167 }
 0x438   :  { %v1978_v3 = vpop.permute.xlu1 %1977  ;;  %v2317_v12 = vsel %vm2302_vm15, %v2300_v2, %v2168_v45 }
 0x439   :  { %2950 = vmatprep.mubr.msk.f32.mxu1 %vm2332_vm0, %v2317_v12  ;;  %v2267_v22 = vsel %vm2251_vm12, %v2250_v25, %v1978_v3 }
 0x43c   :  { %v2042_v58 = vpop.permute.xlu1 %2041 }
 0x43d   :  { %v2284_v7 = vsel %vm2268_vm13, %v2267_v22, %v2042_v58 }
 0x440   :  { %v2106_v31 = vpop.permute.xlu1 %2105 }
 0x441   :  { %v2301_v21 = vsel %vm2285_vm14, %v2284_v7, %v2106_v31 }
 0x444   :  { %v2170_v61 = vpop.permute.xlu1 %2169 }
 0x445   :  { %v2318_v11 = vsel %vm2302_vm15, %v2301_v21, %v2170_v61 }
 0x446   :  { %2951 = vmatmul.mubr.msk.f32.gmra.mrb[12].mxu1 %vm2332_vm0, %v2318_v11 }
 0x465   :  { %v2931_v57 = vpop.f32.mrb[16].mxu0 }
 0x466   :  { %v4575_v29 = vadd.f32 %v2931_v57, %v2812_v46  ;;  %v2447_v56 = vpop.f32.mrb[17].mxu0 }
 0x467   :  { %v4577_v44 = vadd.f32 %v2812_v46, %v2447_v56 }
 0x468   :  { %v2527_v48 = vsel %vm962_vm2, %v4575_v29, 0.0 }
 0x469   :  { %v2526_v32 = vsel %vm962_vm2, %v4577_v44, 0.0 }
 0x46a   :  { %v2528_v13 = vadd.f32 %v2527_v48, %v2526_v32 }
 0x475   :  { %v2934_v41 = vpop.f32.mrb[0].mxu1 }
 0x476   :  { %v2457_v4 = vpop.f32.mrb[1].mxu1  ;;  %v4583_v36 = vadd.f32 %v2934_v41, %v2812_v46 }
 0x477   :  { %v2458_v23 = vadd.f32 %v2812_v46, %v2457_v4 }
 0x478   :  { %v2531_v28 = vsel %vm962_vm2, %v4583_v36, 0.0 }
 0x479   :  { %v2529_v40 = vsel %vm962_vm2, %v2458_v23, 0.0 }
 0x47a   :  { %v2530_v27 = vadd.f32 %v2529_v40, %v2528_v13 }
 0x47c   :  { %v2532_v49 = vadd.f32 %v2531_v28, %v2530_v27 }
 0x495   :  { %v2937_v55 = vpop.f32.mrb[2].mxu1 }
 0x496   :  { %v2467_v8 = vpop.f32.mrb[3].mxu1  ;;  %v2473_v30 = vadd.f32 %v2937_v55, %v2812_v46 }
 0x497   :  { %v2468_v63 = vadd.f32 %v2812_v46, %v2467_v8 }
 0x498   :  { %v2535_v39 = vsel %vm962_vm2, %v2473_v30, 0.0 }
 0x499   :  { %v2533_v33 = vsel %vm962_vm2, %v2468_v63, 0.0 }
 0x49a   :  { %v2534_v10 = vadd.f32 %v2533_v33, %v2532_v49 }
 0x49c   :  { %v2536_v6 = vadd.f32 %v2535_v39, %v2534_v10 }
 0x4aa   :  { %v2940_v53 = vpop.f32.mrb[4].mxu1 }
 0x4ab   :  { %v2477_v52 = vpop.f32.mrb[5].mxu1  ;;  %v2483_v18 = vadd.f32 %v2940_v53, %v2812_v46 }
 0x4ac   :  { %v2478_v59 = vadd.f32 %v2812_v46, %v2477_v52 }
 0x4ad   :  { %v2539_v42 = vsel %vm962_vm2, %v2483_v18, 0.0 }
 0x4ae   :  { %v2537_v37 = vsel %vm962_vm2, %v2478_v59, 0.0 }
 0x4af   :  { %v2538_v24 = vadd.f32 %v2537_v37, %v2536_v6 }
 0x4b1   :  { %v2540_v19 = vadd.f32 %v2539_v42, %v2538_v24 }
 0x4cd   :  { %v2943_v38 = vpop.f32.mrb[6].mxu1 }
 0x4ce   :  { %v2487_v17 = vpop.f32.mrb[7].mxu1  ;;  %v2493_v50 = vadd.f32 %v2943_v38, %v2812_v46 }
 0x4cf   :  { %v2488_v51 = vadd.f32 %v2812_v46, %v2487_v17 }
 0x4d0   :  { %v2543_v43 = vsel %vm962_vm2, %v2493_v50, 0.0 }
 0x4d1   :  { %v2541_v26 = vsel %vm962_vm2, %v2488_v51, 0.0 }
 0x4d2   :  { %v2542_v16 = vadd.f32 %v2541_v26, %v2540_v19 }
 0x4d4   :  { %v2544_v1 = vadd.f32 %v2543_v43, %v2542_v16 }
 0x4ed   :  { %v2946_v14 = vpop.f32.mrb[8].mxu1 }
 0x4ee   :  { %v2497_v0 = vpop.f32.mrb[9].mxu1  ;;  %v2503_v60 = vadd.f32 %v2946_v14, %v2812_v46 }
 0x4ef   :  { %v2498_v47 = vadd.f32 %v2812_v46, %v2497_v0 }
 0x4f0   :  { %v2547_v35 = vsel %vm962_vm2, %v2503_v60, 0.0 }
 0x4f1   :  { %v2545_v62 = vsel %vm962_vm2, %v2498_v47, 0.0 }
 0x4f2   :  { %v2546_v54 = vadd.f32 %v2545_v62, %v2544_v1 }
 0x4f4   :  { %v2548_v15 = vadd.f32 %v2547_v35, %v2546_v54 }
 0x506   :  { %v2949_v9 = vpop.f32.mrb[10].mxu1 }
 0x507   :  { %v2507_v2 = vpop.f32.mrb[11].mxu1  ;;  %v2513_v45 = vadd.f32 %v2949_v9, %v2812_v46 }
 0x508   :  { %v2508_v3 = vadd.f32 %v2812_v46, %v2507_v2 }
 0x509   :  { %v2551_v5 = vsel %vm962_vm2, %v2513_v45, 0.0 }
 0x50a   :  { %v2549_v12 = vsel %vm962_vm2, %v2508_v3, 0.0 }
 0x50b   :  { %v2550_v58 = vadd.f32 %v2549_v12, %v2548_v15 }
 0x50d   :  { %v2552_v34 = vadd.f32 %v2551_v5, %v2550_v58 }
 0x519   :  { %v2952_v20 = vpop.f32.mrb[12].mxu1 }
 0x51a   :  { %v2517_v31 = vpop.f32.mrb[13].mxu1  ;;  %v2523_v25 = vadd.f32 %v2952_v20, %v2812_v46 }
 0x51b   :  { %v2518_v22 = vadd.f32 %v2812_v46, %v2517_v31 }
 0x51c   :  { %v2555_v61 = vsel %vm962_vm2, %v2523_v25, 0.0 }
 0x51d   :  { %v2553_v7 = vsel %vm962_vm2, %v2518_v22, 0.0 }
 0x51e   :  { %v2554_v21 = vadd.f32 %v2553_v7, %v2552_v34 }
 0x520   :  { %v2556_v11 = vadd.f32 %v2555_v61, %v2554_v21 }
 0x522   :  { %v2557_v57 = vrot.slane %v2556_v11, 4 }
 0x524   :  { %v2558_v56 = vadd.f32 %v2557_v57, %v2556_v11 }
 0x526   :  { %v2559_v48 = vrot.slane %v2558_v56, 2 }
 0x528   :  { %v2560_v32 = vadd.f32 %v2559_v48, %v2558_v56 }
 0x52a   :  { %v2561_v13 = vrot.slane %v2560_v32, 1 }
 0x52c   :  { %v2562_v41 = vadd.f32 %v2561_v13, %v2560_v32 }
 0x52e   :  { %v2563_v4 = vmul.f32 0.0078125, %v2562_v41 }
 0x530   :  { %v4601_v40 = vsub.f32 %v4577_v44, %v2563_v4  ;;  %v4604_v27 = vsub.f32 %v4575_v29, %v2563_v4  ;;  %v4606_v46 = vsub.f32 %v2458_v23, %v2563_v4  ;;  %v4609_v28 = vsub.f32 %v4583_v36, %v2563_v4 }
 0x531   :  { %v4611_v49 = vsub.f32 %v2468_v63, %v2563_v4  ;;  %v4613_v55 = vsub.f32 %v2473_v30, %v2563_v4  ;;  %v4615_v8 = vsub.f32 %v2478_v59, %v2563_v4  ;;  %v4617_v33 = vsub.f32 %v2483_v18, %v2563_v4 }
 0x532   :  { %v4619_v10 = vsub.f32 %v2488_v51, %v2563_v4  ;;  %v4621_v44 = vsub.f32 %v2493_v50, %v2563_v4  ;;  %v4623_v39 = vsub.f32 %v2498_v47, %v2563_v4  ;;  %v4625_v29 = vsub.f32 %v2503_v60, %v2563_v4 }
 0x533   :  { %v4627_v23 = vsub.f32 %v2508_v3, %v2563_v4  ;;  %v4629_v36 = vsub.f32 %v2513_v45, %v2563_v4  ;;  %v4631_v63 = vsub.f32 %v2518_v22, %v2563_v4  ;;  %v4633_v30 = vsub.f32 %v2523_v25, %v2563_v4 }
 0x534   :  { %v2580_v6 = vmul.f32 %v4601_v40, %v4601_v40  ;;  %v2581_v53 = vmul.f32 %v4604_v27, %v4604_v27  ;;  %v2582_v52 = vmul.f32 %v4606_v46, %v4606_v46  ;;  %v2583_v18 = vmul.f32 %v4609_v28, %v4609_v28 }
 0x535   :  { %v2584_v42 = vmul.f32 %v4611_v49, %v4611_v49  ;;  %v2585_v17 = vmul.f32 %v4613_v55, %v4613_v55  ;;  %v2586_v26 = vmul.f32 %v4615_v8, %v4615_v8  ;;  %v2587_v1 = vmul.f32 %v4617_v33, %v4617_v33 }
 0x536   :  { %v2596_v59 = vsel %vm962_vm2, %v2580_v6, 0.0  ;;  %v2597_v37 = vsel %vm962_vm2, %v2581_v53, 0.0  ;;  %v2599_v19 = vsel %vm962_vm2, %v2582_v52, 0.0  ;;  %v2601_v50 = vsel %vm962_vm2, %v2583_v18, 0.0 }
 0x537   :  { %v2598_v24 = vadd.f32 %v2597_v37, %v2596_v59  ;;  %v2603_v16 = vsel %vm962_vm2, %v2584_v42, 0.0  ;;  %v2605_v14 = vsel %vm962_vm2, %v2585_v17, 0.0  ;;  %v2588_v60 = vmul.f32 %v4619_v10, %v4619_v10 }
 0x538   :  { %v2607_v47 = vsel %vm962_vm2, %v2586_v26, 0.0  ;;  %v2589_v54 = vmul.f32 %v4621_v44, %v4621_v44  ;;  %v2609_v35 = vsel %vm962_vm2, %v2587_v1, 0.0  ;;  %v2590_v9 = vmul.f32 %v4623_v39, %v4623_v39  ;;  %v2829_v26 = vld [vmem:[%s4771_s3 + $0x4] ss:$0 sm:$0xff] }
 0x539   :  { %v2600_v38 = vadd.f32 %v2599_v19, %v2598_v24  ;;  %v2611_v2 = vsel %vm962_vm2, %v2588_v60, 0.0  ;;  %v2591_v3 = vmul.f32 %v4625_v29, %v4625_v29  ;;  %v2592_v5 = vmul.f32 %v4627_v23, %v4627_v23 }
 0x53a   :  { %v2613_v12 = vsel %vm962_vm2, %v2589_v54, 0.0  ;;  %v2615_v34 = vsel %vm962_vm2, %v2590_v9, 0.0  ;;  %v2593_v31 = vmul.f32 %v4629_v36, %v4629_v36  ;;  %v2594_v7 = vmul.f32 %v4631_v63, %v4631_v63 }
 0x53b   :  { %v2602_v51 = vadd.f32 %v2601_v50, %v2600_v38  ;;  %v2617_v25 = vsel %vm962_vm2, %v2591_v3, 0.0  ;;  %v2619_v21 = vsel %vm962_vm2, %v2592_v5, 0.0  ;;  %v2595_v11 = vmul.f32 %v4633_v30, %v4633_v30 }
 0x53c   :  { %v2621_v57 = vsel %vm962_vm2, %v2593_v31, 0.0  ;;  %v2623_v48 = vsel %vm962_vm2, %v2594_v7, 0.0 }
 0x53d   :  { %v2604_v43 = vadd.f32 %v2603_v16, %v2602_v51  ;;  %v2625_v13 = vsel %vm962_vm2, %v2595_v11, 0.0 }
 0x53f   :  { %v2606_v0 = vadd.f32 %v2605_v14, %v2604_v43 }
 0x541   :  { %v2608_v62 = vadd.f32 %v2607_v47, %v2606_v0 }
 0x543   :  { %v2610_v15 = vadd.f32 %v2609_v35, %v2608_v62 }
 0x545   :  { %v2612_v45 = vadd.f32 %v2611_v2, %v2610_v15 }
 0x547   :  { %v2614_v58 = vadd.f32 %v2613_v12, %v2612_v45 }
 0x549   :  { %v2616_v20 = vadd.f32 %v2615_v34, %v2614_v58 }
 0x54b   :  { %v2618_v22 = vadd.f32 %v2617_v25, %v2616_v20 }
 0x54d   :  { %v2620_v61 = vadd.f32 %v2619_v21, %v2618_v22 }
 0x54f   :  { %v2622_v56 = vadd.f32 %v2621_v57, %v2620_v61 }
 0x551   :  { %v2624_v32 = vadd.f32 %v2623_v48, %v2622_v56 }
 0x553   :  { %v2626_v41 = vadd.f32 %v2625_v13, %v2624_v32 }
 0x555   :  { %v2627_v4 = vrot.slane %v2626_v41, 4 }
 0x557   :  { %v2628_v6 = vadd.f32 %v2627_v4, %v2626_v41 }
 0x559   :  { %v2629_v53 = vrot.slane %v2628_v6, 2 }
 0x55b   :  { %v2630_v52 = vadd.f32 %v2629_v53, %v2628_v6 }
 0x55d   :  { %v2631_v18 = vrot.slane %v2630_v52, 1 }
 0x55f   :  { %v2632_v59 = vadd.f32 %v2631_v18, %v2630_v52 }
 0x561   :  { %v2633_v37 = vmul.f32 0.0078125, %v2632_v59 }
 0x563   :  { %v2634_v24 = vmax.f32 %v2633_v37, 0.0 }
 0x565   :  { %v2635_v42 = vadd.f32 1e-05, %v2634_v24 }
 0x567   :  { %3002 = vrsqrt.f32 %v2635_v42 }
 0x571   :  { %v3003_v19 = vpop.eup %3002 }
 0x572   :  { %v2637_v38 = vmul.f32 %v3003_v19, %v4601_v40  ;;  %v2638_v17 = vmul.f32 %v3003_v19, %v4604_v27  ;;  %v2639_v50 = vmul.f32 %v3003_v19, %v4606_v46  ;;  %v2640_v51 = vmul.f32 %v3003_v19, %v4609_v28 }
 0x573   :  { %v2641_v16 = vmul.f32 %v3003_v19, %v4611_v49  ;;  %v2642_v43 = vmul.f32 %v3003_v19, %v4613_v55  ;;  %v2643_v1 = vmul.f32 %v3003_v19, %v4615_v8  ;;  %v2644_v14 = vmul.f32 %v3003_v19, %v4617_v33 }
 0x574   :  { %v2645_v40 = vmul.f32 %v3003_v19, %v4619_v10  ;;  %v2646_v27 = vmul.f32 %v3003_v19, %v4621_v44  ;;  %v2647_v46 = vmul.f32 %v3003_v19, %v4623_v39  ;;  %v2648_v28 = vmul.f32 %v3003_v19, %v4625_v29  ;;  %v2830_v10 = vld [vmem:[%s4771_s3 + $0x5] ss:$0 sm:$0xff] }
 0x575   :  { %v2649_v0 = vmul.f32 %v3003_v19, %v4627_v23  ;;  %v2650_v60 = vmul.f32 %v3003_v19, %v4629_v36  ;;  %v2651_v49 = vmul.f32 %v3003_v19, %v4631_v63  ;;  %v2652_v55 = vmul.f32 %v3003_v19, %v4633_v30 }
 0x576   :  { %v2657_v47 = vmul.f32 %v2829_v26, %v2637_v38  ;;  %v2658_v8 = vmul.f32 %v2829_v26, %v2638_v17  ;;  %v2659_v62 = vmul.f32 %v2829_v26, %v2639_v50  ;;  %v2660_v33 = vmul.f32 %v2829_v26, %v2640_v51 }
 0x577   :  { %v2661_v44 = vmul.f32 %v2829_v26, %v2641_v16  ;;  %v2662_v39 = vmul.f32 %v2829_v26, %v2642_v43  ;;  %v2663_v54 = vmul.f32 %v2829_v26, %v2643_v1  ;;  %v2664_v29 = vmul.f32 %v2829_v26, %v2644_v14 }
 0x578   :  { %v2665_v35 = vmul.f32 %v2829_v26, %v2645_v40  ;;  %v2666_v23 = vmul.f32 %v2829_v26, %v2646_v27  ;;  %v2667_v15 = vmul.f32 %v2829_v26, %v2647_v46  ;;  %v2668_v36 = vmul.f32 %v2829_v26, %v2648_v28 }
 0x579   :  { %v2669_v9 = vmul.f32 %v2829_v26, %v2649_v0  ;;  %v2670_v63 = vmul.f32 %v2829_v26, %v2650_v60  ;;  %v2671_v2 = vmul.f32 %v2829_v26, %v2651_v49  ;;  %v2672_v30 = vmul.f32 %v2829_v26, %v2652_v55 }
 0x57a   :  { %v2677_v45 = vadd.f32 %v2830_v10, %v2657_v47  ;;  %v2678_v3 = vadd.f32 %v2830_v10, %v2658_v8  ;;  %v2679_v12 = vadd.f32 %v2830_v10, %v2659_v62  ;;  %v2680_v58 = vadd.f32 %v2830_v10, %v2660_v33 }
 0x57b   :  { %v2681_v5 = vadd.f32 %v2830_v10, %v2661_v44  ;;  %v2682_v34 = vadd.f32 %v2830_v10, %v2662_v39  ;;  %v2683_v20 = vadd.f32 %v2830_v10, %v2663_v54  ;;  %v2684_v31 = vadd.f32 %v2830_v10, %v2664_v29 }
 0x57c   :  { %v2685_v25 = vadd.f32 %v2830_v10, %v2665_v35  ;;  %v2686_v22 = vadd.f32 %v2830_v10, %v2666_v23  ;;  %v2687_v7 = vadd.f32 %v2830_v10, %v2667_v15  ;;  %v2688_v21 = vadd.f32 %v2830_v10, %v2668_v36 }
 0x57d   :  { %v2689_v61 = vadd.f32 %v2830_v10, %v2669_v9  ;;  %v2690_v11 = vadd.f32 %v2830_v10, %v2670_v63  ;;  %v2691_v57 = vadd.f32 %v2830_v10, %v2671_v2  ;;  %v2692_v56 = vadd.f32 %v2830_v10, %v2672_v30 }
 0x57e   :  { %v2693_v48 = vmax.f32 %v2677_v45, 0.0  ;;  %v2694_v32 = vmax.f32 %v2678_v3, 0.0  ;;  %v2695_v13 = vmax.f32 %v2679_v12, 0.0  ;;  %v2696_v41 = vmax.f32 %v2680_v58, 0.0 }
 0x57f   :  { %v2697_v4 = vmax.f32 %v2681_v5, 0.0  ;;  %v2698_v6 = vmax.f32 %v2682_v34, 0.0  ;;  %v2699_v53 = vmax.f32 %v2683_v20, 0.0  ;;  %v2700_v52 = vmax.f32 %v2684_v31, 0.0 }
 0x580   :  { %v2701_v18 = vmax.f32 %v2685_v25, 0.0  ;;  %v2702_v59 = vmax.f32 %v2686_v22, 0.0  ;;  %v2703_v37 = vmax.f32 %v2687_v7, 0.0  ;;  %v2704_v24 = vmax.f32 %v2688_v21, 0.0  ;;  %2709 = vst.msk [vmem:[%s4773_s4] sm:$0xff] %vm962_vm2, %v2693_v48  ;;  %2710 = vst.msk [vmem:[%s4773_s4 + $0x8] sm:$0xff] %vm962_vm2, %v2694_v32 }
 0x581   :  { %2711 = vst.msk [vmem:[%s4773_s4 + $0x10] sm:$0xff] %vm962_vm2, %v2695_v13  ;;  %2712 = vst.msk [vmem:[%s4773_s4 + $0x18] sm:$0xff] %vm962_vm2, %v2696_v41  ;;  %v2705_v42 = vmax.f32 %v2689_v61, 0.0  ;;  %v2706_v19 = vmax.f32 %v2690_v11, 0.0  ;;  %v2707_v38 = vmax.f32 %v2691_v57, 0.0  ;;  %v2708_v17 = vmax.f32 %v2692_v56, 0.0 }
 0x582   :  { %2713 = vst.msk [vmem:[%s4773_s4 + $0x20] sm:$0xff] %vm962_vm2, %v2697_v4  ;;  %2714 = vst.msk [vmem:[%s4773_s4 + $0x28] sm:$0xff] %vm962_vm2, %v2698_v6 }
 0x583   :  { %2715 = vst.msk [vmem:[%s4773_s4 + $0x30] sm:$0xff] %vm962_vm2, %v2699_v53  ;;  %2716 = vst.msk [vmem:[%s4773_s4 + $0x38] sm:$0xff] %vm962_vm2, %v2700_v52 }
 0x584   :  { %2717 = vst.msk [vmem:[%s4773_s4 + $0x40] sm:$0xff] %vm962_vm2, %v2701_v18  ;;  %2718 = vst.msk [vmem:[%s4773_s4 + $0x48] sm:$0xff] %vm962_vm2, %v2702_v59 }
 0x585   :  { %2719 = vst.msk [vmem:[%s4773_s4 + $0x50] sm:$0xff] %vm962_vm2, %v2703_v37  ;;  %2720 = vst.msk [vmem:[%s4773_s4 + $0x58] sm:$0xff] %vm962_vm2, %v2704_v24 }
 0x586   :  { %2721 = vst.msk [vmem:[%s4773_s4 + $0x60] sm:$0xff] %vm962_vm2, %v2705_v42  ;;  %2722 = vst.msk [vmem:[%s4773_s4 + $0x68] sm:$0xff] %vm962_vm2, %v2706_v19 }
 0x587   :  { %2723 = vst.msk [vmem:[%s4773_s4 + $0x70] sm:$0xff] %vm962_vm2, %v2707_v38  ;;  %2724 = vst.msk [vmem:[%s4773_s4 + $0x78] sm:$0xff] %vm962_vm2, %v2708_v17 }

</bundles_post_ra>
